<compile_context>
chip_gen: v7x
topology: tpu7x:2x2x1
jax: 0.10.0
libtpu: 0.0.40
codegen_flags: <defaults>
</compile_context>

<pallas_src>
import functools
import math

import jax
import jax.numpy as jnp
from jax.experimental import pallas as pl
from jax.experimental.pallas import tpu as pltpu

# ----------------------------- model config -----------------------------
VOCAB = 32
D_MODEL = 32
N_HEADS = 4
D_HEAD = D_MODEL // N_HEADS
D_FF = 64
MAX_LEN = 16
PADDING_VALUE = 0

# Canonical ordering of parameter tensors fed to the fused kernel.
PARAM_ORDER = (
    "src_emb", "tgt_emb", "pos_emb",
    "enc_wqkv", "enc_bqkv", "enc_wo", "enc_bo",
    "enc_ln1_g", "enc_ln1_b",
    "enc_ff_w1", "enc_ff_b1", "enc_ff_w2", "enc_ff_b2",
    "enc_ln2_g", "enc_ln2_b",
    "dec_wqkv", "dec_bqkv", "dec_wo", "dec_bo",
    "dec_ln1_g", "dec_ln1_b",
    "dcx_wq", "dcx_bq", "dcx_wkv", "dcx_bkv", "dcx_wo", "dcx_bo",
    "dec_ln2_g", "dec_ln2_b",
    "dec_ff_w1", "dec_ff_b1", "dec_ff_w2", "dec_ff_b2",
    "dec_ln3_g", "dec_ln3_b",
    "out_w", "out_b",
)


# ----------------------------- fused kernel ------------------------------
def _s2s_kernel(*refs, batch, s_src, s_tgt, padding_value):
    B, Ss, T, D = batch, s_src, s_tgt, D_MODEL
    f32 = jnp.float32
    NEG = f32(-1e9)
    ZERO = f32(0.0)

    src_ref, src_col_ref, tgt_ref, tgt_col_ref = refs[:4]
    p = dict(zip(PARAM_ORDER, refs[4:4 + len(PARAM_ORDER)]))
    logits_ref = refs[4 + len(PARAM_ORDER)]

    # ---- raw tokens (for in-kernel mask building) ----
    src_tok = src_ref[...]                                  # [B, Ss] int32
    tgt_tok = tgt_ref[...]                                  # [B, T]  int32

    # causal (lower-triangular) structure for decoder self-attention
    rows = jax.lax.broadcasted_iota(jnp.int32, (T, T), 0)
    cols = jax.lax.broadcasted_iota(jnp.int32, (T, T), 1)
    causal = cols <= rows                                   # [T, T] bool

    # ---- helpers (all trace-time Python; fully unrolled, static shapes) ----
    def embed_tokens(col_tok, table_ref):
        # one-hot matmul gather: col_tok [N,1] int32, table [VOCAB, D]
        n = col_tok.shape[0]
        iota = jax.lax.broadcasted_iota(jnp.int32, (n, VOCAB), 1)
        onehot = (iota == col_tok).astype(f32)
        return jnp.dot(onehot, table_ref[...], preferred_element_type=f32)

    def layer_norm(x, g_ref, b_ref):
        mu = jnp.mean(x, axis=-1, keepdims=True)
        var = jnp.mean(jnp.square(x - mu), axis=-1, keepdims=True)
        return (x - mu) * jax.lax.rsqrt(var + f32(1e-5)) * g_ref[...] + b_ref[...]

    def softmax_rows(s):
        m = jnp.max(s, axis=-1, keepdims=True)
        e = jnp.exp(s - m)
        return e * pl.reciprocal(jnp.sum(e, axis=-1, keepdims=True), approx=True)

    def mha(q2d, k2d, v2d, bias_fn, Sq, Sk, wo_ref, bo_ref):
        # q2d: [B*Sq, D]; k2d/v2d: [B*Sk, D]; heads live as lane slices (no transposes).
        outs = []
        for b in range(B):
            qb = q2d[b * Sq:(b + 1) * Sq, :]
            kb = k2d[b * Sk:(b + 1) * Sk, :]
            vb = v2d[b * Sk:(b + 1) * Sk, :]
            bias_b = bias_fn(b)                             # broadcastable to [Sq, Sk]
            heads = []
            for h in range(N_HEADS):
                lo, hi = h * D_HEAD, (h + 1) * D_HEAD
                s = jax.lax.dot_general(qb[:, lo:hi], kb[:, lo:hi],
                                        (((1,), (1,)), ((), ())),
                                        preferred_element_type=f32)
                pr = softmax_rows(s + bias_b)
                heads.append(jnp.dot(pr, vb[:, lo:hi], preferred_element_type=f32))
            outs.append(jnp.concatenate(heads, axis=-1))    # [Sq, D]
        o = jnp.concatenate(outs, axis=0)                   # [B*Sq, D]
        return jnp.dot(o, wo_ref[...], preferred_element_type=f32) + bo_ref[...]

    def ffn(x, w1_ref, b1_ref, w2_ref, b2_ref):
        h = jnp.dot(x, w1_ref[...], preferred_element_type=f32) + b1_ref[...]
        h = jnp.maximum(h, ZERO)
        return jnp.dot(h, w2_ref[...], preferred_element_type=f32) + b2_ref[...]

    emb_scale = f32(math.sqrt(D_MODEL))

    # =========================== encoder ===========================
    pos_src = jnp.concatenate([p["pos_emb"][0:Ss, :]] * B, axis=0)       # [B*Ss, D]
    x = embed_tokens(src_col_ref[...], p["src_emb"]) * emb_scale + pos_src

    qkv = jnp.dot(x, p["enc_wqkv"][...], preferred_element_type=f32) + p["enc_bqkv"][...]
    q, k, v = qkv[:, 0:D], qkv[:, D:2 * D], qkv[:, 2 * D:3 * D]

    def enc_bias(b):   # src pad mask on keys (== make_src_mask broadcast)
        return jnp.where(src_tok[b:b + 1, :] != padding_value, ZERO, NEG)   # [1, Ss]

    a = mha(q, k, v, enc_bias, Ss, Ss, p["enc_wo"], p["enc_bo"])
    x = layer_norm(x + a, p["enc_ln1_g"], p["enc_ln1_b"])
    x = layer_norm(x + ffn(x, p["enc_ff_w1"], p["enc_ff_b1"],
                           p["enc_ff_w2"], p["enc_ff_b2"]),
                   p["enc_ln2_g"], p["enc_ln2_b"])
    enc_out = x                                                            # [B*Ss, D]

    # =========================== decoder ===========================
    pos_tgt = jnp.concatenate([p["pos_emb"][0:T, :]] * B, axis=0)          # [B*T, D]
    y = embed_tokens(tgt_col_ref[...], p["tgt_emb"]) * emb_scale + pos_tgt

    qkv = jnp.dot(y, p["dec_wqkv"][...], preferred_element_type=f32) + p["dec_bqkv"][...]
    q, k, v = qkv[:, 0:D], qkv[:, D:2 * D], qkv[:, 2 * D:3 * D]

    def dec_self_bias(b):   # causal AND tgt pad-on-keys (== make_tgt_mask)
        keep = jnp.logical_and(causal, tgt_tok[b:b + 1, :] != padding_value)  # [T, T]
        return jnp.where(keep, ZERO, NEG)

    a = mha(q, k, v, dec_self_bias, T, T, p["dec_wo"], p["dec_bo"])
    y = layer_norm(y + a, p["dec_ln1_g"], p["dec_ln1_b"])

    qx = jnp.dot(y, p["dcx_wq"][...], preferred_element_type=f32) + p["dcx_bq"][...]
    kvx = jnp.dot(enc_out, p["dcx_wkv"][...], preferred_element_type=f32) + p["dcx_bkv"][...]
    kx, vx = kvx[:, 0:D], kvx[:, D:2 * D]

    def cross_bias(b):   # src pad mask on keys
        return jnp.where(src_tok[b:b + 1, :] != padding_value, ZERO, NEG)   # [1, Ss]

    c = mha(qx, kx, vx, cross_bias, T, Ss, p["dcx_wo"], p["dcx_bo"])
    y = layer_norm(y + c, p["dec_ln2_g"], p["dec_ln2_b"])
    y = layer_norm(y + ffn(y, p["dec_ff_w1"], p["dec_ff_b1"],
                           p["dec_ff_w2"], p["dec_ff_b2"]),
                   p["dec_ln3_g"], p["dec_ln3_b"])

    logits = jnp.dot(y, p["out_w"][...], preferred_element_type=f32) + p["out_b"][...]
    logits_ref[...] = logits.astype(logits_ref.dtype)


# ----------------------------- wrapper ------------------------------------
def _full_spec(shape):
    nd = len(shape)
    return pl.BlockSpec(shape, lambda i, _nd=nd: (0,) * _nd)


def s2s_forward(params, src, tgt, padding_value=PADDING_VALUE):
    """Mirrors S2S.forward: masks built in-kernel, decoder(tgt, encoder(src)) fused."""
    B, Ss = src.shape
    T = tgt.shape[1]
    src = src.astype(jnp.int32)
    tgt = tgt.astype(jnp.int32)
    src_col = src.reshape(B * Ss, 1)   # column form for one-hot embedding gather
    tgt_col = tgt.reshape(B * T, 1)

    args = [src, src_col, tgt, tgt_col] + [params[name] for name in PARAM_ORDER]

    kernel = functools.partial(_s2s_kernel, batch=B, s_src=Ss, s_tgt=T,
                               padding_value=padding_value)
    logits = pl.pallas_call(
        kernel,
        out_shape=jax.ShapeDtypeStruct((B * T, VOCAB), jnp.float32),
        grid=(1,),
        in_specs=[_full_spec(a.shape) for a in args],
        out_specs=_full_spec((B * T, VOCAB)),
        compiler_params=pltpu.CompilerParams(dimension_semantics=("arbitrary",)),
    )(*args)
    return logits.reshape(B, T, VOCAB)


# ----------------------------- parameter init ----------------------------
def init_params(key):
    keys = iter(jax.random.split(key, 32))

    def dense(din, dout):
        # xavier-normal-like (matches S2S.init_parameters intent for dim>1 params)
        std = math.sqrt(2.0 / (din + dout))
        return jax.random.normal(next(keys), (din, dout), jnp.float32) * std

    D = D_MODEL
    qscale = 1.0 / math.sqrt(D_HEAD)   # folded into Wq (and zero bq) at staging time

    p = {
        "src_emb": jax.random.normal(next(keys), (VOCAB, D), jnp.float32) * 0.02,
        "tgt_emb": jax.random.normal(next(keys), (VOCAB, D), jnp.float32) * 0.02,
        "pos_emb": jax.random.normal(next(keys), (MAX_LEN, D), jnp.float32) * 0.02,
    }

    # encoder / decoder self-attention: fused [D, 3D] QKV with scale folded into Q
    for prefix in ("enc", "dec"):
        wq, wk, wv = dense(D, D), dense(D, D), dense(D, D)
        p[f"{prefix}_wqkv"] = jnp.concatenate([wq * qscale, wk, wv], axis=1)
        p[f"{prefix}_bqkv"] = jnp.zeros((1, 3 * D), jnp.float32)
        p[f"{prefix}_wo"] = dense(D, D)
        p[f"{prefix}_bo"] = jnp.zeros((1, D), jnp.float32)

    # decoder cross-attention: Q from decoder state, fused [D, 2D] KV from encoder out
    p["dcx_wq"] = dense(D, D) * qscale
    p["dcx_bq"] = jnp.zeros((1, D), jnp.float32)
    p["dcx_wkv"] = jnp.concatenate([dense(D, D), dense(D, D)], axis=1)
    p["dcx_bkv"] = jnp.zeros((1, 2 * D), jnp.float32)
    p["dcx_wo"] = dense(D, D)
    p["dcx_bo"] = jnp.zeros((1, D), jnp.float32)

    for prefix in ("enc", "dec"):
        p[f"{prefix}_ff_w1"] = dense(D, D_FF)
        p[f"{prefix}_ff_b1"] = jnp.zeros((1, D_FF), jnp.float32)
        p[f"{prefix}_ff_w2"] = dense(D_FF, D)
        p[f"{prefix}_ff_b2"] = jnp.zeros((1, D), jnp.float32)

    for name in ("enc_ln1", "enc_ln2", "dec_ln1", "dec_ln2", "dec_ln3"):
        p[f"{name}_g"] = jnp.ones((1, D), jnp.float32)
        p[f"{name}_b"] = jnp.zeros((1, D), jnp.float32)

    p["out_w"] = dense(D, VOCAB)
    p["out_b"] = jnp.zeros((1, VOCAB), jnp.float32)
    return p


# ----------------------------- main --------------------------------------
if __name__ == "__main__":
    key = jax.random.PRNGKey(0)
    k_param, k_src, k_tgt = jax.random.split(key, 3)

    params = init_params(k_param)

    B, S_SRC, S_TGT = 2, 8, 8
    src = jax.random.randint(k_src, (B, S_SRC), 1, VOCAB, dtype=jnp.int32)
    tgt = jax.random.randint(k_tgt, (B, S_TGT), 1, VOCAB, dtype=jnp.int32)
    # introduce padding tokens so both pad masks are exercised
    src = src.at[1, -3:].set(PADDING_VALUE)
    tgt = tgt.at[1, -2:].set(PADDING_VALUE)

    fwd = jax.jit(functools.partial(s2s_forward, padding_value=PADDING_VALUE))
    logits = fwd(params, src, tgt)
    jax.block_until_ready(logits)

    assert logits.shape == (B, S_TGT, VOCAB), logits.shape
    assert bool(jnp.all(jnp.isfinite(logits)))
    # TODO(synk): train_batch / backward / optimizer step are training APIs, not part of the forward kernel.
    print("KERNEL_OK")
</pallas_src>

<mosaic_0001>
module attributes {stable_mosaic.version = 11 : i64} {
  func.func @_s2s_kernel(%arg0: i32, %arg1: memref<2x8xi32, #tpu.memory_space<vmem>>, %arg2: memref<16x1xi32, #tpu.memory_space<vmem>>, %arg3: memref<2x8xi32, #tpu.memory_space<vmem>>, %arg4: memref<16x1xi32, #tpu.memory_space<vmem>>, %arg5: memref<32x32xf32, #tpu.memory_space<vmem>>, %arg6: memref<32x32xf32, #tpu.memory_space<vmem>>, %arg7: memref<16x32xf32, #tpu.memory_space<vmem>>, %arg8: memref<32x96xf32, #tpu.memory_space<vmem>>, %arg9: memref<1x96xf32, #tpu.memory_space<vmem>>, %arg10: memref<32x32xf32, #tpu.memory_space<vmem>>, %arg11: memref<1x32xf32, #tpu.memory_space<vmem>>, %arg12: memref<1x32xf32, #tpu.memory_space<vmem>>, %arg13: memref<1x32xf32, #tpu.memory_space<vmem>>, %arg14: memref<32x64xf32, #tpu.memory_space<vmem>>, %arg15: memref<1x64xf32, #tpu.memory_space<vmem>>, %arg16: memref<64x32xf32, #tpu.memory_space<vmem>>, %arg17: memref<1x32xf32, #tpu.memory_space<vmem>>, %arg18: memref<1x32xf32, #tpu.memory_space<vmem>>, %arg19: memref<1x32xf32, #tpu.memory_space<vmem>>, %arg20: memref<32x96xf32, #tpu.memory_space<vmem>>, %arg21: memref<1x96xf32, #tpu.memory_space<vmem>>, %arg22: memref<32x32xf32, #tpu.memory_space<vmem>>, %arg23: memref<1x32xf32, #tpu.memory_space<vmem>>, %arg24: memref<1x32xf32, #tpu.memory_space<vmem>>, %arg25: memref<1x32xf32, #tpu.memory_space<vmem>>, %arg26: memref<32x32xf32, #tpu.memory_space<vmem>>, %arg27: memref<1x32xf32, #tpu.memory_space<vmem>>, %arg28: memref<32x64xf32, #tpu.memory_space<vmem>>, %arg29: memref<1x64xf32, #tpu.memory_space<vmem>>, %arg30: memref<32x32xf32, #tpu.memory_space<vmem>>, %arg31: memref<1x32xf32, #tpu.memory_space<vmem>>, %arg32: memref<1x32xf32, #tpu.memory_space<vmem>>, %arg33: memref<1x32xf32, #tpu.memory_space<vmem>>, %arg34: memref<32x64xf32, #tpu.memory_space<vmem>>, %arg35: memref<1x64xf32, #tpu.memory_space<vmem>>, %arg36: memref<64x32xf32, #tpu.memory_space<vmem>>, %arg37: memref<1x32xf32, #tpu.memory_space<vmem>>, %arg38: memref<1x32xf32, #tpu.memory_space<vmem>>, %arg39: memref<1x32xf32, #tpu.memory_space<vmem>>, %arg40: memref<32x32xf32, #tpu.memory_space<vmem>>, %arg41: memref<1x32xf32, #tpu.memory_space<vmem>>, %arg42: memref<16x32xf32, #tpu.memory_space<vmem>>) attributes {dimension_semantics = [#tpu.dimension_semantics<arbitrary>], iteration_bounds = array<i64: 1>, scalar_prefetch = 0 : i64, scratch_operands = 0 : i64, tpu.core_type = #tpu.core_type<tc>, window_params = [{pipeline_mode = #tpu.pipeline_mode<synchronous>, transform_indices = @transform_0, window_bounds = array<i64: 2, 8>}, {pipeline_mode = #tpu.pipeline_mode<synchronous>, transform_indices = @transform_1, window_bounds = array<i64: 16, 1>}, {pipeline_mode = #tpu.pipeline_mode<synchronous>, transform_indices = @transform_2, window_bounds = array<i64: 2, 8>}, {pipeline_mode = #tpu.pipeline_mode<synchronous>, transform_indices = @transform_3, window_bounds = array<i64: 16, 1>}, {pipeline_mode = #tpu.pipeline_mode<synchronous>, transform_indices = @transform_4, window_bounds = array<i64: 32, 32>}, {pipeline_mode = #tpu.pipeline_mode<synchronous>, transform_indices = @transform_5, window_bounds = array<i64: 32, 32>}, {pipeline_mode = #tpu.pipeline_mode<synchronous>, transform_indices = @transform_6, window_bounds = array<i64: 16, 32>}, {pipeline_mode = #tpu.pipeline_mode<synchronous>, transform_indices = @transform_7, window_bounds = array<i64: 32, 96>}, {pipeline_mode = #tpu.pipeline_mode<synchronous>, transform_indices = @transform_8, window_bounds = array<i64: 1, 96>}, {pipeline_mode = #tpu.pipeline_mode<synchronous>, transform_indices = @transform_9, window_bounds = array<i64: 32, 32>}, {pipeline_mode = #tpu.pipeline_mode<synchronous>, transform_indices = @transform_10, window_bounds = array<i64: 1, 32>}, {pipeline_mode = #tpu.pipeline_mode<synchronous>, transform_indices = @transform_11, window_bounds = array<i64: 1, 32>}, {pipeline_mode = #tpu.pipeline_mode<synchronous>, transform_indices = @transform_12, window_bounds = array<i64: 1, 32>}, {pipeline_mode = #tpu.pipeline_mode<synchronous>, transform_indices = @transform_13, window_bounds = array<i64: 32, 64>}, {pipeline_mode = #tpu.pipeline_mode<synchronous>, transform_indices = @transform_14, window_bounds = array<i64: 1, 64>}, {pipeline_mode = #tpu.pipeline_mode<synchronous>, transform_indices = @transform_15, window_bounds = array<i64: 64, 32>}, {pipeline_mode = #tpu.pipeline_mode<synchronous>, transform_indices = @transform_16, window_bounds = array<i64: 1, 32>}, {pipeline_mode = #tpu.pipeline_mode<synchronous>, transform_indices = @transform_17, window_bounds = array<i64: 1, 32>}, {pipeline_mode = #tpu.pipeline_mode<synchronous>, transform_indices = @transform_18, window_bounds = array<i64: 1, 32>}, {pipeline_mode = #tpu.pipeline_mode<synchronous>, transform_indices = @transform_19, window_bounds = array<i64: 32, 96>}, {pipeline_mode = #tpu.pipeline_mode<synchronous>, transform_indices = @transform_20, window_bounds = array<i64: 1, 96>}, {pipeline_mode = #tpu.pipeline_mode<synchronous>, transform_indices = @transform_21, window_bounds = array<i64: 32, 32>}, {pipeline_mode = #tpu.pipeline_mode<synchronous>, transform_indices = @transform_22, window_bounds = array<i64: 1, 32>}, {pipeline_mode = #tpu.pipeline_mode<synchronous>, transform_indices = @transform_23, window_bounds = array<i64: 1, 32>}, {pipeline_mode = #tpu.pipeline_mode<synchronous>, transform_indices = @transform_24, window_bounds = array<i64: 1, 32>}, {pipeline_mode = #tpu.pipeline_mode<synchronous>, transform_indices = @transform_25, window_bounds = array<i64: 32, 32>}, {pipeline_mode = #tpu.pipeline_mode<synchronous>, transform_indices = @transform_26, window_bounds = array<i64: 1, 32>}, {pipeline_mode = #tpu.pipeline_mode<synchronous>, transform_indices = @transform_27, window_bounds = array<i64: 32, 64>}, {pipeline_mode = #tpu.pipeline_mode<synchronous>, transform_indices = @transform_28, window_bounds = array<i64: 1, 64>}, {pipeline_mode = #tpu.pipeline_mode<synchronous>, transform_indices = @transform_29, window_bounds = array<i64: 32, 32>}, {pipeline_mode = #tpu.pipeline_mode<synchronous>, transform_indices = @transform_30, window_bounds = array<i64: 1, 32>}, {pipeline_mode = #tpu.pipeline_mode<synchronous>, transform_indices = @transform_31, window_bounds = array<i64: 1, 32>}, {pipeline_mode = #tpu.pipeline_mode<synchronous>, transform_indices = @transform_32, window_bounds = array<i64: 1, 32>}, {pipeline_mode = #tpu.pipeline_mode<synchronous>, transform_indices = @transform_33, window_bounds = array<i64: 32, 64>}, {pipeline_mode = #tpu.pipeline_mode<synchronous>, transform_indices = @transform_34, window_bounds = array<i64: 1, 64>}, {pipeline_mode = #tpu.pipeline_mode<synchronous>, transform_indices = @transform_35, window_bounds = array<i64: 64, 32>}, {pipeline_mode = #tpu.pipeline_mode<synchronous>, transform_indices = @transform_36, window_bounds = array<i64: 1, 32>}, {pipeline_mode = #tpu.pipeline_mode<synchronous>, transform_indices = @transform_37, window_bounds = array<i64: 1, 32>}, {pipeline_mode = #tpu.pipeline_mode<synchronous>, transform_indices = @transform_38, window_bounds = array<i64: 1, 32>}, {pipeline_mode = #tpu.pipeline_mode<synchronous>, transform_indices = @transform_39, window_bounds = array<i64: 32, 32>}, {pipeline_mode = #tpu.pipeline_mode<synchronous>, transform_indices = @transform_40, window_bounds = array<i64: 1, 32>}, {pipeline_mode = #tpu.pipeline_mode<synchronous>, transform_indices = @transform_41, window_bounds = array<i64: 16, 32>}]} {
    %c0 = arith.constant 0 : index
    %c0_0 = arith.constant 0 : index
    %0 = vector.load %arg1[%c0, %c0_0] : memref<2x8xi32, #tpu.memory_space<vmem>>, vector<2x8xi32>
    %c0_1 = arith.constant 0 : index
    %c0_2 = arith.constant 0 : index
    %1 = vector.load %arg3[%c0_1, %c0_2] : memref<2x8xi32, #tpu.memory_space<vmem>>, vector<2x8xi32>
    %2 = tpu.iota {dimensions = array<i32: 0>} : vector<8x8xi32>
    %3 = tpu.iota {dimensions = array<i32: 1>} : vector<8x8xi32>
    %4 = arith.cmpi sle, %3, %2 : vector<8x8xi32>
    %c0_3 = arith.constant 0 : index
    %c0_4 = arith.constant 0 : index
    %5 = vector.load %arg7[%c0_3, %c0_4] : memref<16x32xf32, #tpu.memory_space<vmem>>, vector<8x32xf32>
    %6 = tpu.concatenate %5, %5 in 0 : vector<8x32xf32>, vector<8x32xf32> -> vector<16x32xf32>
    %c0_5 = arith.constant 0 : index
    %c0_6 = arith.constant 0 : index
    %7 = vector.load %arg2[%c0_5, %c0_6] : memref<16x1xi32, #tpu.memory_space<vmem>>, vector<16x1xi32>
    %8 = tpu.iota {dimensions = array<i32: 1>} : vector<16x32xi32>
    %9 = vector.broadcast %7 : vector<16x1xi32> to vector<16x32xi32>
    %10 = arith.cmpi eq, %8, %9 : vector<16x32xi32>
    %11 = arith.extui %10 : vector<16x32xi1> to vector<16x32xi32>
    %12 = arith.sitofp %11 : vector<16x32xi32> to vector<16x32xf32>
    %c0_7 = arith.constant 0 : index
    %c0_8 = arith.constant 0 : index
    %13 = vector.load %arg5[%c0_7, %c0_8] : memref<32x32xf32, #tpu.memory_space<vmem>>, vector<32x32xf32>
    %cst = arith.constant dense<0.000000e+00> : vector<16x32xf32>
    %14 = tpu.matmul %12, %13, %cst {dimension_numbers = #tpu.dot_dimension_numbers<[1], [0], [0], [1], [0, 0, 1, 1], [], []>} : vector<16x32xf32>, vector<32x32xf32>, vector<16x32xf32> -> vector<16x32xf32>
    %cst_9 = arith.constant 5.65685415 : f32
    %15 = vector.broadcast %cst_9 : f32 to vector<16x32xf32>
    %16 = arith.mulf %14, %15 : vector<16x32xf32>
    %17 = arith.addf %16, %6 : vector<16x32xf32>
    %c0_10 = arith.constant 0 : index
    %c0_11 = arith.constant 0 : index
    %18 = vector.load %arg8[%c0_10, %c0_11] : memref<32x96xf32, #tpu.memory_space<vmem>>, vector<32x96xf32>
    %cst_12 = arith.constant dense<0.000000e+00> : vector<16x96xf32>
    %19 = tpu.matmul %17, %18, %cst_12 {dimension_numbers = #tpu.dot_dimension_numbers<[1], [0], [0], [1], [0, 0, 1, 1], [], []>} : vector<16x32xf32>, vector<32x96xf32>, vector<16x96xf32> -> vector<16x96xf32>
    %c0_13 = arith.constant 0 : index
    %c0_14 = arith.constant 0 : index
    %20 = vector.load %arg9[%c0_13, %c0_14] : memref<1x96xf32, #tpu.memory_space<vmem>>, vector<1x96xf32>
    %21 = vector.broadcast %20 : vector<1x96xf32> to vector<16x96xf32>
    %22 = arith.addf %19, %21 : vector<16x96xf32>
    %23 = vector.extract_strided_slice %22 {offsets = [0, 0], sizes = [16, 32], strides = [1, 1]} : vector<16x96xf32> to vector<16x32xf32>
    %24 = vector.extract_strided_slice %22 {offsets = [0, 32], sizes = [16, 32], strides = [1, 1]} : vector<16x96xf32> to vector<16x32xf32>
    %25 = vector.extract_strided_slice %22 {offsets = [0, 64], sizes = [16, 32], strides = [1, 1]} : vector<16x96xf32> to vector<16x32xf32>
    %26 = vector.extract_strided_slice %23 {offsets = [0, 0], sizes = [8, 32], strides = [1, 1]} : vector<16x32xf32> to vector<8x32xf32>
    %27 = vector.extract_strided_slice %24 {offsets = [0, 0], sizes = [8, 32], strides = [1, 1]} : vector<16x32xf32> to vector<8x32xf32>
    %28 = vector.extract_strided_slice %25 {offsets = [0, 0], sizes = [8, 32], strides = [1, 1]} : vector<16x32xf32> to vector<8x32xf32>
    %29 = vector.extract_strided_slice %0 {offsets = [0, 0], sizes = [1, 8], strides = [1, 1]} : vector<2x8xi32> to vector<1x8xi32>
    %c0_i32 = arith.constant 0 : i32
    %30 = vector.broadcast %c0_i32 : i32 to vector<1x8xi32>
    %31 = arith.cmpi ne, %29, %30 : vector<1x8xi32>
    %cst_15 = arith.constant 0.000000e+00 : f32
    %cst_16 = arith.constant -1.000000e+09 : f32
    %32 = vector.broadcast %cst_15 : f32 to vector<1x8xf32>
    %33 = vector.broadcast %cst_16 : f32 to vector<1x8xf32>
    %34 = arith.select %31, %32, %33 : vector<1x8xi1>, vector<1x8xf32>
    %35 = vector.extract_strided_slice %26 {offsets = [0, 0], sizes = [8, 8], strides = [1, 1]} : vector<8x32xf32> to vector<8x8xf32>
    %36 = vector.extract_strided_slice %27 {offsets = [0, 0], sizes = [8, 8], strides = [1, 1]} : vector<8x32xf32> to vector<8x8xf32>
    %cst_17 = arith.constant dense<0.000000e+00> : vector<8x8xf32>
    %37 = tpu.matmul %35, %36, %cst_17 {dimension_numbers = #tpu.dot_dimension_numbers<[1], [1], [0], [0], [0, 0, 1, 0], [], []>} : vector<8x8xf32>, vector<8x8xf32>, vector<8x8xf32> -> vector<8x8xf32>
    %38 = vector.broadcast %34 : vector<1x8xf32> to vector<8x8xf32>
    %39 = arith.addf %37, %38 : vector<8x8xf32>
    %cst_18 = arith.constant dense<0xFF800000> : vector<8xf32>
    %40 = vector.multi_reduction <maximumf>, %39, %cst_18 [1] : vector<8x8xf32> to vector<8xf32>
    %41 = vector.shape_cast %40 : vector<8xf32> to vector<8x1xf32>
    %42 = vector.broadcast %41 : vector<8x1xf32> to vector<8x8xf32>
    %43 = arith.subf %39, %42 : vector<8x8xf32>
    %44 = math.exp %43 : vector<8x8xf32>
    %cst_19 = arith.constant dense<0.000000e+00> : vector<8xf32>
    %45 = vector.multi_reduction <add>, %44, %cst_19 [1] : vector<8x8xf32> to vector<8xf32>
    %46 = vector.shape_cast %45 : vector<8xf32> to vector<8x1xf32>
    %47 = tpu.reciprocal %46 {approx = true} : vector<8x1xf32> -> vector<8x1xf32>
    %48 = vector.broadcast %47 : vector<8x1xf32> to vector<8x8xf32>
    %49 = arith.mulf %44, %48 : vector<8x8xf32>
    %50 = vector.extract_strided_slice %28 {offsets = [0, 0], sizes = [8, 8], strides = [1, 1]} : vector<8x32xf32> to vector<8x8xf32>
    %cst_20 = arith.constant dense<0.000000e+00> : vector<8x8xf32>
    %51 = tpu.matmul %49, %50, %cst_20 {dimension_numbers = #tpu.dot_dimension_numbers<[1], [0], [0], [1], [0, 0, 1, 1], [], []>} : vector<8x8xf32>, vector<8x8xf32>, vector<8x8xf32> -> vector<8x8xf32>
    %52 = vector.extract_strided_slice %26 {offsets = [0, 8], sizes = [8, 8], strides = [1, 1]} : vector<8x32xf32> to vector<8x8xf32>
    %53 = vector.extract_strided_slice %27 {offsets = [0, 8], sizes = [8, 8], strides = [1, 1]} : vector<8x32xf32> to vector<8x8xf32>
    %cst_21 = arith.constant dense<0.000000e+00> : vector<8x8xf32>
    %54 = tpu.matmul %52, %53, %cst_21 {dimension_numbers = #tpu.dot_dimension_numbers<[1], [1], [0], [0], [0, 0, 1, 0], [], []>} : vector<8x8xf32>, vector<8x8xf32>, vector<8x8xf32> -> vector<8x8xf32>
    %55 = vector.broadcast %34 : vector<1x8xf32> to vector<8x8xf32>
    %56 = arith.addf %54, %55 : vector<8x8xf32>
    %cst_22 = arith.constant dense<0xFF800000> : vector<8xf32>
    %57 = vector.multi_reduction <maximumf>, %56, %cst_22 [1] : vector<8x8xf32> to vector<8xf32>
    %58 = vector.shape_cast %57 : vector<8xf32> to vector<8x1xf32>
    %59 = vector.broadcast %58 : vector<8x1xf32> to vector<8x8xf32>
    %60 = arith.subf %56, %59 : vector<8x8xf32>
    %61 = math.exp %60 : vector<8x8xf32>
    %cst_23 = arith.constant dense<0.000000e+00> : vector<8xf32>
    %62 = vector.multi_reduction <add>, %61, %cst_23 [1] : vector<8x8xf32> to vector<8xf32>
    %63 = vector.shape_cast %62 : vector<8xf32> to vector<8x1xf32>
    %64 = tpu.reciprocal %63 {approx = true} : vector<8x1xf32> -> vector<8x1xf32>
    %65 = vector.broadcast %64 : vector<8x1xf32> to vector<8x8xf32>
    %66 = arith.mulf %61, %65 : vector<8x8xf32>
    %67 = vector.extract_strided_slice %28 {offsets = [0, 8], sizes = [8, 8], strides = [1, 1]} : vector<8x32xf32> to vector<8x8xf32>
    %cst_24 = arith.constant dense<0.000000e+00> : vector<8x8xf32>
    %68 = tpu.matmul %66, %67, %cst_24 {dimension_numbers = #tpu.dot_dimension_numbers<[1], [0], [0], [1], [0, 0, 1, 1], [], []>} : vector<8x8xf32>, vector<8x8xf32>, vector<8x8xf32> -> vector<8x8xf32>
    %69 = vector.extract_strided_slice %26 {offsets = [0, 16], sizes = [8, 8], strides = [1, 1]} : vector<8x32xf32> to vector<8x8xf32>
    %70 = vector.extract_strided_slice %27 {offsets = [0, 16], sizes = [8, 8], strides = [1, 1]} : vector<8x32xf32> to vector<8x8xf32>
    %cst_25 = arith.constant dense<0.000000e+00> : vector<8x8xf32>
    %71 = tpu.matmul %69, %70, %cst_25 {dimension_numbers = #tpu.dot_dimension_numbers<[1], [1], [0], [0], [0, 0, 1, 0], [], []>} : vector<8x8xf32>, vector<8x8xf32>, vector<8x8xf32> -> vector<8x8xf32>
    %72 = vector.broadcast %34 : vector<1x8xf32> to vector<8x8xf32>
    %73 = arith.addf %71, %72 : vector<8x8xf32>
    %cst_26 = arith.constant dense<0xFF800000> : vector<8xf32>
    %74 = vector.multi_reduction <maximumf>, %73, %cst_26 [1] : vector<8x8xf32> to vector<8xf32>
    %75 = vector.shape_cast %74 : vector<8xf32> to vector<8x1xf32>
    %76 = vector.broadcast %75 : vector<8x1xf32> to vector<8x8xf32>
    %77 = arith.subf %73, %76 : vector<8x8xf32>
    %78 = math.exp %77 : vector<8x8xf32>
    %cst_27 = arith.constant dense<0.000000e+00> : vector<8xf32>
    %79 = vector.multi_reduction <add>, %78, %cst_27 [1] : vector<8x8xf32> to vector<8xf32>
    %80 = vector.shape_cast %79 : vector<8xf32> to vector<8x1xf32>
    %81 = tpu.reciprocal %80 {approx = true} : vector<8x1xf32> -> vector<8x1xf32>
    %82 = vector.broadcast %81 : vector<8x1xf32> to vector<8x8xf32>
    %83 = arith.mulf %78, %82 : vector<8x8xf32>
    %84 = vector.extract_strided_slice %28 {offsets = [0, 16], sizes = [8, 8], strides = [1, 1]} : vector<8x32xf32> to vector<8x8xf32>
    %cst_28 = arith.constant dense<0.000000e+00> : vector<8x8xf32>
    %85 = tpu.matmul %83, %84, %cst_28 {dimension_numbers = #tpu.dot_dimension_numbers<[1], [0], [0], [1], [0, 0, 1, 1], [], []>} : vector<8x8xf32>, vector<8x8xf32>, vector<8x8xf32> -> vector<8x8xf32>
    %86 = vector.extract_strided_slice %26 {offsets = [0, 24], sizes = [8, 8], strides = [1, 1]} : vector<8x32xf32> to vector<8x8xf32>
    %87 = vector.extract_strided_slice %27 {offsets = [0, 24], sizes = [8, 8], strides = [1, 1]} : vector<8x32xf32> to vector<8x8xf32>
    %cst_29 = arith.constant dense<0.000000e+00> : vector<8x8xf32>
    %88 = tpu.matmul %86, %87, %cst_29 {dimension_numbers = #tpu.dot_dimension_numbers<[1], [1], [0], [0], [0, 0, 1, 0], [], []>} : vector<8x8xf32>, vector<8x8xf32>, vector<8x8xf32> -> vector<8x8xf32>
    %89 = vector.broadcast %34 : vector<1x8xf32> to vector<8x8xf32>
    %90 = arith.addf %88, %89 : vector<8x8xf32>
    %cst_30 = arith.constant dense<0xFF800000> : vector<8xf32>
    %91 = vector.multi_reduction <maximumf>, %90, %cst_30 [1] : vector<8x8xf32> to vector<8xf32>
    %92 = vector.shape_cast %91 : vector<8xf32> to vector<8x1xf32>
    %93 = vector.broadcast %92 : vector<8x1xf32> to vector<8x8xf32>
    %94 = arith.subf %90, %93 : vector<8x8xf32>
    %95 = math.exp %94 : vector<8x8xf32>
    %cst_31 = arith.constant dense<0.000000e+00> : vector<8xf32>
    %96 = vector.multi_reduction <add>, %95, %cst_31 [1] : vector<8x8xf32> to vector<8xf32>
    %97 = vector.shape_cast %96 : vector<8xf32> to vector<8x1xf32>
    %98 = tpu.reciprocal %97 {approx = true} : vector<8x1xf32> -> vector<8x1xf32>
    %99 = vector.broadcast %98 : vector<8x1xf32> to vector<8x8xf32>
    %100 = arith.mulf %95, %99 : vector<8x8xf32>
    %101 = vector.extract_strided_slice %28 {offsets = [0, 24], sizes = [8, 8], strides = [1, 1]} : vector<8x32xf32> to vector<8x8xf32>
    %cst_32 = arith.constant dense<0.000000e+00> : vector<8x8xf32>
    %102 = tpu.matmul %100, %101, %cst_32 {dimension_numbers = #tpu.dot_dimension_numbers<[1], [0], [0], [1], [0, 0, 1, 1], [], []>} : vector<8x8xf32>, vector<8x8xf32>, vector<8x8xf32> -> vector<8x8xf32>
    %103 = tpu.concatenate %51, %68, %85, %102 in 1 : vector<8x8xf32>, vector<8x8xf32>, vector<8x8xf32>, vector<8x8xf32> -> vector<8x32xf32>
    %104 = vector.extract_strided_slice %23 {offsets = [8, 0], sizes = [8, 32], strides = [1, 1]} : vector<16x32xf32> to vector<8x32xf32>
    %105 = vector.extract_strided_slice %24 {offsets = [8, 0], sizes = [8, 32], strides = [1, 1]} : vector<16x32xf32> to vector<8x32xf32>
    %106 = vector.extract_strided_slice %25 {offsets = [8, 0], sizes = [8, 32], strides = [1, 1]} : vector<16x32xf32> to vector<8x32xf32>
    %107 = vector.extract_strided_slice %0 {offsets = [1, 0], sizes = [1, 8], strides = [1, 1]} : vector<2x8xi32> to vector<1x8xi32>
    %c0_i32_33 = arith.constant 0 : i32
    %108 = vector.broadcast %c0_i32_33 : i32 to vector<1x8xi32>
    %109 = arith.cmpi ne, %107, %108 : vector<1x8xi32>
    %cst_34 = arith.constant 0.000000e+00 : f32
    %cst_35 = arith.constant -1.000000e+09 : f32
    %110 = vector.broadcast %cst_34 : f32 to vector<1x8xf32>
    %111 = vector.broadcast %cst_35 : f32 to vector<1x8xf32>
    %112 = arith.select %109, %110, %111 : vector<1x8xi1>, vector<1x8xf32>
    %113 = vector.extract_strided_slice %104 {offsets = [0, 0], sizes = [8, 8], strides = [1, 1]} : vector<8x32xf32> to vector<8x8xf32>
    %114 = vector.extract_strided_slice %105 {offsets = [0, 0], sizes = [8, 8], strides = [1, 1]} : vector<8x32xf32> to vector<8x8xf32>
    %cst_36 = arith.constant dense<0.000000e+00> : vector<8x8xf32>
    %115 = tpu.matmul %113, %114, %cst_36 {dimension_numbers = #tpu.dot_dimension_numbers<[1], [1], [0], [0], [0, 0, 1, 0], [], []>} : vector<8x8xf32>, vector<8x8xf32>, vector<8x8xf32> -> vector<8x8xf32>
    %116 = vector.broadcast %112 : vector<1x8xf32> to vector<8x8xf32>
    %117 = arith.addf %115, %116 : vector<8x8xf32>
    %cst_37 = arith.constant dense<0xFF800000> : vector<8xf32>
    %118 = vector.multi_reduction <maximumf>, %117, %cst_37 [1] : vector<8x8xf32> to vector<8xf32>
    %119 = vector.shape_cast %118 : vector<8xf32> to vector<8x1xf32>
    %120 = vector.broadcast %119 : vector<8x1xf32> to vector<8x8xf32>
    %121 = arith.subf %117, %120 : vector<8x8xf32>
    %122 = math.exp %121 : vector<8x8xf32>
    %cst_38 = arith.constant dense<0.000000e+00> : vector<8xf32>
    %123 = vector.multi_reduction <add>, %122, %cst_38 [1] : vector<8x8xf32> to vector<8xf32>
    %124 = vector.shape_cast %123 : vector<8xf32> to vector<8x1xf32>
    %125 = tpu.reciprocal %124 {approx = true} : vector<8x1xf32> -> vector<8x1xf32>
    %126 = vector.broadcast %125 : vector<8x1xf32> to vector<8x8xf32>
    %127 = arith.mulf %122, %126 : vector<8x8xf32>
    %128 = vector.extract_strided_slice %106 {offsets = [0, 0], sizes = [8, 8], strides = [1, 1]} : vector<8x32xf32> to vector<8x8xf32>
    %cst_39 = arith.constant dense<0.000000e+00> : vector<8x8xf32>
    %129 = tpu.matmul %127, %128, %cst_39 {dimension_numbers = #tpu.dot_dimension_numbers<[1], [0], [0], [1], [0, 0, 1, 1], [], []>} : vector<8x8xf32>, vector<8x8xf32>, vector<8x8xf32> -> vector<8x8xf32>
    %130 = vector.extract_strided_slice %104 {offsets = [0, 8], sizes = [8, 8], strides = [1, 1]} : vector<8x32xf32> to vector<8x8xf32>
    %131 = vector.extract_strided_slice %105 {offsets = [0, 8], sizes = [8, 8], strides = [1, 1]} : vector<8x32xf32> to vector<8x8xf32>
    %cst_40 = arith.constant dense<0.000000e+00> : vector<8x8xf32>
    %132 = tpu.matmul %130, %131, %cst_40 {dimension_numbers = #tpu.dot_dimension_numbers<[1], [1], [0], [0], [0, 0, 1, 0], [], []>} : vector<8x8xf32>, vector<8x8xf32>, vector<8x8xf32> -> vector<8x8xf32>
    %133 = vector.broadcast %112 : vector<1x8xf32> to vector<8x8xf32>
    %134 = arith.addf %132, %133 : vector<8x8xf32>
    %cst_41 = arith.constant dense<0xFF800000> : vector<8xf32>
    %135 = vector.multi_reduction <maximumf>, %134, %cst_41 [1] : vector<8x8xf32> to vector<8xf32>
    %136 = vector.shape_cast %135 : vector<8xf32> to vector<8x1xf32>
    %137 = vector.broadcast %136 : vector<8x1xf32> to vector<8x8xf32>
    %138 = arith.subf %134, %137 : vector<8x8xf32>
    %139 = math.exp %138 : vector<8x8xf32>
    %cst_42 = arith.constant dense<0.000000e+00> : vector<8xf32>
    %140 = vector.multi_reduction <add>, %139, %cst_42 [1] : vector<8x8xf32> to vector<8xf32>
    %141 = vector.shape_cast %140 : vector<8xf32> to vector<8x1xf32>
    %142 = tpu.reciprocal %141 {approx = true} : vector<8x1xf32> -> vector<8x1xf32>
    %143 = vector.broadcast %142 : vector<8x1xf32> to vector<8x8xf32>
    %144 = arith.mulf %139, %143 : vector<8x8xf32>
    %145 = vector.extract_strided_slice %106 {offsets = [0, 8], sizes = [8, 8], strides = [1, 1]} : vector<8x32xf32> to vector<8x8xf32>
    %cst_43 = arith.constant dense<0.000000e+00> : vector<8x8xf32>
    %146 = tpu.matmul %144, %145, %cst_43 {dimension_numbers = #tpu.dot_dimension_numbers<[1], [0], [0], [1], [0, 0, 1, 1], [], []>} : vector<8x8xf32>, vector<8x8xf32>, vector<8x8xf32> -> vector<8x8xf32>
    %147 = vector.extract_strided_slice %104 {offsets = [0, 16], sizes = [8, 8], strides = [1, 1]} : vector<8x32xf32> to vector<8x8xf32>
    %148 = vector.extract_strided_slice %105 {offsets = [0, 16], sizes = [8, 8], strides = [1, 1]} : vector<8x32xf32> to vector<8x8xf32>
    %cst_44 = arith.constant dense<0.000000e+00> : vector<8x8xf32>
    %149 = tpu.matmul %147, %148, %cst_44 {dimension_numbers = #tpu.dot_dimension_numbers<[1], [1], [0], [0], [0, 0, 1, 0], [], []>} : vector<8x8xf32>, vector<8x8xf32>, vector<8x8xf32> -> vector<8x8xf32>
    %150 = vector.broadcast %112 : vector<1x8xf32> to vector<8x8xf32>
    %151 = arith.addf %149, %150 : vector<8x8xf32>
    %cst_45 = arith.constant dense<0xFF800000> : vector<8xf32>
    %152 = vector.multi_reduction <maximumf>, %151, %cst_45 [1] : vector<8x8xf32> to vector<8xf32>
    %153 = vector.shape_cast %152 : vector<8xf32> to vector<8x1xf32>
    %154 = vector.broadcast %153 : vector<8x1xf32> to vector<8x8xf32>
    %155 = arith.subf %151, %154 : vector<8x8xf32>
    %156 = math.exp %155 : vector<8x8xf32>
    %cst_46 = arith.constant dense<0.000000e+00> : vector<8xf32>
    %157 = vector.multi_reduction <add>, %156, %cst_46 [1] : vector<8x8xf32> to vector<8xf32>
    %158 = vector.shape_cast %157 : vector<8xf32> to vector<8x1xf32>
    %159 = tpu.reciprocal %158 {approx = true} : vector<8x1xf32> -> vector<8x1xf32>
    %160 = vector.broadcast %159 : vector<8x1xf32> to vector<8x8xf32>
    %161 = arith.mulf %156, %160 : vector<8x8xf32>
    %162 = vector.extract_strided_slice %106 {offsets = [0, 16], sizes = [8, 8], strides = [1, 1]} : vector<8x32xf32> to vector<8x8xf32>
    %cst_47 = arith.constant dense<0.000000e+00> : vector<8x8xf32>
    %163 = tpu.matmul %161, %162, %cst_47 {dimension_numbers = #tpu.dot_dimension_numbers<[1], [0], [0], [1], [0, 0, 1, 1], [], []>} : vector<8x8xf32>, vector<8x8xf32>, vector<8x8xf32> -> vector<8x8xf32>
    %164 = vector.extract_strided_slice %104 {offsets = [0, 24], sizes = [8, 8], strides = [1, 1]} : vector<8x32xf32> to vector<8x8xf32>
    %165 = vector.extract_strided_slice %105 {offsets = [0, 24], sizes = [8, 8], strides = [1, 1]} : vector<8x32xf32> to vector<8x8xf32>
    %cst_48 = arith.constant dense<0.000000e+00> : vector<8x8xf32>
    %166 = tpu.matmul %164, %165, %cst_48 {dimension_numbers = #tpu.dot_dimension_numbers<[1], [1], [0], [0], [0, 0, 1, 0], [], []>} : vector<8x8xf32>, vector<8x8xf32>, vector<8x8xf32> -> vector<8x8xf32>
    %167 = vector.broadcast %112 : vector<1x8xf32> to vector<8x8xf32>
    %168 = arith.addf %166, %167 : vector<8x8xf32>
    %cst_49 = arith.constant dense<0xFF800000> : vector<8xf32>
    %169 = vector.multi_reduction <maximumf>, %168, %cst_49 [1] : vector<8x8xf32> to vector<8xf32>
    %170 = vector.shape_cast %169 : vector<8xf32> to vector<8x1xf32>
    %171 = vector.broadcast %170 : vector<8x1xf32> to vector<8x8xf32>
    %172 = arith.subf %168, %171 : vector<8x8xf32>
    %173 = math.exp %172 : vector<8x8xf32>
    %cst_50 = arith.constant dense<0.000000e+00> : vector<8xf32>
    %174 = vector.multi_reduction <add>, %173, %cst_50 [1] : vector<8x8xf32> to vector<8xf32>
    %175 = vector.shape_cast %174 : vector<8xf32> to vector<8x1xf32>
    %176 = tpu.reciprocal %175 {approx = true} : vector<8x1xf32> -> vector<8x1xf32>
    %177 = vector.broadcast %176 : vector<8x1xf32> to vector<8x8xf32>
    %178 = arith.mulf %173, %177 : vector<8x8xf32>
    %179 = vector.extract_strided_slice %106 {offsets = [0, 24], sizes = [8, 8], strides = [1, 1]} : vector<8x32xf32> to vector<8x8xf32>
    %cst_51 = arith.constant dense<0.000000e+00> : vector<8x8xf32>
    %180 = tpu.matmul %178, %179, %cst_51 {dimension_numbers = #tpu.dot_dimension_numbers<[1], [0], [0], [1], [0, 0, 1, 1], [], []>} : vector<8x8xf32>, vector<8x8xf32>, vector<8x8xf32> -> vector<8x8xf32>
    %181 = tpu.concatenate %129, %146, %163, %180 in 1 : vector<8x8xf32>, vector<8x8xf32>, vector<8x8xf32>, vector<8x8xf32> -> vector<8x32xf32>
    %182 = tpu.concatenate %103, %181 in 0 : vector<8x32xf32>, vector<8x32xf32> -> vector<16x32xf32>
    %c0_52 = arith.constant 0 : index
    %c0_53 = arith.constant 0 : index
    %183 = vector.load %arg10[%c0_52, %c0_53] : memref<32x32xf32, #tpu.memory_space<vmem>>, vector<32x32xf32>
    %cst_54 = arith.constant dense<0.000000e+00> : vector<16x32xf32>
    %184 = tpu.matmul %182, %183, %cst_54 {dimension_numbers = #tpu.dot_dimension_numbers<[1], [0], [0], [1], [0, 0, 1, 1], [], []>} : vector<16x32xf32>, vector<32x32xf32>, vector<16x32xf32> -> vector<16x32xf32>
    %c0_55 = arith.constant 0 : index
    %c0_56 = arith.constant 0 : index
    %185 = vector.load %arg11[%c0_55, %c0_56] : memref<1x32xf32, #tpu.memory_space<vmem>>, vector<1x32xf32>
    %186 = vector.broadcast %185 : vector<1x32xf32> to vector<16x32xf32>
    %187 = arith.addf %184, %186 : vector<16x32xf32>
    %188 = arith.addf %17, %187 : vector<16x32xf32>
    %cst_57 = arith.constant dense<0.000000e+00> : vector<16xf32>
    %189 = vector.multi_reduction <add>, %188, %cst_57 [1] : vector<16x32xf32> to vector<16xf32>
    %190 = vector.shape_cast %189 : vector<16xf32> to vector<16x1xf32>
    %cst_58 = arith.constant 3.200000e+01 : f32
    %191 = vector.broadcast %cst_58 : f32 to vector<16x1xf32>
    %192 = arith.divf %190, %191 : vector<16x1xf32>
    %193 = vector.broadcast %192 : vector<16x1xf32> to vector<16x32xf32>
    %194 = arith.subf %188, %193 : vector<16x32xf32>
    %195 = arith.mulf %194, %194 : vector<16x32xf32>
    %cst_59 = arith.constant dense<0.000000e+00> : vector<16xf32>
    %196 = vector.multi_reduction <add>, %195, %cst_59 [1] : vector<16x32xf32> to vector<16xf32>
    %197 = vector.shape_cast %196 : vector<16xf32> to vector<16x1xf32>
    %cst_60 = arith.constant 3.200000e+01 : f32
    %198 = vector.broadcast %cst_60 : f32 to vector<16x1xf32>
    %199 = arith.divf %197, %198 : vector<16x1xf32>
    %200 = vector.broadcast %192 : vector<16x1xf32> to vector<16x32xf32>
    %201 = arith.subf %188, %200 : vector<16x32xf32>
    %cst_61 = arith.constant 9.99999974E-6 : f32
    %202 = vector.broadcast %cst_61 : f32 to vector<16x1xf32>
    %203 = arith.addf %199, %202 : vector<16x1xf32>
    %204 = math.rsqrt %203 : vector<16x1xf32>
    %205 = vector.broadcast %204 : vector<16x1xf32> to vector<16x32xf32>
    %206 = arith.mulf %201, %205 : vector<16x32xf32>
    %c0_62 = arith.constant 0 : index
    %c0_63 = arith.constant 0 : index
    %207 = vector.load %arg12[%c0_62, %c0_63] : memref<1x32xf32, #tpu.memory_space<vmem>>, vector<1x32xf32>
    %208 = vector.broadcast %207 : vector<1x32xf32> to vector<16x32xf32>
    %209 = arith.mulf %206, %208 : vector<16x32xf32>
    %c0_64 = arith.constant 0 : index
    %c0_65 = arith.constant 0 : index
    %210 = vector.load %arg13[%c0_64, %c0_65] : memref<1x32xf32, #tpu.memory_space<vmem>>, vector<1x32xf32>
    %211 = vector.broadcast %210 : vector<1x32xf32> to vector<16x32xf32>
    %212 = arith.addf %209, %211 : vector<16x32xf32>
    %c0_66 = arith.constant 0 : index
    %c0_67 = arith.constant 0 : index
    %213 = vector.load %arg14[%c0_66, %c0_67] : memref<32x64xf32, #tpu.memory_space<vmem>>, vector<32x64xf32>
    %cst_68 = arith.constant dense<0.000000e+00> : vector<16x64xf32>
    %214 = tpu.matmul %212, %213, %cst_68 {dimension_numbers = #tpu.dot_dimension_numbers<[1], [0], [0], [1], [0, 0, 1, 1], [], []>} : vector<16x32xf32>, vector<32x64xf32>, vector<16x64xf32> -> vector<16x64xf32>
    %c0_69 = arith.constant 0 : index
    %c0_70 = arith.constant 0 : index
    %215 = vector.load %arg15[%c0_69, %c0_70] : memref<1x64xf32, #tpu.memory_space<vmem>>, vector<1x64xf32>
    %216 = vector.broadcast %215 : vector<1x64xf32> to vector<16x64xf32>
    %217 = arith.addf %214, %216 : vector<16x64xf32>
    %cst_71 = arith.constant 0.000000e+00 : f32
    %218 = vector.broadcast %cst_71 : f32 to vector<16x64xf32>
    %219 = arith.maximumf %217, %218 : vector<16x64xf32>
    %c0_72 = arith.constant 0 : index
    %c0_73 = arith.constant 0 : index
    %220 = vector.load %arg16[%c0_72, %c0_73] : memref<64x32xf32, #tpu.memory_space<vmem>>, vector<64x32xf32>
    %cst_74 = arith.constant dense<0.000000e+00> : vector<16x32xf32>
    %221 = tpu.matmul %219, %220, %cst_74 {dimension_numbers = #tpu.dot_dimension_numbers<[1], [0], [0], [1], [0, 0, 1, 1], [], []>} : vector<16x64xf32>, vector<64x32xf32>, vector<16x32xf32> -> vector<16x32xf32>
    %c0_75 = arith.constant 0 : index
    %c0_76 = arith.constant 0 : index
    %222 = vector.load %arg17[%c0_75, %c0_76] : memref<1x32xf32, #tpu.memory_space<vmem>>, vector<1x32xf32>
    %223 = vector.broadcast %222 : vector<1x32xf32> to vector<16x32xf32>
    %224 = arith.addf %221, %223 : vector<16x32xf32>
    %225 = arith.addf %212, %224 : vector<16x32xf32>
    %cst_77 = arith.constant dense<0.000000e+00> : vector<16xf32>
    %226 = vector.multi_reduction <add>, %225, %cst_77 [1] : vector<16x32xf32> to vector<16xf32>
    %227 = vector.shape_cast %226 : vector<16xf32> to vector<16x1xf32>
    %cst_78 = arith.constant 3.200000e+01 : f32
    %228 = vector.broadcast %cst_78 : f32 to vector<16x1xf32>
    %229 = arith.divf %227, %228 : vector<16x1xf32>
    %230 = vector.broadcast %229 : vector<16x1xf32> to vector<16x32xf32>
    %231 = arith.subf %225, %230 : vector<16x32xf32>
    %232 = arith.mulf %231, %231 : vector<16x32xf32>
    %cst_79 = arith.constant dense<0.000000e+00> : vector<16xf32>
    %233 = vector.multi_reduction <add>, %232, %cst_79 [1] : vector<16x32xf32> to vector<16xf32>
    %234 = vector.shape_cast %233 : vector<16xf32> to vector<16x1xf32>
    %cst_80 = arith.constant 3.200000e+01 : f32
    %235 = vector.broadcast %cst_80 : f32 to vector<16x1xf32>
    %236 = arith.divf %234, %235 : vector<16x1xf32>
    %237 = vector.broadcast %229 : vector<16x1xf32> to vector<16x32xf32>
    %238 = arith.subf %225, %237 : vector<16x32xf32>
    %cst_81 = arith.constant 9.99999974E-6 : f32
    %239 = vector.broadcast %cst_81 : f32 to vector<16x1xf32>
    %240 = arith.addf %236, %239 : vector<16x1xf32>
    %241 = math.rsqrt %240 : vector<16x1xf32>
    %242 = vector.broadcast %241 : vector<16x1xf32> to vector<16x32xf32>
    %243 = arith.mulf %238, %242 : vector<16x32xf32>
    %c0_82 = arith.constant 0 : index
    %c0_83 = arith.constant 0 : index
    %244 = vector.load %arg18[%c0_82, %c0_83] : memref<1x32xf32, #tpu.memory_space<vmem>>, vector<1x32xf32>
    %245 = vector.broadcast %244 : vector<1x32xf32> to vector<16x32xf32>
    %246 = arith.mulf %243, %245 : vector<16x32xf32>
    %c0_84 = arith.constant 0 : index
    %c0_85 = arith.constant 0 : index
    %247 = vector.load %arg19[%c0_84, %c0_85] : memref<1x32xf32, #tpu.memory_space<vmem>>, vector<1x32xf32>
    %248 = vector.broadcast %247 : vector<1x32xf32> to vector<16x32xf32>
    %249 = arith.addf %246, %248 : vector<16x32xf32>
    %c0_86 = arith.constant 0 : index
    %c0_87 = arith.constant 0 : index
    %250 = vector.load %arg7[%c0_86, %c0_87] : memref<16x32xf32, #tpu.memory_space<vmem>>, vector<8x32xf32>
    %251 = tpu.concatenate %250, %250 in 0 : vector<8x32xf32>, vector<8x32xf32> -> vector<16x32xf32>
    %c0_88 = arith.constant 0 : index
    %c0_89 = arith.constant 0 : index
    %252 = vector.load %arg4[%c0_88, %c0_89] : memref<16x1xi32, #tpu.memory_space<vmem>>, vector<16x1xi32>
    %253 = tpu.iota {dimensions = array<i32: 1>} : vector<16x32xi32>
    %254 = vector.broadcast %252 : vector<16x1xi32> to vector<16x32xi32>
    %255 = arith.cmpi eq, %253, %254 : vector<16x32xi32>
    %256 = arith.extui %255 : vector<16x32xi1> to vector<16x32xi32>
    %257 = arith.sitofp %256 : vector<16x32xi32> to vector<16x32xf32>
    %c0_90 = arith.constant 0 : index
    %c0_91 = arith.constant 0 : index
    %258 = vector.load %arg6[%c0_90, %c0_91] : memref<32x32xf32, #tpu.memory_space<vmem>>, vector<32x32xf32>
    %cst_92 = arith.constant dense<0.000000e+00> : vector<16x32xf32>
    %259 = tpu.matmul %257, %258, %cst_92 {dimension_numbers = #tpu.dot_dimension_numbers<[1], [0], [0], [1], [0, 0, 1, 1], [], []>} : vector<16x32xf32>, vector<32x32xf32>, vector<16x32xf32> -> vector<16x32xf32>
    %cst_93 = arith.constant 5.65685415 : f32
    %260 = vector.broadcast %cst_93 : f32 to vector<16x32xf32>
    %261 = arith.mulf %259, %260 : vector<16x32xf32>
    %262 = arith.addf %261, %251 : vector<16x32xf32>
    %c0_94 = arith.constant 0 : index
    %c0_95 = arith.constant 0 : index
    %263 = vector.load %arg20[%c0_94, %c0_95] : memref<32x96xf32, #tpu.memory_space<vmem>>, vector<32x96xf32>
    %cst_96 = arith.constant dense<0.000000e+00> : vector<16x96xf32>
    %264 = tpu.matmul %262, %263, %cst_96 {dimension_numbers = #tpu.dot_dimension_numbers<[1], [0], [0], [1], [0, 0, 1, 1], [], []>} : vector<16x32xf32>, vector<32x96xf32>, vector<16x96xf32> -> vector<16x96xf32>
    %c0_97 = arith.constant 0 : index
    %c0_98 = arith.constant 0 : index
    %265 = vector.load %arg21[%c0_97, %c0_98] : memref<1x96xf32, #tpu.memory_space<vmem>>, vector<1x96xf32>
    %266 = vector.broadcast %265 : vector<1x96xf32> to vector<16x96xf32>
    %267 = arith.addf %264, %266 : vector<16x96xf32>
    %268 = vector.extract_strided_slice %267 {offsets = [0, 0], sizes = [16, 32], strides = [1, 1]} : vector<16x96xf32> to vector<16x32xf32>
    %269 = vector.extract_strided_slice %267 {offsets = [0, 32], sizes = [16, 32], strides = [1, 1]} : vector<16x96xf32> to vector<16x32xf32>
    %270 = vector.extract_strided_slice %267 {offsets = [0, 64], sizes = [16, 32], strides = [1, 1]} : vector<16x96xf32> to vector<16x32xf32>
    %271 = vector.extract_strided_slice %268 {offsets = [0, 0], sizes = [8, 32], strides = [1, 1]} : vector<16x32xf32> to vector<8x32xf32>
    %272 = vector.extract_strided_slice %269 {offsets = [0, 0], sizes = [8, 32], strides = [1, 1]} : vector<16x32xf32> to vector<8x32xf32>
    %273 = vector.extract_strided_slice %270 {offsets = [0, 0], sizes = [8, 32], strides = [1, 1]} : vector<16x32xf32> to vector<8x32xf32>
    %274 = vector.extract_strided_slice %1 {offsets = [0, 0], sizes = [1, 8], strides = [1, 1]} : vector<2x8xi32> to vector<1x8xi32>
    %c0_i32_99 = arith.constant 0 : i32
    %275 = vector.broadcast %c0_i32_99 : i32 to vector<1x8xi32>
    %276 = arith.cmpi ne, %274, %275 : vector<1x8xi32>
    %277 = vector.broadcast %276 : vector<1x8xi1> to vector<8x8xi1>
    %278 = arith.andi %4, %277 : vector<8x8xi1>
    %cst_100 = arith.constant 0.000000e+00 : f32
    %cst_101 = arith.constant -1.000000e+09 : f32
    %279 = vector.broadcast %cst_100 : f32 to vector<8x8xf32>
    %280 = vector.broadcast %cst_101 : f32 to vector<8x8xf32>
    %281 = arith.select %278, %279, %280 : vector<8x8xi1>, vector<8x8xf32>
    %282 = vector.extract_strided_slice %271 {offsets = [0, 0], sizes = [8, 8], strides = [1, 1]} : vector<8x32xf32> to vector<8x8xf32>
    %283 = vector.extract_strided_slice %272 {offsets = [0, 0], sizes = [8, 8], strides = [1, 1]} : vector<8x32xf32> to vector<8x8xf32>
    %cst_102 = arith.constant dense<0.000000e+00> : vector<8x8xf32>
    %284 = tpu.matmul %282, %283, %cst_102 {dimension_numbers = #tpu.dot_dimension_numbers<[1], [1], [0], [0], [0, 0, 1, 0], [], []>} : vector<8x8xf32>, vector<8x8xf32>, vector<8x8xf32> -> vector<8x8xf32>
    %285 = arith.addf %284, %281 : vector<8x8xf32>
    %cst_103 = arith.constant dense<0xFF800000> : vector<8xf32>
    %286 = vector.multi_reduction <maximumf>, %285, %cst_103 [1] : vector<8x8xf32> to vector<8xf32>
    %287 = vector.shape_cast %286 : vector<8xf32> to vector<8x1xf32>
    %288 = vector.broadcast %287 : vector<8x1xf32> to vector<8x8xf32>
    %289 = arith.subf %285, %288 : vector<8x8xf32>
    %290 = math.exp %289 : vector<8x8xf32>
    %cst_104 = arith.constant dense<0.000000e+00> : vector<8xf32>
    %291 = vector.multi_reduction <add>, %290, %cst_104 [1] : vector<8x8xf32> to vector<8xf32>
    %292 = vector.shape_cast %291 : vector<8xf32> to vector<8x1xf32>
    %293 = tpu.reciprocal %292 {approx = true} : vector<8x1xf32> -> vector<8x1xf32>
    %294 = vector.broadcast %293 : vector<8x1xf32> to vector<8x8xf32>
    %295 = arith.mulf %290, %294 : vector<8x8xf32>
    %296 = vector.extract_strided_slice %273 {offsets = [0, 0], sizes = [8, 8], strides = [1, 1]} : vector<8x32xf32> to vector<8x8xf32>
    %cst_105 = arith.constant dense<0.000000e+00> : vector<8x8xf32>
    %297 = tpu.matmul %295, %296, %cst_105 {dimension_numbers = #tpu.dot_dimension_numbers<[1], [0], [0], [1], [0, 0, 1, 1], [], []>} : vector<8x8xf32>, vector<8x8xf32>, vector<8x8xf32> -> vector<8x8xf32>
    %298 = vector.extract_strided_slice %271 {offsets = [0, 8], sizes = [8, 8], strides = [1, 1]} : vector<8x32xf32> to vector<8x8xf32>
    %299 = vector.extract_strided_slice %272 {offsets = [0, 8], sizes = [8, 8], strides = [1, 1]} : vector<8x32xf32> to vector<8x8xf32>
    %cst_106 = arith.constant dense<0.000000e+00> : vector<8x8xf32>
    %300 = tpu.matmul %298, %299, %cst_106 {dimension_numbers = #tpu.dot_dimension_numbers<[1], [1], [0], [0], [0, 0, 1, 0], [], []>} : vector<8x8xf32>, vector<8x8xf32>, vector<8x8xf32> -> vector<8x8xf32>
    %301 = arith.addf %300, %281 : vector<8x8xf32>
    %cst_107 = arith.constant dense<0xFF800000> : vector<8xf32>
    %302 = vector.multi_reduction <maximumf>, %301, %cst_107 [1] : vector<8x8xf32> to vector<8xf32>
    %303 = vector.shape_cast %302 : vector<8xf32> to vector<8x1xf32>
    %304 = vector.broadcast %303 : vector<8x1xf32> to vector<8x8xf32>
    %305 = arith.subf %301, %304 : vector<8x8xf32>
    %306 = math.exp %305 : vector<8x8xf32>
    %cst_108 = arith.constant dense<0.000000e+00> : vector<8xf32>
    %307 = vector.multi_reduction <add>, %306, %cst_108 [1] : vector<8x8xf32> to vector<8xf32>
    %308 = vector.shape_cast %307 : vector<8xf32> to vector<8x1xf32>
    %309 = tpu.reciprocal %308 {approx = true} : vector<8x1xf32> -> vector<8x1xf32>
    %310 = vector.broadcast %309 : vector<8x1xf32> to vector<8x8xf32>
    %311 = arith.mulf %306, %310 : vector<8x8xf32>
    %312 = vector.extract_strided_slice %273 {offsets = [0, 8], sizes = [8, 8], strides = [1, 1]} : vector<8x32xf32> to vector<8x8xf32>
    %cst_109 = arith.constant dense<0.000000e+00> : vector<8x8xf32>
    %313 = tpu.matmul %311, %312, %cst_109 {dimension_numbers = #tpu.dot_dimension_numbers<[1], [0], [0], [1], [0, 0, 1, 1], [], []>} : vector<8x8xf32>, vector<8x8xf32>, vector<8x8xf32> -> vector<8x8xf32>
    %314 = vector.extract_strided_slice %271 {offsets = [0, 16], sizes = [8, 8], strides = [1, 1]} : vector<8x32xf32> to vector<8x8xf32>
    %315 = vector.extract_strided_slice %272 {offsets = [0, 16], sizes = [8, 8], strides = [1, 1]} : vector<8x32xf32> to vector<8x8xf32>
    %cst_110 = arith.constant dense<0.000000e+00> : vector<8x8xf32>
    %316 = tpu.matmul %314, %315, %cst_110 {dimension_numbers = #tpu.dot_dimension_numbers<[1], [1], [0], [0], [0, 0, 1, 0], [], []>} : vector<8x8xf32>, vector<8x8xf32>, vector<8x8xf32> -> vector<8x8xf32>
    %317 = arith.addf %316, %281 : vector<8x8xf32>
    %cst_111 = arith.constant dense<0xFF800000> : vector<8xf32>
    %318 = vector.multi_reduction <maximumf>, %317, %cst_111 [1] : vector<8x8xf32> to vector<8xf32>
    %319 = vector.shape_cast %318 : vector<8xf32> to vector<8x1xf32>
    %320 = vector.broadcast %319 : vector<8x1xf32> to vector<8x8xf32>
    %321 = arith.subf %317, %320 : vector<8x8xf32>
    %322 = math.exp %321 : vector<8x8xf32>
    %cst_112 = arith.constant dense<0.000000e+00> : vector<8xf32>
    %323 = vector.multi_reduction <add>, %322, %cst_112 [1] : vector<8x8xf32> to vector<8xf32>
    %324 = vector.shape_cast %323 : vector<8xf32> to vector<8x1xf32>
    %325 = tpu.reciprocal %324 {approx = true} : vector<8x1xf32> -> vector<8x1xf32>
    %326 = vector.broadcast %325 : vector<8x1xf32> to vector<8x8xf32>
    %327 = arith.mulf %322, %326 : vector<8x8xf32>
    %328 = vector.extract_strided_slice %273 {offsets = [0, 16], sizes = [8, 8], strides = [1, 1]} : vector<8x32xf32> to vector<8x8xf32>
    %cst_113 = arith.constant dense<0.000000e+00> : vector<8x8xf32>
    %329 = tpu.matmul %327, %328, %cst_113 {dimension_numbers = #tpu.dot_dimension_numbers<[1], [0], [0], [1], [0, 0, 1, 1], [], []>} : vector<8x8xf32>, vector<8x8xf32>, vector<8x8xf32> -> vector<8x8xf32>
    %330 = vector.extract_strided_slice %271 {offsets = [0, 24], sizes = [8, 8], strides = [1, 1]} : vector<8x32xf32> to vector<8x8xf32>
    %331 = vector.extract_strided_slice %272 {offsets = [0, 24], sizes = [8, 8], strides = [1, 1]} : vector<8x32xf32> to vector<8x8xf32>
    %cst_114 = arith.constant dense<0.000000e+00> : vector<8x8xf32>
    %332 = tpu.matmul %330, %331, %cst_114 {dimension_numbers = #tpu.dot_dimension_numbers<[1], [1], [0], [0], [0, 0, 1, 0], [], []>} : vector<8x8xf32>, vector<8x8xf32>, vector<8x8xf32> -> vector<8x8xf32>
    %333 = arith.addf %332, %281 : vector<8x8xf32>
    %cst_115 = arith.constant dense<0xFF800000> : vector<8xf32>
    %334 = vector.multi_reduction <maximumf>, %333, %cst_115 [1] : vector<8x8xf32> to vector<8xf32>
    %335 = vector.shape_cast %334 : vector<8xf32> to vector<8x1xf32>
    %336 = vector.broadcast %335 : vector<8x1xf32> to vector<8x8xf32>
    %337 = arith.subf %333, %336 : vector<8x8xf32>
    %338 = math.exp %337 : vector<8x8xf32>
    %cst_116 = arith.constant dense<0.000000e+00> : vector<8xf32>
    %339 = vector.multi_reduction <add>, %338, %cst_116 [1] : vector<8x8xf32> to vector<8xf32>
    %340 = vector.shape_cast %339 : vector<8xf32> to vector<8x1xf32>
    %341 = tpu.reciprocal %340 {approx = true} : vector<8x1xf32> -> vector<8x1xf32>
    %342 = vector.broadcast %341 : vector<8x1xf32> to vector<8x8xf32>
    %343 = arith.mulf %338, %342 : vector<8x8xf32>
    %344 = vector.extract_strided_slice %273 {offsets = [0, 24], sizes = [8, 8], strides = [1, 1]} : vector<8x32xf32> to vector<8x8xf32>
    %cst_117 = arith.constant dense<0.000000e+00> : vector<8x8xf32>
    %345 = tpu.matmul %343, %344, %cst_117 {dimension_numbers = #tpu.dot_dimension_numbers<[1], [0], [0], [1], [0, 0, 1, 1], [], []>} : vector<8x8xf32>, vector<8x8xf32>, vector<8x8xf32> -> vector<8x8xf32>
    %346 = tpu.concatenate %297, %313, %329, %345 in 1 : vector<8x8xf32>, vector<8x8xf32>, vector<8x8xf32>, vector<8x8xf32> -> vector<8x32xf32>
    %347 = vector.extract_strided_slice %268 {offsets = [8, 0], sizes = [8, 32], strides = [1, 1]} : vector<16x32xf32> to vector<8x32xf32>
    %348 = vector.extract_strided_slice %269 {offsets = [8, 0], sizes = [8, 32], strides = [1, 1]} : vector<16x32xf32> to vector<8x32xf32>
    %349 = vector.extract_strided_slice %270 {offsets = [8, 0], sizes = [8, 32], strides = [1, 1]} : vector<16x32xf32> to vector<8x32xf32>
    %350 = vector.extract_strided_slice %1 {offsets = [1, 0], sizes = [1, 8], strides = [1, 1]} : vector<2x8xi32> to vector<1x8xi32>
    %c0_i32_118 = arith.constant 0 : i32
    %351 = vector.broadcast %c0_i32_118 : i32 to vector<1x8xi32>
    %352 = arith.cmpi ne, %350, %351 : vector<1x8xi32>
    %353 = vector.broadcast %352 : vector<1x8xi1> to vector<8x8xi1>
    %354 = arith.andi %4, %353 : vector<8x8xi1>
    %cst_119 = arith.constant 0.000000e+00 : f32
    %cst_120 = arith.constant -1.000000e+09 : f32
    %355 = vector.broadcast %cst_119 : f32 to vector<8x8xf32>
    %356 = vector.broadcast %cst_120 : f32 to vector<8x8xf32>
    %357 = arith.select %354, %355, %356 : vector<8x8xi1>, vector<8x8xf32>
    %358 = vector.extract_strided_slice %347 {offsets = [0, 0], sizes = [8, 8], strides = [1, 1]} : vector<8x32xf32> to vector<8x8xf32>
    %359 = vector.extract_strided_slice %348 {offsets = [0, 0], sizes = [8, 8], strides = [1, 1]} : vector<8x32xf32> to vector<8x8xf32>
    %cst_121 = arith.constant dense<0.000000e+00> : vector<8x8xf32>
    %360 = tpu.matmul %358, %359, %cst_121 {dimension_numbers = #tpu.dot_dimension_numbers<[1], [1], [0], [0], [0, 0, 1, 0], [], []>} : vector<8x8xf32>, vector<8x8xf32>, vector<8x8xf32> -> vector<8x8xf32>
    %361 = arith.addf %360, %357 : vector<8x8xf32>
    %cst_122 = arith.constant dense<0xFF800000> : vector<8xf32>
    %362 = vector.multi_reduction <maximumf>, %361, %cst_122 [1] : vector<8x8xf32> to vector<8xf32>
    %363 = vector.shape_cast %362 : vector<8xf32> to vector<8x1xf32>
    %364 = vector.broadcast %363 : vector<8x1xf32> to vector<8x8xf32>
    %365 = arith.subf %361, %364 : vector<8x8xf32>
    %366 = math.exp %365 : vector<8x8xf32>
    %cst_123 = arith.constant dense<0.000000e+00> : vector<8xf32>
    %367 = vector.multi_reduction <add>, %366, %cst_123 [1] : vector<8x8xf32> to vector<8xf32>
    %368 = vector.shape_cast %367 : vector<8xf32> to vector<8x1xf32>
    %369 = tpu.reciprocal %368 {approx = true} : vector<8x1xf32> -> vector<8x1xf32>
    %370 = vector.broadcast %369 : vector<8x1xf32> to vector<8x8xf32>
    %371 = arith.mulf %366, %370 : vector<8x8xf32>
    %372 = vector.extract_strided_slice %349 {offsets = [0, 0], sizes = [8, 8], strides = [1, 1]} : vector<8x32xf32> to vector<8x8xf32>
    %cst_124 = arith.constant dense<0.000000e+00> : vector<8x8xf32>
    %373 = tpu.matmul %371, %372, %cst_124 {dimension_numbers = #tpu.dot_dimension_numbers<[1], [0], [0], [1], [0, 0, 1, 1], [], []>} : vector<8x8xf32>, vector<8x8xf32>, vector<8x8xf32> -> vector<8x8xf32>
    %374 = vector.extract_strided_slice %347 {offsets = [0, 8], sizes = [8, 8], strides = [1, 1]} : vector<8x32xf32> to vector<8x8xf32>
    %375 = vector.extract_strided_slice %348 {offsets = [0, 8], sizes = [8, 8], strides = [1, 1]} : vector<8x32xf32> to vector<8x8xf32>
    %cst_125 = arith.constant dense<0.000000e+00> : vector<8x8xf32>
    %376 = tpu.matmul %374, %375, %cst_125 {dimension_numbers = #tpu.dot_dimension_numbers<[1], [1], [0], [0], [0, 0, 1, 0], [], []>} : vector<8x8xf32>, vector<8x8xf32>, vector<8x8xf32> -> vector<8x8xf32>
    %377 = arith.addf %376, %357 : vector<8x8xf32>
    %cst_126 = arith.constant dense<0xFF800000> : vector<8xf32>
    %378 = vector.multi_reduction <maximumf>, %377, %cst_126 [1] : vector<8x8xf32> to vector<8xf32>
    %379 = vector.shape_cast %378 : vector<8xf32> to vector<8x1xf32>
    %380 = vector.broadcast %379 : vector<8x1xf32> to vector<8x8xf32>
    %381 = arith.subf %377, %380 : vector<8x8xf32>
    %382 = math.exp %381 : vector<8x8xf32>
    %cst_127 = arith.constant dense<0.000000e+00> : vector<8xf32>
    %383 = vector.multi_reduction <add>, %382, %cst_127 [1] : vector<8x8xf32> to vector<8xf32>
    %384 = vector.shape_cast %383 : vector<8xf32> to vector<8x1xf32>
    %385 = tpu.reciprocal %384 {approx = true} : vector<8x1xf32> -> vector<8x1xf32>
    %386 = vector.broadcast %385 : vector<8x1xf32> to vector<8x8xf32>
    %387 = arith.mulf %382, %386 : vector<8x8xf32>
    %388 = vector.extract_strided_slice %349 {offsets = [0, 8], sizes = [8, 8], strides = [1, 1]} : vector<8x32xf32> to vector<8x8xf32>
    %cst_128 = arith.constant dense<0.000000e+00> : vector<8x8xf32>
    %389 = tpu.matmul %387, %388, %cst_128 {dimension_numbers = #tpu.dot_dimension_numbers<[1], [0], [0], [1], [0, 0, 1, 1], [], []>} : vector<8x8xf32>, vector<8x8xf32>, vector<8x8xf32> -> vector<8x8xf32>
    %390 = vector.extract_strided_slice %347 {offsets = [0, 16], sizes = [8, 8], strides = [1, 1]} : vector<8x32xf32> to vector<8x8xf32>
    %391 = vector.extract_strided_slice %348 {offsets = [0, 16], sizes = [8, 8], strides = [1, 1]} : vector<8x32xf32> to vector<8x8xf32>
    %cst_129 = arith.constant dense<0.000000e+00> : vector<8x8xf32>
    %392 = tpu.matmul %390, %391, %cst_129 {dimension_numbers = #tpu.dot_dimension_numbers<[1], [1], [0], [0], [0, 0, 1, 0], [], []>} : vector<8x8xf32>, vector<8x8xf32>, vector<8x8xf32> -> vector<8x8xf32>
    %393 = arith.addf %392, %357 : vector<8x8xf32>
    %cst_130 = arith.constant dense<0xFF800000> : vector<8xf32>
    %394 = vector.multi_reduction <maximumf>, %393, %cst_130 [1] : vector<8x8xf32> to vector<8xf32>
    %395 = vector.shape_cast %394 : vector<8xf32> to vector<8x1xf32>
    %396 = vector.broadcast %395 : vector<8x1xf32> to vector<8x8xf32>
    %397 = arith.subf %393, %396 : vector<8x8xf32>
    %398 = math.exp %397 : vector<8x8xf32>
    %cst_131 = arith.constant dense<0.000000e+00> : vector<8xf32>
    %399 = vector.multi_reduction <add>, %398, %cst_131 [1] : vector<8x8xf32> to vector<8xf32>
    %400 = vector.shape_cast %399 : vector<8xf32> to vector<8x1xf32>
    %401 = tpu.reciprocal %400 {approx = true} : vector<8x1xf32> -> vector<8x1xf32>
    %402 = vector.broadcast %401 : vector<8x1xf32> to vector<8x8xf32>
    %403 = arith.mulf %398, %402 : vector<8x8xf32>
    %404 = vector.extract_strided_slice %349 {offsets = [0, 16], sizes = [8, 8], strides = [1, 1]} : vector<8x32xf32> to vector<8x8xf32>
    %cst_132 = arith.constant dense<0.000000e+00> : vector<8x8xf32>
    %405 = tpu.matmul %403, %404, %cst_132 {dimension_numbers = #tpu.dot_dimension_numbers<[1], [0], [0], [1], [0, 0, 1, 1], [], []>} : vector<8x8xf32>, vector<8x8xf32>, vector<8x8xf32> -> vector<8x8xf32>
    %406 = vector.extract_strided_slice %347 {offsets = [0, 24], sizes = [8, 8], strides = [1, 1]} : vector<8x32xf32> to vector<8x8xf32>
    %407 = vector.extract_strided_slice %348 {offsets = [0, 24], sizes = [8, 8], strides = [1, 1]} : vector<8x32xf32> to vector<8x8xf32>
    %cst_133 = arith.constant dense<0.000000e+00> : vector<8x8xf32>
    %408 = tpu.matmul %406, %407, %cst_133 {dimension_numbers = #tpu.dot_dimension_numbers<[1], [1], [0], [0], [0, 0, 1, 0], [], []>} : vector<8x8xf32>, vector<8x8xf32>, vector<8x8xf32> -> vector<8x8xf32>
    %409 = arith.addf %408, %357 : vector<8x8xf32>
    %cst_134 = arith.constant dense<0xFF800000> : vector<8xf32>
    %410 = vector.multi_reduction <maximumf>, %409, %cst_134 [1] : vector<8x8xf32> to vector<8xf32>
    %411 = vector.shape_cast %410 : vector<8xf32> to vector<8x1xf32>
    %412 = vector.broadcast %411 : vector<8x1xf32> to vector<8x8xf32>
    %413 = arith.subf %409, %412 : vector<8x8xf32>
    %414 = math.exp %413 : vector<8x8xf32>
    %cst_135 = arith.constant dense<0.000000e+00> : vector<8xf32>
    %415 = vector.multi_reduction <add>, %414, %cst_135 [1] : vector<8x8xf32> to vector<8xf32>
    %416 = vector.shape_cast %415 : vector<8xf32> to vector<8x1xf32>
    %417 = tpu.reciprocal %416 {approx = true} : vector<8x1xf32> -> vector<8x1xf32>
    %418 = vector.broadcast %417 : vector<8x1xf32> to vector<8x8xf32>
    %419 = arith.mulf %414, %418 : vector<8x8xf32>
    %420 = vector.extract_strided_slice %349 {offsets = [0, 24], sizes = [8, 8], strides = [1, 1]} : vector<8x32xf32> to vector<8x8xf32>
    %cst_136 = arith.constant dense<0.000000e+00> : vector<8x8xf32>
    %421 = tpu.matmul %419, %420, %cst_136 {dimension_numbers = #tpu.dot_dimension_numbers<[1], [0], [0], [1], [0, 0, 1, 1], [], []>} : vector<8x8xf32>, vector<8x8xf32>, vector<8x8xf32> -> vector<8x8xf32>
    %422 = tpu.concatenate %373, %389, %405, %421 in 1 : vector<8x8xf32>, vector<8x8xf32>, vector<8x8xf32>, vector<8x8xf32> -> vector<8x32xf32>
    %423 = tpu.concatenate %346, %422 in 0 : vector<8x32xf32>, vector<8x32xf32> -> vector<16x32xf32>
    %c0_137 = arith.constant 0 : index
    %c0_138 = arith.constant 0 : index
    %424 = vector.load %arg22[%c0_137, %c0_138] : memref<32x32xf32, #tpu.memory_space<vmem>>, vector<32x32xf32>
    %cst_139 = arith.constant dense<0.000000e+00> : vector<16x32xf32>
    %425 = tpu.matmul %423, %424, %cst_139 {dimension_numbers = #tpu.dot_dimension_numbers<[1], [0], [0], [1], [0, 0, 1, 1], [], []>} : vector<16x32xf32>, vector<32x32xf32>, vector<16x32xf32> -> vector<16x32xf32>
    %c0_140 = arith.constant 0 : index
    %c0_141 = arith.constant 0 : index
    %426 = vector.load %arg23[%c0_140, %c0_141] : memref<1x32xf32, #tpu.memory_space<vmem>>, vector<1x32xf32>
    %427 = vector.broadcast %426 : vector<1x32xf32> to vector<16x32xf32>
    %428 = arith.addf %425, %427 : vector<16x32xf32>
    %429 = arith.addf %262, %428 : vector<16x32xf32>
    %cst_142 = arith.constant dense<0.000000e+00> : vector<16xf32>
    %430 = vector.multi_reduction <add>, %429, %cst_142 [1] : vector<16x32xf32> to vector<16xf32>
    %431 = vector.shape_cast %430 : vector<16xf32> to vector<16x1xf32>
    %cst_143 = arith.constant 3.200000e+01 : f32
    %432 = vector.broadcast %cst_143 : f32 to vector<16x1xf32>
    %433 = arith.divf %431, %432 : vector<16x1xf32>
    %434 = vector.broadcast %433 : vector<16x1xf32> to vector<16x32xf32>
    %435 = arith.subf %429, %434 : vector<16x32xf32>
    %436 = arith.mulf %435, %435 : vector<16x32xf32>
    %cst_144 = arith.constant dense<0.000000e+00> : vector<16xf32>
    %437 = vector.multi_reduction <add>, %436, %cst_144 [1] : vector<16x32xf32> to vector<16xf32>
    %438 = vector.shape_cast %437 : vector<16xf32> to vector<16x1xf32>
    %cst_145 = arith.constant 3.200000e+01 : f32
    %439 = vector.broadcast %cst_145 : f32 to vector<16x1xf32>
    %440 = arith.divf %438, %439 : vector<16x1xf32>
    %441 = vector.broadcast %433 : vector<16x1xf32> to vector<16x32xf32>
    %442 = arith.subf %429, %441 : vector<16x32xf32>
    %cst_146 = arith.constant 9.99999974E-6 : f32
    %443 = vector.broadcast %cst_146 : f32 to vector<16x1xf32>
    %444 = arith.addf %440, %443 : vector<16x1xf32>
    %445 = math.rsqrt %444 : vector<16x1xf32>
    %446 = vector.broadcast %445 : vector<16x1xf32> to vector<16x32xf32>
    %447 = arith.mulf %442, %446 : vector<16x32xf32>
    %c0_147 = arith.constant 0 : index
    %c0_148 = arith.constant 0 : index
    %448 = vector.load %arg24[%c0_147, %c0_148] : memref<1x32xf32, #tpu.memory_space<vmem>>, vector<1x32xf32>
    %449 = vector.broadcast %448 : vector<1x32xf32> to vector<16x32xf32>
    %450 = arith.mulf %447, %449 : vector<16x32xf32>
    %c0_149 = arith.constant 0 : index
    %c0_150 = arith.constant 0 : index
    %451 = vector.load %arg25[%c0_149, %c0_150] : memref<1x32xf32, #tpu.memory_space<vmem>>, vector<1x32xf32>
    %452 = vector.broadcast %451 : vector<1x32xf32> to vector<16x32xf32>
    %453 = arith.addf %450, %452 : vector<16x32xf32>
    %c0_151 = arith.constant 0 : index
    %c0_152 = arith.constant 0 : index
    %454 = vector.load %arg26[%c0_151, %c0_152] : memref<32x32xf32, #tpu.memory_space<vmem>>, vector<32x32xf32>
    %cst_153 = arith.constant dense<0.000000e+00> : vector<16x32xf32>
    %455 = tpu.matmul %453, %454, %cst_153 {dimension_numbers = #tpu.dot_dimension_numbers<[1], [0], [0], [1], [0, 0, 1, 1], [], []>} : vector<16x32xf32>, vector<32x32xf32>, vector<16x32xf32> -> vector<16x32xf32>
    %c0_154 = arith.constant 0 : index
    %c0_155 = arith.constant 0 : index
    %456 = vector.load %arg27[%c0_154, %c0_155] : memref<1x32xf32, #tpu.memory_space<vmem>>, vector<1x32xf32>
    %457 = vector.broadcast %456 : vector<1x32xf32> to vector<16x32xf32>
    %458 = arith.addf %455, %457 : vector<16x32xf32>
    %c0_156 = arith.constant 0 : index
    %c0_157 = arith.constant 0 : index
    %459 = vector.load %arg28[%c0_156, %c0_157] : memref<32x64xf32, #tpu.memory_space<vmem>>, vector<32x64xf32>
    %cst_158 = arith.constant dense<0.000000e+00> : vector<16x64xf32>
    %460 = tpu.matmul %249, %459, %cst_158 {dimension_numbers = #tpu.dot_dimension_numbers<[1], [0], [0], [1], [0, 0, 1, 1], [], []>} : vector<16x32xf32>, vector<32x64xf32>, vector<16x64xf32> -> vector<16x64xf32>
    %c0_159 = arith.constant 0 : index
    %c0_160 = arith.constant 0 : index
    %461 = vector.load %arg29[%c0_159, %c0_160] : memref<1x64xf32, #tpu.memory_space<vmem>>, vector<1x64xf32>
    %462 = vector.broadcast %461 : vector<1x64xf32> to vector<16x64xf32>
    %463 = arith.addf %460, %462 : vector<16x64xf32>
    %464 = vector.extract_strided_slice %463 {offsets = [0, 0], sizes = [16, 32], strides = [1, 1]} : vector<16x64xf32> to vector<16x32xf32>
    %465 = vector.extract_strided_slice %463 {offsets = [0, 32], sizes = [16, 32], strides = [1, 1]} : vector<16x64xf32> to vector<16x32xf32>
    %466 = vector.extract_strided_slice %458 {offsets = [0, 0], sizes = [8, 32], strides = [1, 1]} : vector<16x32xf32> to vector<8x32xf32>
    %467 = vector.extract_strided_slice %464 {offsets = [0, 0], sizes = [8, 32], strides = [1, 1]} : vector<16x32xf32> to vector<8x32xf32>
    %468 = vector.extract_strided_slice %465 {offsets = [0, 0], sizes = [8, 32], strides = [1, 1]} : vector<16x32xf32> to vector<8x32xf32>
    %469 = vector.extract_strided_slice %0 {offsets = [0, 0], sizes = [1, 8], strides = [1, 1]} : vector<2x8xi32> to vector<1x8xi32>
    %c0_i32_161 = arith.constant 0 : i32
    %470 = vector.broadcast %c0_i32_161 : i32 to vector<1x8xi32>
    %471 = arith.cmpi ne, %469, %470 : vector<1x8xi32>
    %cst_162 = arith.constant 0.000000e+00 : f32
    %cst_163 = arith.constant -1.000000e+09 : f32
    %472 = vector.broadcast %cst_162 : f32 to vector<1x8xf32>
    %473 = vector.broadcast %cst_163 : f32 to vector<1x8xf32>
    %474 = arith.select %471, %472, %473 : vector<1x8xi1>, vector<1x8xf32>
    %475 = vector.extract_strided_slice %466 {offsets = [0, 0], sizes = [8, 8], strides = [1, 1]} : vector<8x32xf32> to vector<8x8xf32>
    %476 = vector.extract_strided_slice %467 {offsets = [0, 0], sizes = [8, 8], strides = [1, 1]} : vector<8x32xf32> to vector<8x8xf32>
    %cst_164 = arith.constant dense<0.000000e+00> : vector<8x8xf32>
    %477 = tpu.matmul %475, %476, %cst_164 {dimension_numbers = #tpu.dot_dimension_numbers<[1], [1], [0], [0], [0, 0, 1, 0], [], []>} : vector<8x8xf32>, vector<8x8xf32>, vector<8x8xf32> -> vector<8x8xf32>
    %478 = vector.broadcast %474 : vector<1x8xf32> to vector<8x8xf32>
    %479 = arith.addf %477, %478 : vector<8x8xf32>
    %cst_165 = arith.constant dense<0xFF800000> : vector<8xf32>
    %480 = vector.multi_reduction <maximumf>, %479, %cst_165 [1] : vector<8x8xf32> to vector<8xf32>
    %481 = vector.shape_cast %480 : vector<8xf32> to vector<8x1xf32>
    %482 = vector.broadcast %481 : vector<8x1xf32> to vector<8x8xf32>
    %483 = arith.subf %479, %482 : vector<8x8xf32>
    %484 = math.exp %483 : vector<8x8xf32>
    %cst_166 = arith.constant dense<0.000000e+00> : vector<8xf32>
    %485 = vector.multi_reduction <add>, %484, %cst_166 [1] : vector<8x8xf32> to vector<8xf32>
    %486 = vector.shape_cast %485 : vector<8xf32> to vector<8x1xf32>
    %487 = tpu.reciprocal %486 {approx = true} : vector<8x1xf32> -> vector<8x1xf32>
    %488 = vector.broadcast %487 : vector<8x1xf32> to vector<8x8xf32>
    %489 = arith.mulf %484, %488 : vector<8x8xf32>
    %490 = vector.extract_strided_slice %468 {offsets = [0, 0], sizes = [8, 8], strides = [1, 1]} : vector<8x32xf32> to vector<8x8xf32>
    %cst_167 = arith.constant dense<0.000000e+00> : vector<8x8xf32>
    %491 = tpu.matmul %489, %490, %cst_167 {dimension_numbers = #tpu.dot_dimension_numbers<[1], [0], [0], [1], [0, 0, 1, 1], [], []>} : vector<8x8xf32>, vector<8x8xf32>, vector<8x8xf32> -> vector<8x8xf32>
    %492 = vector.extract_strided_slice %466 {offsets = [0, 8], sizes = [8, 8], strides = [1, 1]} : vector<8x32xf32> to vector<8x8xf32>
    %493 = vector.extract_strided_slice %467 {offsets = [0, 8], sizes = [8, 8], strides = [1, 1]} : vector<8x32xf32> to vector<8x8xf32>
    %cst_168 = arith.constant dense<0.000000e+00> : vector<8x8xf32>
    %494 = tpu.matmul %492, %493, %cst_168 {dimension_numbers = #tpu.dot_dimension_numbers<[1], [1], [0], [0], [0, 0, 1, 0], [], []>} : vector<8x8xf32>, vector<8x8xf32>, vector<8x8xf32> -> vector<8x8xf32>
    %495 = vector.broadcast %474 : vector<1x8xf32> to vector<8x8xf32>
    %496 = arith.addf %494, %495 : vector<8x8xf32>
    %cst_169 = arith.constant dense<0xFF800000> : vector<8xf32>
    %497 = vector.multi_reduction <maximumf>, %496, %cst_169 [1] : vector<8x8xf32> to vector<8xf32>
    %498 = vector.shape_cast %497 : vector<8xf32> to vector<8x1xf32>
    %499 = vector.broadcast %498 : vector<8x1xf32> to vector<8x8xf32>
    %500 = arith.subf %496, %499 : vector<8x8xf32>
    %501 = math.exp %500 : vector<8x8xf32>
    %cst_170 = arith.constant dense<0.000000e+00> : vector<8xf32>
    %502 = vector.multi_reduction <add>, %501, %cst_170 [1] : vector<8x8xf32> to vector<8xf32>
    %503 = vector.shape_cast %502 : vector<8xf32> to vector<8x1xf32>
    %504 = tpu.reciprocal %503 {approx = true} : vector<8x1xf32> -> vector<8x1xf32>
    %505 = vector.broadcast %504 : vector<8x1xf32> to vector<8x8xf32>
    %506 = arith.mulf %501, %505 : vector<8x8xf32>
    %507 = vector.extract_strided_slice %468 {offsets = [0, 8], sizes = [8, 8], strides = [1, 1]} : vector<8x32xf32> to vector<8x8xf32>
    %cst_171 = arith.constant dense<0.000000e+00> : vector<8x8xf32>
    %508 = tpu.matmul %506, %507, %cst_171 {dimension_numbers = #tpu.dot_dimension_numbers<[1], [0], [0], [1], [0, 0, 1, 1], [], []>} : vector<8x8xf32>, vector<8x8xf32>, vector<8x8xf32> -> vector<8x8xf32>
    %509 = vector.extract_strided_slice %466 {offsets = [0, 16], sizes = [8, 8], strides = [1, 1]} : vector<8x32xf32> to vector<8x8xf32>
    %510 = vector.extract_strided_slice %467 {offsets = [0, 16], sizes = [8, 8], strides = [1, 1]} : vector<8x32xf32> to vector<8x8xf32>
    %cst_172 = arith.constant dense<0.000000e+00> : vector<8x8xf32>
    %511 = tpu.matmul %509, %510, %cst_172 {dimension_numbers = #tpu.dot_dimension_numbers<[1], [1], [0], [0], [0, 0, 1, 0], [], []>} : vector<8x8xf32>, vector<8x8xf32>, vector<8x8xf32> -> vector<8x8xf32>
    %512 = vector.broadcast %474 : vector<1x8xf32> to vector<8x8xf32>
    %513 = arith.addf %511, %512 : vector<8x8xf32>
    %cst_173 = arith.constant dense<0xFF800000> : vector<8xf32>
    %514 = vector.multi_reduction <maximumf>, %513, %cst_173 [1] : vector<8x8xf32> to vector<8xf32>
    %515 = vector.shape_cast %514 : vector<8xf32> to vector<8x1xf32>
    %516 = vector.broadcast %515 : vector<8x1xf32> to vector<8x8xf32>
    %517 = arith.subf %513, %516 : vector<8x8xf32>
    %518 = math.exp %517 : vector<8x8xf32>
    %cst_174 = arith.constant dense<0.000000e+00> : vector<8xf32>
    %519 = vector.multi_reduction <add>, %518, %cst_174 [1] : vector<8x8xf32> to vector<8xf32>
    %520 = vector.shape_cast %519 : vector<8xf32> to vector<8x1xf32>
    %521 = tpu.reciprocal %520 {approx = true} : vector<8x1xf32> -> vector<8x1xf32>
    %522 = vector.broadcast %521 : vector<8x1xf32> to vector<8x8xf32>
    %523 = arith.mulf %518, %522 : vector<8x8xf32>
    %524 = vector.extract_strided_slice %468 {offsets = [0, 16], sizes = [8, 8], strides = [1, 1]} : vector<8x32xf32> to vector<8x8xf32>
    %cst_175 = arith.constant dense<0.000000e+00> : vector<8x8xf32>
    %525 = tpu.matmul %523, %524, %cst_175 {dimension_numbers = #tpu.dot_dimension_numbers<[1], [0], [0], [1], [0, 0, 1, 1], [], []>} : vector<8x8xf32>, vector<8x8xf32>, vector<8x8xf32> -> vector<8x8xf32>
    %526 = vector.extract_strided_slice %466 {offsets = [0, 24], sizes = [8, 8], strides = [1, 1]} : vector<8x32xf32> to vector<8x8xf32>
    %527 = vector.extract_strided_slice %467 {offsets = [0, 24], sizes = [8, 8], strides = [1, 1]} : vector<8x32xf32> to vector<8x8xf32>
    %cst_176 = arith.constant dense<0.000000e+00> : vector<8x8xf32>
    %528 = tpu.matmul %526, %527, %cst_176 {dimension_numbers = #tpu.dot_dimension_numbers<[1], [1], [0], [0], [0, 0, 1, 0], [], []>} : vector<8x8xf32>, vector<8x8xf32>, vector<8x8xf32> -> vector<8x8xf32>
    %529 = vector.broadcast %474 : vector<1x8xf32> to vector<8x8xf32>
    %530 = arith.addf %528, %529 : vector<8x8xf32>
    %cst_177 = arith.constant dense<0xFF800000> : vector<8xf32>
    %531 = vector.multi_reduction <maximumf>, %530, %cst_177 [1] : vector<8x8xf32> to vector<8xf32>
    %532 = vector.shape_cast %531 : vector<8xf32> to vector<8x1xf32>
    %533 = vector.broadcast %532 : vector<8x1xf32> to vector<8x8xf32>
    %534 = arith.subf %530, %533 : vector<8x8xf32>
    %535 = math.exp %534 : vector<8x8xf32>
    %cst_178 = arith.constant dense<0.000000e+00> : vector<8xf32>
    %536 = vector.multi_reduction <add>, %535, %cst_178 [1] : vector<8x8xf32> to vector<8xf32>
    %537 = vector.shape_cast %536 : vector<8xf32> to vector<8x1xf32>
    %538 = tpu.reciprocal %537 {approx = true} : vector<8x1xf32> -> vector<8x1xf32>
    %539 = vector.broadcast %538 : vector<8x1xf32> to vector<8x8xf32>
    %540 = arith.mulf %535, %539 : vector<8x8xf32>
    %541 = vector.extract_strided_slice %468 {offsets = [0, 24], sizes = [8, 8], strides = [1, 1]} : vector<8x32xf32> to vector<8x8xf32>
    %cst_179 = arith.constant dense<0.000000e+00> : vector<8x8xf32>
    %542 = tpu.matmul %540, %541, %cst_179 {dimension_numbers = #tpu.dot_dimension_numbers<[1], [0], [0], [1], [0, 0, 1, 1], [], []>} : vector<8x8xf32>, vector<8x8xf32>, vector<8x8xf32> -> vector<8x8xf32>
    %543 = tpu.concatenate %491, %508, %525, %542 in 1 : vector<8x8xf32>, vector<8x8xf32>, vector<8x8xf32>, vector<8x8xf32> -> vector<8x32xf32>
    %544 = vector.extract_strided_slice %458 {offsets = [8, 0], sizes = [8, 32], strides = [1, 1]} : vector<16x32xf32> to vector<8x32xf32>
    %545 = vector.extract_strided_slice %464 {offsets = [8, 0], sizes = [8, 32], strides = [1, 1]} : vector<16x32xf32> to vector<8x32xf32>
    %546 = vector.extract_strided_slice %465 {offsets = [8, 0], sizes = [8, 32], strides = [1, 1]} : vector<16x32xf32> to vector<8x32xf32>
    %547 = vector.extract_strided_slice %0 {offsets = [1, 0], sizes = [1, 8], strides = [1, 1]} : vector<2x8xi32> to vector<1x8xi32>
    %c0_i32_180 = arith.constant 0 : i32
    %548 = vector.broadcast %c0_i32_180 : i32 to vector<1x8xi32>
    %549 = arith.cmpi ne, %547, %548 : vector<1x8xi32>
    %cst_181 = arith.constant 0.000000e+00 : f32
    %cst_182 = arith.constant -1.000000e+09 : f32
    %550 = vector.broadcast %cst_181 : f32 to vector<1x8xf32>
    %551 = vector.broadcast %cst_182 : f32 to vector<1x8xf32>
    %552 = arith.select %549, %550, %551 : vector<1x8xi1>, vector<1x8xf32>
    %553 = vector.extract_strided_slice %544 {offsets = [0, 0], sizes = [8, 8], strides = [1, 1]} : vector<8x32xf32> to vector<8x8xf32>
    %554 = vector.extract_strided_slice %545 {offsets = [0, 0], sizes = [8, 8], strides = [1, 1]} : vector<8x32xf32> to vector<8x8xf32>
    %cst_183 = arith.constant dense<0.000000e+00> : vector<8x8xf32>
    %555 = tpu.matmul %553, %554, %cst_183 {dimension_numbers = #tpu.dot_dimension_numbers<[1], [1], [0], [0], [0, 0, 1, 0], [], []>} : vector<8x8xf32>, vector<8x8xf32>, vector<8x8xf32> -> vector<8x8xf32>
    %556 = vector.broadcast %552 : vector<1x8xf32> to vector<8x8xf32>
    %557 = arith.addf %555, %556 : vector<8x8xf32>
    %cst_184 = arith.constant dense<0xFF800000> : vector<8xf32>
    %558 = vector.multi_reduction <maximumf>, %557, %cst_184 [1] : vector<8x8xf32> to vector<8xf32>
    %559 = vector.shape_cast %558 : vector<8xf32> to vector<8x1xf32>
    %560 = vector.broadcast %559 : vector<8x1xf32> to vector<8x8xf32>
    %561 = arith.subf %557, %560 : vector<8x8xf32>
    %562 = math.exp %561 : vector<8x8xf32>
    %cst_185 = arith.constant dense<0.000000e+00> : vector<8xf32>
    %563 = vector.multi_reduction <add>, %562, %cst_185 [1] : vector<8x8xf32> to vector<8xf32>
    %564 = vector.shape_cast %563 : vector<8xf32> to vector<8x1xf32>
    %565 = tpu.reciprocal %564 {approx = true} : vector<8x1xf32> -> vector<8x1xf32>
    %566 = vector.broadcast %565 : vector<8x1xf32> to vector<8x8xf32>
    %567 = arith.mulf %562, %566 : vector<8x8xf32>
    %568 = vector.extract_strided_slice %546 {offsets = [0, 0], sizes = [8, 8], strides = [1, 1]} : vector<8x32xf32> to vector<8x8xf32>
    %cst_186 = arith.constant dense<0.000000e+00> : vector<8x8xf32>
    %569 = tpu.matmul %567, %568, %cst_186 {dimension_numbers = #tpu.dot_dimension_numbers<[1], [0], [0], [1], [0, 0, 1, 1], [], []>} : vector<8x8xf32>, vector<8x8xf32>, vector<8x8xf32> -> vector<8x8xf32>
    %570 = vector.extract_strided_slice %544 {offsets = [0, 8], sizes = [8, 8], strides = [1, 1]} : vector<8x32xf32> to vector<8x8xf32>
    %571 = vector.extract_strided_slice %545 {offsets = [0, 8], sizes = [8, 8], strides = [1, 1]} : vector<8x32xf32> to vector<8x8xf32>
    %cst_187 = arith.constant dense<0.000000e+00> : vector<8x8xf32>
    %572 = tpu.matmul %570, %571, %cst_187 {dimension_numbers = #tpu.dot_dimension_numbers<[1], [1], [0], [0], [0, 0, 1, 0], [], []>} : vector<8x8xf32>, vector<8x8xf32>, vector<8x8xf32> -> vector<8x8xf32>
    %573 = vector.broadcast %552 : vector<1x8xf32> to vector<8x8xf32>
    %574 = arith.addf %572, %573 : vector<8x8xf32>
    %cst_188 = arith.constant dense<0xFF800000> : vector<8xf32>
    %575 = vector.multi_reduction <maximumf>, %574, %cst_188 [1] : vector<8x8xf32> to vector<8xf32>
    %576 = vector.shape_cast %575 : vector<8xf32> to vector<8x1xf32>
    %577 = vector.broadcast %576 : vector<8x1xf32> to vector<8x8xf32>
    %578 = arith.subf %574, %577 : vector<8x8xf32>
    %579 = math.exp %578 : vector<8x8xf32>
    %cst_189 = arith.constant dense<0.000000e+00> : vector<8xf32>
    %580 = vector.multi_reduction <add>, %579, %cst_189 [1] : vector<8x8xf32> to vector<8xf32>
    %581 = vector.shape_cast %580 : vector<8xf32> to vector<8x1xf32>
    %582 = tpu.reciprocal %581 {approx = true} : vector<8x1xf32> -> vector<8x1xf32>
    %583 = vector.broadcast %582 : vector<8x1xf32> to vector<8x8xf32>
    %584 = arith.mulf %579, %583 : vector<8x8xf32>
    %585 = vector.extract_strided_slice %546 {offsets = [0, 8], sizes = [8, 8], strides = [1, 1]} : vector<8x32xf32> to vector<8x8xf32>
    %cst_190 = arith.constant dense<0.000000e+00> : vector<8x8xf32>
    %586 = tpu.matmul %584, %585, %cst_190 {dimension_numbers = #tpu.dot_dimension_numbers<[1], [0], [0], [1], [0, 0, 1, 1], [], []>} : vector<8x8xf32>, vector<8x8xf32>, vector<8x8xf32> -> vector<8x8xf32>
    %587 = vector.extract_strided_slice %544 {offsets = [0, 16], sizes = [8, 8], strides = [1, 1]} : vector<8x32xf32> to vector<8x8xf32>
    %588 = vector.extract_strided_slice %545 {offsets = [0, 16], sizes = [8, 8], strides = [1, 1]} : vector<8x32xf32> to vector<8x8xf32>
    %cst_191 = arith.constant dense<0.000000e+00> : vector<8x8xf32>
    %589 = tpu.matmul %587, %588, %cst_191 {dimension_numbers = #tpu.dot_dimension_numbers<[1], [1], [0], [0], [0, 0, 1, 0], [], []>} : vector<8x8xf32>, vector<8x8xf32>, vector<8x8xf32> -> vector<8x8xf32>
    %590 = vector.broadcast %552 : vector<1x8xf32> to vector<8x8xf32>
    %591 = arith.addf %589, %590 : vector<8x8xf32>
    %cst_192 = arith.constant dense<0xFF800000> : vector<8xf32>
    %592 = vector.multi_reduction <maximumf>, %591, %cst_192 [1] : vector<8x8xf32> to vector<8xf32>
    %593 = vector.shape_cast %592 : vector<8xf32> to vector<8x1xf32>
    %594 = vector.broadcast %593 : vector<8x1xf32> to vector<8x8xf32>
    %595 = arith.subf %591, %594 : vector<8x8xf32>
    %596 = math.exp %595 : vector<8x8xf32>
    %cst_193 = arith.constant dense<0.000000e+00> : vector<8xf32>
    %597 = vector.multi_reduction <add>, %596, %cst_193 [1] : vector<8x8xf32> to vector<8xf32>
    %598 = vector.shape_cast %597 : vector<8xf32> to vector<8x1xf32>
    %599 = tpu.reciprocal %598 {approx = true} : vector<8x1xf32> -> vector<8x1xf32>
    %600 = vector.broadcast %599 : vector<8x1xf32> to vector<8x8xf32>
    %601 = arith.mulf %596, %600 : vector<8x8xf32>
    %602 = vector.extract_strided_slice %546 {offsets = [0, 16], sizes = [8, 8], strides = [1, 1]} : vector<8x32xf32> to vector<8x8xf32>
    %cst_194 = arith.constant dense<0.000000e+00> : vector<8x8xf32>
    %603 = tpu.matmul %601, %602, %cst_194 {dimension_numbers = #tpu.dot_dimension_numbers<[1], [0], [0], [1], [0, 0, 1, 1], [], []>} : vector<8x8xf32>, vector<8x8xf32>, vector<8x8xf32> -> vector<8x8xf32>
    %604 = vector.extract_strided_slice %544 {offsets = [0, 24], sizes = [8, 8], strides = [1, 1]} : vector<8x32xf32> to vector<8x8xf32>
    %605 = vector.extract_strided_slice %545 {offsets = [0, 24], sizes = [8, 8], strides = [1, 1]} : vector<8x32xf32> to vector<8x8xf32>
    %cst_195 = arith.constant dense<0.000000e+00> : vector<8x8xf32>
    %606 = tpu.matmul %604, %605, %cst_195 {dimension_numbers = #tpu.dot_dimension_numbers<[1], [1], [0], [0], [0, 0, 1, 0], [], []>} : vector<8x8xf32>, vector<8x8xf32>, vector<8x8xf32> -> vector<8x8xf32>
    %607 = vector.broadcast %552 : vector<1x8xf32> to vector<8x8xf32>
    %608 = arith.addf %606, %607 : vector<8x8xf32>
    %cst_196 = arith.constant dense<0xFF800000> : vector<8xf32>
    %609 = vector.multi_reduction <maximumf>, %608, %cst_196 [1] : vector<8x8xf32> to vector<8xf32>
    %610 = vector.shape_cast %609 : vector<8xf32> to vector<8x1xf32>
    %611 = vector.broadcast %610 : vector<8x1xf32> to vector<8x8xf32>
    %612 = arith.subf %608, %611 : vector<8x8xf32>
    %613 = math.exp %612 : vector<8x8xf32>
    %cst_197 = arith.constant dense<0.000000e+00> : vector<8xf32>
    %614 = vector.multi_reduction <add>, %613, %cst_197 [1] : vector<8x8xf32> to vector<8xf32>
    %615 = vector.shape_cast %614 : vector<8xf32> to vector<8x1xf32>
    %616 = tpu.reciprocal %615 {approx = true} : vector<8x1xf32> -> vector<8x1xf32>
    %617 = vector.broadcast %616 : vector<8x1xf32> to vector<8x8xf32>
    %618 = arith.mulf %613, %617 : vector<8x8xf32>
    %619 = vector.extract_strided_slice %546 {offsets = [0, 24], sizes = [8, 8], strides = [1, 1]} : vector<8x32xf32> to vector<8x8xf32>
    %cst_198 = arith.constant dense<0.000000e+00> : vector<8x8xf32>
    %620 = tpu.matmul %618, %619, %cst_198 {dimension_numbers = #tpu.dot_dimension_numbers<[1], [0], [0], [1], [0, 0, 1, 1], [], []>} : vector<8x8xf32>, vector<8x8xf32>, vector<8x8xf32> -> vector<8x8xf32>
    %621 = tpu.concatenate %569, %586, %603, %620 in 1 : vector<8x8xf32>, vector<8x8xf32>, vector<8x8xf32>, vector<8x8xf32> -> vector<8x32xf32>
    %622 = tpu.concatenate %543, %621 in 0 : vector<8x32xf32>, vector<8x32xf32> -> vector<16x32xf32>
    %c0_199 = arith.constant 0 : index
    %c0_200 = arith.constant 0 : index
    %623 = vector.load %arg30[%c0_199, %c0_200] : memref<32x32xf32, #tpu.memory_space<vmem>>, vector<32x32xf32>
    %cst_201 = arith.constant dense<0.000000e+00> : vector<16x32xf32>
    %624 = tpu.matmul %622, %623, %cst_201 {dimension_numbers = #tpu.dot_dimension_numbers<[1], [0], [0], [1], [0, 0, 1, 1], [], []>} : vector<16x32xf32>, vector<32x32xf32>, vector<16x32xf32> -> vector<16x32xf32>
    %c0_202 = arith.constant 0 : index
    %c0_203 = arith.constant 0 : index
    %625 = vector.load %arg31[%c0_202, %c0_203] : memref<1x32xf32, #tpu.memory_space<vmem>>, vector<1x32xf32>
    %626 = vector.broadcast %625 : vector<1x32xf32> to vector<16x32xf32>
    %627 = arith.addf %624, %626 : vector<16x32xf32>
    %628 = arith.addf %453, %627 : vector<16x32xf32>
    %cst_204 = arith.constant dense<0.000000e+00> : vector<16xf32>
    %629 = vector.multi_reduction <add>, %628, %cst_204 [1] : vector<16x32xf32> to vector<16xf32>
    %630 = vector.shape_cast %629 : vector<16xf32> to vector<16x1xf32>
    %cst_205 = arith.constant 3.200000e+01 : f32
    %631 = vector.broadcast %cst_205 : f32 to vector<16x1xf32>
    %632 = arith.divf %630, %631 : vector<16x1xf32>
    %633 = vector.broadcast %632 : vector<16x1xf32> to vector<16x32xf32>
    %634 = arith.subf %628, %633 : vector<16x32xf32>
    %635 = arith.mulf %634, %634 : vector<16x32xf32>
    %cst_206 = arith.constant dense<0.000000e+00> : vector<16xf32>
    %636 = vector.multi_reduction <add>, %635, %cst_206 [1] : vector<16x32xf32> to vector<16xf32>
    %637 = vector.shape_cast %636 : vector<16xf32> to vector<16x1xf32>
    %cst_207 = arith.constant 3.200000e+01 : f32
    %638 = vector.broadcast %cst_207 : f32 to vector<16x1xf32>
    %639 = arith.divf %637, %638 : vector<16x1xf32>
    %640 = vector.broadcast %632 : vector<16x1xf32> to vector<16x32xf32>
    %641 = arith.subf %628, %640 : vector<16x32xf32>
    %cst_208 = arith.constant 9.99999974E-6 : f32
    %642 = vector.broadcast %cst_208 : f32 to vector<16x1xf32>
    %643 = arith.addf %639, %642 : vector<16x1xf32>
    %644 = math.rsqrt %643 : vector<16x1xf32>
    %645 = vector.broadcast %644 : vector<16x1xf32> to vector<16x32xf32>
    %646 = arith.mulf %641, %645 : vector<16x32xf32>
    %c0_209 = arith.constant 0 : index
    %c0_210 = arith.constant 0 : index
    %647 = vector.load %arg32[%c0_209, %c0_210] : memref<1x32xf32, #tpu.memory_space<vmem>>, vector<1x32xf32>
    %648 = vector.broadcast %647 : vector<1x32xf32> to vector<16x32xf32>
    %649 = arith.mulf %646, %648 : vector<16x32xf32>
    %c0_211 = arith.constant 0 : index
    %c0_212 = arith.constant 0 : index
    %650 = vector.load %arg33[%c0_211, %c0_212] : memref<1x32xf32, #tpu.memory_space<vmem>>, vector<1x32xf32>
    %651 = vector.broadcast %650 : vector<1x32xf32> to vector<16x32xf32>
    %652 = arith.addf %649, %651 : vector<16x32xf32>
    %c0_213 = arith.constant 0 : index
    %c0_214 = arith.constant 0 : index
    %653 = vector.load %arg34[%c0_213, %c0_214] : memref<32x64xf32, #tpu.memory_space<vmem>>, vector<32x64xf32>
    %cst_215 = arith.constant dense<0.000000e+00> : vector<16x64xf32>
    %654 = tpu.matmul %652, %653, %cst_215 {dimension_numbers = #tpu.dot_dimension_numbers<[1], [0], [0], [1], [0, 0, 1, 1], [], []>} : vector<16x32xf32>, vector<32x64xf32>, vector<16x64xf32> -> vector<16x64xf32>
    %c0_216 = arith.constant 0 : index
    %c0_217 = arith.constant 0 : index
    %655 = vector.load %arg35[%c0_216, %c0_217] : memref<1x64xf32, #tpu.memory_space<vmem>>, vector<1x64xf32>
    %656 = vector.broadcast %655 : vector<1x64xf32> to vector<16x64xf32>
    %657 = arith.addf %654, %656 : vector<16x64xf32>
    %cst_218 = arith.constant 0.000000e+00 : f32
    %658 = vector.broadcast %cst_218 : f32 to vector<16x64xf32>
    %659 = arith.maximumf %657, %658 : vector<16x64xf32>
    %c0_219 = arith.constant 0 : index
    %c0_220 = arith.constant 0 : index
    %660 = vector.load %arg36[%c0_219, %c0_220] : memref<64x32xf32, #tpu.memory_space<vmem>>, vector<64x32xf32>
    %cst_221 = arith.constant dense<0.000000e+00> : vector<16x32xf32>
    %661 = tpu.matmul %659, %660, %cst_221 {dimension_numbers = #tpu.dot_dimension_numbers<[1], [0], [0], [1], [0, 0, 1, 1], [], []>} : vector<16x64xf32>, vector<64x32xf32>, vector<16x32xf32> -> vector<16x32xf32>
    %c0_222 = arith.constant 0 : index
    %c0_223 = arith.constant 0 : index
    %662 = vector.load %arg37[%c0_222, %c0_223] : memref<1x32xf32, #tpu.memory_space<vmem>>, vector<1x32xf32>
    %663 = vector.broadcast %662 : vector<1x32xf32> to vector<16x32xf32>
    %664 = arith.addf %661, %663 : vector<16x32xf32>
    %665 = arith.addf %652, %664 : vector<16x32xf32>
    %cst_224 = arith.constant dense<0.000000e+00> : vector<16xf32>
    %666 = vector.multi_reduction <add>, %665, %cst_224 [1] : vector<16x32xf32> to vector<16xf32>
    %667 = vector.shape_cast %666 : vector<16xf32> to vector<16x1xf32>
    %cst_225 = arith.constant 3.200000e+01 : f32
    %668 = vector.broadcast %cst_225 : f32 to vector<16x1xf32>
    %669 = arith.divf %667, %668 : vector<16x1xf32>
    %670 = vector.broadcast %669 : vector<16x1xf32> to vector<16x32xf32>
    %671 = arith.subf %665, %670 : vector<16x32xf32>
    %672 = arith.mulf %671, %671 : vector<16x32xf32>
    %cst_226 = arith.constant dense<0.000000e+00> : vector<16xf32>
    %673 = vector.multi_reduction <add>, %672, %cst_226 [1] : vector<16x32xf32> to vector<16xf32>
    %674 = vector.shape_cast %673 : vector<16xf32> to vector<16x1xf32>
    %cst_227 = arith.constant 3.200000e+01 : f32
    %675 = vector.broadcast %cst_227 : f32 to vector<16x1xf32>
    %676 = arith.divf %674, %675 : vector<16x1xf32>
    %677 = vector.broadcast %669 : vector<16x1xf32> to vector<16x32xf32>
    %678 = arith.subf %665, %677 : vector<16x32xf32>
    %cst_228 = arith.constant 9.99999974E-6 : f32
    %679 = vector.broadcast %cst_228 : f32 to vector<16x1xf32>
    %680 = arith.addf %676, %679 : vector<16x1xf32>
    %681 = math.rsqrt %680 : vector<16x1xf32>
    %682 = vector.broadcast %681 : vector<16x1xf32> to vector<16x32xf32>
    %683 = arith.mulf %678, %682 : vector<16x32xf32>
    %c0_229 = arith.constant 0 : index
    %c0_230 = arith.constant 0 : index
    %684 = vector.load %arg38[%c0_229, %c0_230] : memref<1x32xf32, #tpu.memory_space<vmem>>, vector<1x32xf32>
    %685 = vector.broadcast %684 : vector<1x32xf32> to vector<16x32xf32>
    %686 = arith.mulf %683, %685 : vector<16x32xf32>
    %c0_231 = arith.constant 0 : index
    %c0_232 = arith.constant 0 : index
    %687 = vector.load %arg39[%c0_231, %c0_232] : memref<1x32xf32, #tpu.memory_space<vmem>>, vector<1x32xf32>
    %688 = vector.broadcast %687 : vector<1x32xf32> to vector<16x32xf32>
    %689 = arith.addf %686, %688 : vector<16x32xf32>
    %c0_233 = arith.constant 0 : index
    %c0_234 = arith.constant 0 : index
    %690 = vector.load %arg40[%c0_233, %c0_234] : memref<32x32xf32, #tpu.memory_space<vmem>>, vector<32x32xf32>
    %cst_235 = arith.constant dense<0.000000e+00> : vector<16x32xf32>
    %691 = tpu.matmul %689, %690, %cst_235 {dimension_numbers = #tpu.dot_dimension_numbers<[1], [0], [0], [1], [0, 0, 1, 1], [], []>} : vector<16x32xf32>, vector<32x32xf32>, vector<16x32xf32> -> vector<16x32xf32>
    %c0_236 = arith.constant 0 : index
    %c0_237 = arith.constant 0 : index
    %692 = vector.load %arg41[%c0_236, %c0_237] : memref<1x32xf32, #tpu.memory_space<vmem>>, vector<1x32xf32>
    %693 = vector.broadcast %692 : vector<1x32xf32> to vector<16x32xf32>
    %694 = arith.addf %691, %693 : vector<16x32xf32>
    %c0_238 = arith.constant 0 : index
    %c0_239 = arith.constant 0 : index
    %695 = vector.load %arg42[%c0_238, %c0_239] : memref<16x32xf32, #tpu.memory_space<vmem>>, vector<16x32xf32>
    tpu.vector_store %arg42[%c0_238, %c0_239], %694 {strides = array<i32>} : memref<16x32xf32, #tpu.memory_space<vmem>>, vector<16x32xf32>,
    return
  }
  func.func @transform_0(%arg0: i32) -> (i32, i32) {
    %c0_i32 = arith.constant 0 : i32
    %c0_i32_0 = arith.constant 0 : i32
    %c0_i32_1 = arith.constant 0 : i32
    return %c0_i32, %c0_i32_0 : i32, i32
  }
  func.func @transform_1(%arg0: i32) -> (i32, i32) {
    %c0_i32 = arith.constant 0 : i32
    %c0_i32_0 = arith.constant 0 : i32
    %c0_i32_1 = arith.constant 0 : i32
    return %c0_i32, %c0_i32_0 : i32, i32
  }
  func.func @transform_2(%arg0: i32) -> (i32, i32) {
    %c0_i32 = arith.constant 0 : i32
    %c0_i32_0 = arith.constant 0 : i32
    %c0_i32_1 = arith.constant 0 : i32
    return %c0_i32, %c0_i32_0 : i32, i32
  }
  func.func @transform_3(%arg0: i32) -> (i32, i32) {
    %c0_i32 = arith.constant 0 : i32
    %c0_i32_0 = arith.constant 0 : i32
    %c0_i32_1 = arith.constant 0 : i32
    return %c0_i32, %c0_i32_0 : i32, i32
  }
  func.func @transform_4(%arg0: i32) -> (i32, i32) {
    %c0_i32 = arith.constant 0 : i32
    %c0_i32_0 = arith.constant 0 : i32
    %c0_i32_1 = arith.constant 0 : i32
    return %c0_i32, %c0_i32_0 : i32, i32
  }
  func.func @transform_5(%arg0: i32) -> (i32, i32) {
    %c0_i32 = arith.constant 0 : i32
    %c0_i32_0 = arith.constant 0 : i32
    %c0_i32_1 = arith.constant 0 : i32
    return %c0_i32, %c0_i32_0 : i32, i32
  }
  func.func @transform_6(%arg0: i32) -> (i32, i32) {
    %c0_i32 = arith.constant 0 : i32
    %c0_i32_0 = arith.constant 0 : i32
    %c0_i32_1 = arith.constant 0 : i32
    return %c0_i32, %c0_i32_0 : i32, i32
  }
  func.func @transform_7(%arg0: i32) -> (i32, i32) {
    %c0_i32 = arith.constant 0 : i32
    %c0_i32_0 = arith.constant 0 : i32
    %c0_i32_1 = arith.constant 0 : i32
    return %c0_i32, %c0_i32_0 : i32, i32
  }
  func.func @transform_8(%arg0: i32) -> (i32, i32) {
    %c0_i32 = arith.constant 0 : i32
    %c0_i32_0 = arith.constant 0 : i32
    %c0_i32_1 = arith.constant 0 : i32
    return %c0_i32, %c0_i32_0 : i32, i32
  }
  func.func @transform_9(%arg0: i32) -> (i32, i32) {
    %c0_i32 = arith.constant 0 : i32
    %c0_i32_0 = arith.constant 0 : i32
    %c0_i32_1 = arith.constant 0 : i32
    return %c0_i32, %c0_i32_0 : i32, i32
  }
  func.func @transform_10(%arg0: i32) -> (i32, i32) {
    %c0_i32 = arith.constant 0 : i32
    %c0_i32_0 = arith.constant 0 : i32
    %c0_i32_1 = arith.constant 0 : i32
    return %c0_i32, %c0_i32_0 : i32, i32
  }
  func.func @transform_11(%arg0: i32) -> (i32, i32) {
    %c0_i32 = arith.constant 0 : i32
    %c0_i32_0 = arith.constant 0 : i32
    %c0_i32_1 = arith.constant 0 : i32
    return %c0_i32, %c0_i32_0 : i32, i32
  }
  func.func @transform_12(%arg0: i32) -> (i32, i32) {
    %c0_i32 = arith.constant 0 : i32
    %c0_i32_0 = arith.constant 0 : i32
    %c0_i32_1 = arith.constant 0 : i32
    return %c0_i32, %c0_i32_0 : i32, i32
  }
  func.func @transform_13(%arg0: i32) -> (i32, i32) {
    %c0_i32 = arith.constant 0 : i32
    %c0_i32_0 = arith.constant 0 : i32
    %c0_i32_1 = arith.constant 0 : i32
    return %c0_i32, %c0_i32_0 : i32, i32
  }
  func.func @transform_14(%arg0: i32) -> (i32, i32) {
    %c0_i32 = arith.constant 0 : i32
    %c0_i32_0 = arith.constant 0 : i32
    %c0_i32_1 = arith.constant 0 : i32
    return %c0_i32, %c0_i32_0 : i32, i32
  }
  func.func @transform_15(%arg0: i32) -> (i32, i32) {
    %c0_i32 = arith.constant 0 : i32
    %c0_i32_0 = arith.constant 0 : i32
    %c0_i32_1 = arith.constant 0 : i32
    return %c0_i32, %c0_i32_0 : i32, i32
  }
  func.func @transform_16(%arg0: i32) -> (i32, i32) {
    %c0_i32 = arith.constant 0 : i32
    %c0_i32_0 = arith.constant 0 : i32
    %c0_i32_1 = arith.constant 0 : i32
    return %c0_i32, %c0_i32_0 : i32, i32
  }
  func.func @transform_17(%arg0: i32) -> (i32, i32) {
    %c0_i32 = arith.constant 0 : i32
    %c0_i32_0 = arith.constant 0 : i32
    %c0_i32_1 = arith.constant 0 : i32
    return %c0_i32, %c0_i32_0 : i32, i32
  }
  func.func @transform_18(%arg0: i32) -> (i32, i32) {
    %c0_i32 = arith.constant 0 : i32
    %c0_i32_0 = arith.constant 0 : i32
    %c0_i32_1 = arith.constant 0 : i32
    return %c0_i32, %c0_i32_0 : i32, i32
  }
  func.func @transform_19(%arg0: i32) -> (i32, i32) {
    %c0_i32 = arith.constant 0 : i32
    %c0_i32_0 = arith.constant 0 : i32
    %c0_i32_1 = arith.constant 0 : i32
    return %c0_i32, %c0_i32_0 : i32, i32
  }
  func.func @transform_20(%arg0: i32) -> (i32, i32) {
    %c0_i32 = arith.constant 0 : i32
    %c0_i32_0 = arith.constant 0 : i32
    %c0_i32_1 = arith.constant 0 : i32
    return %c0_i32, %c0_i32_0 : i32, i32
  }
  func.func @transform_21(%arg0: i32) -> (i32, i32) {
    %c0_i32 = arith.constant 0 : i32
    %c0_i32_0 = arith.constant 0 : i32
    %c0_i32_1 = arith.constant 0 : i32
    return %c0_i32, %c0_i32_0 : i32, i32
  }
  func.func @transform_22(%arg0: i32) -> (i32, i32) {
    %c0_i32 = arith.constant 0 : i32
    %c0_i32_0 = arith.constant 0 : i32
    %c0_i32_1 = arith.constant 0 : i32
    return %c0_i32, %c0_i32_0 : i32, i32
  }
  func.func @transform_23(%arg0: i32) -> (i32, i32) {
    %c0_i32 = arith.constant 0 : i32
    %c0_i32_0 = arith.constant 0 : i32
    %c0_i32_1 = arith.constant 0 : i32
    return %c0_i32, %c0_i32_0 : i32, i32
  }
  func.func @transform_24(%arg0: i32) -> (i32, i32) {
    %c0_i32 = arith.constant 0 : i32
    %c0_i32_0 = arith.constant 0 : i32
    %c0_i32_1 = arith.constant 0 : i32
    return %c0_i32, %c0_i32_0 : i32, i32
  }
  func.func @transform_25(%arg0: i32) -> (i32, i32) {
    %c0_i32 = arith.constant 0 : i32
    %c0_i32_0 = arith.constant 0 : i32
    %c0_i32_1 = arith.constant 0 : i32
    return %c0_i32, %c0_i32_0 : i32, i32
  }
  func.func @transform_26(%arg0: i32) -> (i32, i32) {
    %c0_i32 = arith.constant 0 : i32
    %c0_i32_0 = arith.constant 0 : i32
    %c0_i32_1 = arith.constant 0 : i32
    return %c0_i32, %c0_i32_0 : i32, i32
  }
  func.func @transform_27(%arg0: i32) -> (i32, i32) {
    %c0_i32 = arith.constant 0 : i32
    %c0_i32_0 = arith.constant 0 : i32
    %c0_i32_1 = arith.constant 0 : i32
    return %c0_i32, %c0_i32_0 : i32, i32
  }
  func.func @transform_28(%arg0: i32) -> (i32, i32) {
    %c0_i32 = arith.constant 0 : i32
    %c0_i32_0 = arith.constant 0 : i32
    %c0_i32_1 = arith.constant 0 : i32
    return %c0_i32, %c0_i32_0 : i32, i32
  }
  func.func @transform_29(%arg0: i32) -> (i32, i32) {
    %c0_i32 = arith.constant 0 : i32
    %c0_i32_0 = arith.constant 0 : i32
    %c0_i32_1 = arith.constant 0 : i32
    return %c0_i32, %c0_i32_0 : i32, i32
  }
  func.func @transform_30(%arg0: i32) -> (i32, i32) {
    %c0_i32 = arith.constant 0 : i32
    %c0_i32_0 = arith.constant 0 : i32
    %c0_i32_1 = arith.constant 0 : i32
    return %c0_i32, %c0_i32_0 : i32, i32
  }
  func.func @transform_31(%arg0: i32) -> (i32, i32) {
    %c0_i32 = arith.constant 0 : i32
    %c0_i32_0 = arith.constant 0 : i32
    %c0_i32_1 = arith.constant 0 : i32
    return %c0_i32, %c0_i32_0 : i32, i32
  }
  func.func @transform_32(%arg0: i32) -> (i32, i32) {
    %c0_i32 = arith.constant 0 : i32
    %c0_i32_0 = arith.constant 0 : i32
    %c0_i32_1 = arith.constant 0 : i32
    return %c0_i32, %c0_i32_0 : i32, i32
  }
  func.func @transform_33(%arg0: i32) -> (i32, i32) {
    %c0_i32 = arith.constant 0 : i32
    %c0_i32_0 = arith.constant 0 : i32
    %c0_i32_1 = arith.constant 0 : i32
    return %c0_i32, %c0_i32_0 : i32, i32
  }
  func.func @transform_34(%arg0: i32) -> (i32, i32) {
    %c0_i32 = arith.constant 0 : i32
    %c0_i32_0 = arith.constant 0 : i32
    %c0_i32_1 = arith.constant 0 : i32
    return %c0_i32, %c0_i32_0 : i32, i32
  }
  func.func @transform_35(%arg0: i32) -> (i32, i32) {
    %c0_i32 = arith.constant 0 : i32
    %c0_i32_0 = arith.constant 0 : i32
    %c0_i32_1 = arith.constant 0 : i32
    return %c0_i32, %c0_i32_0 : i32, i32
  }
  func.func @transform_36(%arg0: i32) -> (i32, i32) {
    %c0_i32 = arith.constant 0 : i32
    %c0_i32_0 = arith.constant 0 : i32
    %c0_i32_1 = arith.constant 0 : i32
    return %c0_i32, %c0_i32_0 : i32, i32
  }
  func.func @transform_37(%arg0: i32) -> (i32, i32) {
    %c0_i32 = arith.constant 0 : i32
    %c0_i32_0 = arith.constant 0 : i32
    %c0_i32_1 = arith.constant 0 : i32
    return %c0_i32, %c0_i32_0 : i32, i32
  }
  func.func @transform_38(%arg0: i32) -> (i32, i32) {
    %c0_i32 = arith.constant 0 : i32
    %c0_i32_0 = arith.constant 0 : i32
    %c0_i32_1 = arith.constant 0 : i32
    return %c0_i32, %c0_i32_0 : i32, i32
  }
  func.func @transform_39(%arg0: i32) -> (i32, i32) {
    %c0_i32 = arith.constant 0 : i32
    %c0_i32_0 = arith.constant 0 : i32
    %c0_i32_1 = arith.constant 0 : i32
    return %c0_i32, %c0_i32_0 : i32, i32
  }
  func.func @transform_40(%arg0: i32) -> (i32, i32) {
    %c0_i32 = arith.constant 0 : i32
    %c0_i32_0 = arith.constant 0 : i32
    %c0_i32_1 = arith.constant 0 : i32
    return %c0_i32, %c0_i32_0 : i32, i32
  }
  func.func @transform_41(%arg0: i32) -> (i32, i32) {
    %c0_i32 = arith.constant 0 : i32
    %c0_i32_0 = arith.constant 0 : i32
    %c0_i32_1 = arith.constant 0 : i32
    return %c0_i32, %c0_i32_0 : i32, i32
  }
}

</mosaic_0001>

<bundles_post_ra>
// kernel: s2s_forward.1
= control target key start
LH: loop header
LB: loop body
LE: loop exit
PB: predicated region body
PF: predicated region fallthrough
CT: control target
= control target key end

     0   :  { %s7795_s6 = smov 1   ;;  %s7796_s10 = smov 2   ;;  %s8931_s0 = inlined_call_operand.smem [shape: u32[42], index: -1, kind: input, shape index: {}] }
   0x1   :  { %s7888_s5 = sld [smem:[%s8931_s0]]   ;;  %s7797_s14 = smov 3  }
   0x2   :  { %s7893_s9 = sld [smem:[%s8931_s0 + %s7795_s6]]   ;;  %s7798_s18 = smov 4  }
   0x3   :  { %s7898_s13 = sld [smem:[%s8931_s0 + %s7796_s10]]   ;;  %s7799_s22 = smov 5  }
   0x4   :  { %s7903_s17 = sld [smem:[%s8931_s0 + %s7797_s14]]   ;;  %s7800_s26 = smov 6  }
   0x5   :  { %s7908_s21 = sld [smem:[%s8931_s0 + %s7798_s18]]   ;;  %s7801_s30 = smov 7  }
   0x6   :  { %s7913_s25 = sld [smem:[%s8931_s0 + %s7799_s22]]   ;;  %s7802_s4 = smov 8  }
   0x7   :  { %8952 = sst [smem:[#allocation55_spill]] %s7888_s5  ;;  %s7803_s10 = smov 9  }
   0x8   :  { %8953 = sst [smem:[#allocation56_spill]] %s7893_s9  ;;  %s7804_s15 = smov 10  }
   0x9   :  { %8954 = sst [smem:[#allocation57_spill]] %s7898_s13  ;;  %s7805_s20 = smov 11  }
   0xa   :  { %8955 = sst [smem:[#allocation58_spill]] %s7903_s17  ;;  %s7807_s1 = smov 13  }
   0xb   :  { %8956 = sst [smem:[#allocation59_spill]] %s7908_s21  ;;  %s7808_s7 = smov 14  }
   0xc   :  { %8957 = sst [smem:[#allocation60_spill]] %s7913_s25  ;;  %s7810_s22 = smov 16  }
   0xd   :  { %s7918_s29 = sld [smem:[%s8931_s0 + %s7800_s26]]   ;;  %s7806_s26 = smov 12  }
   0xe   :  { %s7923_s3 = sld [smem:[%s8931_s0 + %s7801_s30]]   ;;  %s7811_s28 = smov 17  }
   0xf   :  { %s7928_s8 = sld [smem:[%s8931_s0 + %s7802_s4]]  }
  0x10   :  { %s7933_s14 = sld [smem:[%s8931_s0 + %s7803_s10]]  }
  0x11   :  { %s7938_s19 = sld [smem:[%s8931_s0 + %s7804_s15]]   ;;  %s7809_s15 = smov 15  }
  0x12   :  { %s7943_s24 = sld [smem:[%s8931_s0 + %s7805_s20]]  }
  0x13   :  { %8958 = sst [smem:[#allocation61_spill]] %s7918_s29 }
  0x14   :  { %8959 = sst [smem:[#allocation62_spill]] %s7923_s3 }
  0x15   :  { %8960 = sst [smem:[#allocation63_spill]] %s7928_s8 }
  0x16   :  { %8961 = sst [smem:[#allocation64_spill]] %s7933_s14 }
  0x17   :  { %s7948_s30 = sld [smem:[%s8931_s0 + %s7806_s26]]  }
  0x18   :  { %s7953_s6 = sld [smem:[%s8931_s0 + %s7807_s1]]  }
  0x19   :  { %s7958_s12 = sld [smem:[%s8931_s0 + %s7808_s7]]   ;;  %s7812_s7 = smov 18  }
  0x1a   :  { %s7963_s20 = sld [smem:[%s8931_s0 + %s7809_s15]]   ;;  %s7813_s15 = smov 19  }
  0x1b   :  { %s7968_s27 = sld [smem:[%s8931_s0 + %s7810_s22]]   ;;  %s7814_s22 = smov 20  }
  0x1c   :  { %s7973_s4 = sld [smem:[%s8931_s0 + %s7811_s28]]   ;;  %s7815_s28 = smov 21  }
  0x1d   :  { %s7978_s25 = sld [smem:[%s8931_s0 + %s7812_s7]]   ;;  %s7816_s7 = smov 22  }
  0x1e   :  { %8962 = sst [smem:[#allocation65_spill]] %s7953_s6 }
  0x1f   :  { %s7988_s6 = sld [smem:[%s8931_s0 + %s7814_s22]]   ;;  %s7818_s22 = smov 24  }
  0x20   :  { %8963 = sst [smem:[#allocation66_spill]] %s7963_s20 }
  0x21   :  { %s7983_s20 = sld [smem:[%s8931_s0 + %s7813_s15]]   ;;  %s7817_s15 = smov 23  }
  0x22   :  { %s7993_s17 = sld [smem:[%s8931_s0 + %s7815_s28]]   ;;  %s7819_s28 = smov 25  }
  0x23   :  { %8964 = sst [smem:[#allocation67_spill]] %s7978_s25 }
  0x24   :  { %s7998_s14 = sld [smem:[%s8931_s0 + %s7816_s7]]   ;;  %s7820_s7 = smov 26  }
  0x25   :  { %s8008_s5 = sld [smem:[%s8931_s0 + %s7818_s22]]   ;;  %s7822_s22 = smov 28  }
  0x26   :  { %s8018_s8 = sld [smem:[%s8931_s0 + %s7820_s7]]   ;;  %s7824_s7 = smov 30  }
  0x27   :  { %8965 = sst [smem:[#allocation68_spill]] %s7983_s20 }
  0x28   :  { %8966 = sst [smem:[#allocation69_spill]] %s7993_s17 }
  0x29   :  { %s8003_s20 = sld [smem:[%s8931_s0 + %s7817_s15]]   ;;  %s7821_s15 = smov 27  }
  0x2a   :  { %8967 = sst [smem:[#allocation70_spill]] %s7998_s14 }
  0x2b   :  { %8968 = sst [smem:[#allocation71_spill]] %s8008_s5 }
  0x2c   :  { %s8013_s17 = sld [smem:[%s8931_s0 + %s7819_s28]]   ;;  %s7823_s28 = smov 29  }
  0x2d   :  { %8969 = sst [smem:[#allocation72_spill]] %s8018_s8 }
  0x2e   :  { %s8023_s29 = sld [smem:[%s8931_s0 + %s7821_s15]]   ;;  %s7825_s15 = smov 31  }
  0x2f   :  { %s8028_s3 = sld [smem:[%s8931_s0 + %s7822_s22]]   ;;  %s7826_s22 = smov 32  }
  0x30   :  { %s8033_s21 = sld [smem:[%s8931_s0 + %s7823_s28]]   ;;  %s7827_s28 = smov 33  }
  0x31   :  { %s8038_s9 = sld [smem:[%s8931_s0 + %s7824_s7]]   ;;  %s7828_s7 = smov 34  }
  0x32   :  { %s8043_s13 = sld [smem:[%s8931_s0 + %s7825_s15]]   ;;  %s7829_s15 = smov 35  }
  0x33   :  { %s8053_s8 = sld [smem:[%s8931_s0 + %s7827_s28]]   ;;  %s7831_s28 = smov 37  }
  0x34   :  { %s8063_s5 = sld [smem:[%s8931_s0 + %s7829_s15]]   ;;  %s7833_s15 = smov 39  }
  0x35   :  { %8970 = sst [smem:[#allocation73_spill]] %s8028_s3 }
  0x36   :  { %s8048_s3 = sld [smem:[%s8931_s0 + %s7826_s22]]   ;;  %s7830_s22 = smov 36  }
  0x37   :  { %8971 = sst [smem:[#allocation74_spill]] %s8038_s9 }
  0x38   :  { %s8058_s9 = sld [smem:[%s8931_s0 + %s7828_s7]]   ;;  %s7832_s7 = smov 38  }
  0x39   :  { %s8073_s14 = sld [smem:[%s8931_s0 + %s7831_s28]]   ;;  %s7835_s28 = smov 41  }
  0x3a   :  { %8974 = sst [smem:[#allocation77_spill]] %s8063_s5 }
  0x3b   :  { %s8083_s5 = sld [smem:[%s8931_s0 + %s7833_s15]]  }
  0x3c   :  { %8972 = sst [smem:[#allocation75_spill]] %s8048_s3 }
  0x3d   :  { %s8068_s3 = sld [smem:[%s8931_s0 + %s7830_s22]]   ;;  %s7834_s22 = smov 40  }
  0x3e   :  { %8973 = sst [smem:[#allocation76_spill]] %s8058_s9 }
  0x3f   :  { %8975 = sst [smem:[#allocation78_spill]] %s8073_s14 }
  0x40   :  { %s8078_s9 = sld [smem:[%s8931_s0 + %s7832_s7]]  }
  0x41   :  { %s8088_s25 = sld [smem:[%s8931_s0 + %s7834_s22]]  }
  0x42   :  { %s8093_s14 = sld [smem:[%s8931_s0 + %s7835_s28]]  }
  0x43   :  { %88 = vsyncpa [#allocation3], 0 }
  0x44   :  { %89 = vsyncpa [#allocation6], 0 }
  0x45   :  { %90 = vsyncpa [#allocation9], 0 }
  0x46   :  { %91 = vsyncpa [#allocation12], 0 }
  0x47   :  { %92 = vsyncpa [#allocation15], 0 }
  0x48   :  { %93 = vsyncpa [#allocation18], 0 }
  0x49   :  { %94 = vsyncpa [#allocation21], 0 }
  0x4a   :  { %95 = vsyncpa [#allocation24], 0 }
  0x4b   :  { %96 = vsyncpa [#allocation27], 0 }
  0x4c   :  { %97 = vsyncpa [#allocation30], 0 }
  0x4d   :  { %98 = vsyncpa [#allocation33], 0 }
  0x4e   :  { %99 = vsyncpa [#allocation36], 0 }
  0x4f   :  { %100 = vsyncpa [#allocation39], 0 }
  0x50   :  { %101 = vsyncpa [#allocation4], 0  ;;  %s7836_s7 = smov [#allocation5]   ;;  %s7837_s10 = smov [#allocation8]  }
  0x51   :  { %s138_s0 = sshll.u32 %s7836_s7, 4  ;;  %s160_s11 = sshll.u32 %s7837_s10, 4  ;;  %s139_s0 = int_to_ptr.vmem [resolvable:$true] %s138_s0  ;;  %s161_s11 = int_to_ptr.vmem [resolvable:$true] %s160_s11 }
  0x52   :  { %s7217_s15 = scalar_lea.hbm %s7943_s24, 16 }
  0x53   :  { %p7218_p0 = scmp.ne.s32.totalorder %s7943_s24, %s7217_s15  ;;  %p7221_p1 = scmp.lt.u32.totalorder %s7217_s15, %s7943_s24 }
  0x55   :  { %p7223_p2 = pnand %p7221_p1, %p7218_p0 }
  0x57   :  { %7226 = shalt.err (!%p7223_p2)
}
  0x58   :  { %s7227_s16 = scalar_lea.vmem %s139_s0, 16  ;;  %s7231_s18 = scalar_lea.vmem %s139_s0, 32 }
  0x59   :  { %p7228_p3 = scmp.ne.s32.totalorder %s139_s0, %s7227_s16  ;;  %p7232_p4 = scmp.lt.s32.totalorder %s139_s0, %s139_s0 }
  0x5a   :  { %p7233_p5 = scmp.lt.s32.totalorder %s7231_s18, %s7227_s16 }
  0x5c   :  { %p7234_p6 = por %p7233_p5, %p7232_p4 }
  0x5e   :  { %p7235_p7 = pnand %p7234_p6, %p7228_p3 }
  0x60   :  { %7238 = shalt.err (!%p7235_p7)
}
  0x61   :  { %141 = dma.hbm_to_vmem [thread:$0]  %s7943_s24, 16, %s139_s0, [#allocation6]  }
  0x62   :  { %s7239_s22 = scalar_lea.hbm %s7958_s12, 16 }
  0x63   :  { %p7240_p8 = scmp.ne.s32.totalorder %s7958_s12, %s7239_s22  ;;  %p7243_p9 = scmp.lt.u32.totalorder %s7239_s22, %s7958_s12 }
  0x65   :  { %p7245_p10 = pnand %p7243_p9, %p7240_p8 }
  0x67   :  { %7248 = shalt.err (!%p7245_p10)
}
  0x68   :  { %s7249_s23 = scalar_lea.vmem %s161_s11, 16  ;;  %s7253_s26 = scalar_lea.vmem %s161_s11, 32 }
  0x69   :  { %p7250_p11 = scmp.ne.s32.totalorder %s161_s11, %s7249_s23  ;;  %p7254_p12 = scmp.lt.s32.totalorder %s161_s11, %s161_s11 }
  0x6a   :  { %p7255_p13 = scmp.lt.s32.totalorder %s7253_s26, %s7249_s23 }
  0x6c   :  { %p7256_p0 = por %p7255_p13, %p7254_p12 }
  0x6e   :  { %p7257_p1 = pnand %p7256_p0, %p7250_p11 }
  0x70   :  { %7260 = shalt.err (!%p7257_p1)
}
  0x71   :  { %163 = dma.hbm_to_vmem [thread:$0]  %s7958_s12, 16, %s161_s11, [#allocation9]  }
  0x72   :  { %s7838_s28 = smov [#allocation11]   ;;  %s7839_s1 = smov [#allocation14]  }
  0x73   :  { %s182_s24 = sshll.u32 %s7838_s28, 4  ;;  %s204_s2 = sshll.u32 %s7839_s1, 4  ;;  %s183_s24 = int_to_ptr.vmem [resolvable:$true] %s182_s24  ;;  %s205_s2 = int_to_ptr.vmem [resolvable:$true] %s204_s2 }
  0x74   :  { %s7261_s7 = scalar_lea.hbm %s7973_s4, 16 }
  0x75   :  { %p7262_p2 = scmp.ne.s32.totalorder %s7973_s4, %s7261_s7  ;;  %p7265_p3 = scmp.lt.u32.totalorder %s7261_s7, %s7973_s4 }
  0x77   :  { %p7267_p4 = pnand %p7265_p3, %p7262_p2 }
  0x79   :  { %7270 = shalt.err (!%p7267_p4)
}
  0x7a   :  { %s7271_s0 = scalar_lea.vmem %s183_s24, 16  ;;  %s7275_s10 = scalar_lea.vmem %s183_s24, 32 }
  0x7b   :  { %p7272_p5 = scmp.ne.s32.totalorder %s183_s24, %s7271_s0  ;;  %p7276_p6 = scmp.lt.s32.totalorder %s183_s24, %s183_s24 }
  0x7c   :  { %p7277_p7 = scmp.lt.s32.totalorder %s7275_s10, %s7271_s0 }
  0x7e   :  { %p7278_p8 = por %p7277_p7, %p7276_p6 }
  0x80   :  { %p7279_p9 = pnand %p7278_p8, %p7272_p5 }
  0x82   :  { %7282 = shalt.err (!%p7279_p9)
}
  0x83   :  { %185 = dma.hbm_to_vmem [thread:$0]  %s7973_s4, 16, %s183_s24, [#allocation12]  }
  0x84   :  { %s7283_s12 = scalar_lea.hbm %s7988_s6, 16 }
  0x85   :  { %p7284_p10 = scmp.ne.s32.totalorder %s7988_s6, %s7283_s12  ;;  %p7287_p11 = scmp.lt.u32.totalorder %s7283_s12, %s7988_s6 }
  0x87   :  { %p7289_p12 = pnand %p7287_p11, %p7284_p10 }
  0x89   :  { %7292 = shalt.err (!%p7289_p12)
}
  0x8a   :  { %s7293_s11 = scalar_lea.vmem %s205_s2, 16  ;;  %s7297_s15 = scalar_lea.vmem %s205_s2, 32 }
  0x8b   :  { %p7294_p13 = scmp.ne.s32.totalorder %s205_s2, %s7293_s11  ;;  %p7298_p0 = scmp.lt.s32.totalorder %s205_s2, %s205_s2 }
  0x8c   :  { %p7299_p1 = scmp.lt.s32.totalorder %s7297_s15, %s7293_s11 }
  0x8e   :  { %p7300_p2 = por %p7299_p1, %p7298_p0 }
  0x90   :  { %p7301_p3 = pnand %p7300_p2, %p7294_p13 }
  0x92   :  { %7304 = shalt.err (!%p7301_p3)
}
  0x93   :  { %207 = dma.hbm_to_vmem [thread:$0]  %s7988_s6, 16, %s205_s2, [#allocation15]  }
  0x94   :  { %s7840_s16 = smov [#allocation17]   ;;  %s7841_s18 = smov [#allocation20]  }
  0x95   :  { %s226_s4 = sshll.u32 %s7840_s16, 4  ;;  %s245_s22 = sshll.u32 %s7841_s18, 4  ;;  %s227_s4 = int_to_ptr.vmem [resolvable:$true] %s226_s4  ;;  %s8111_s22 = int_to_ptr.vmem [resolvable:$true] %s245_s22 }
  0x96   :  { %s7305_s23 = scalar_lea.hbm %s8003_s20, 16 }
  0x97   :  { %p7306_p4 = scmp.ne.s32.totalorder %s8003_s20, %s7305_s23  ;;  %p7309_p5 = scmp.lt.u32.totalorder %s7305_s23, %s8003_s20 }
  0x99   :  { %p7311_p6 = pnand %p7309_p5, %p7306_p4 }
  0x9b   :  { %7314 = shalt.err (!%p7311_p6)
}
  0x9c   :  { %s7315_s26 = scalar_lea.vmem %s227_s4, 16  ;;  %s7319_s28 = scalar_lea.vmem %s227_s4, 32 }
  0x9d   :  { %p7316_p7 = scmp.ne.s32.totalorder %s227_s4, %s7315_s26  ;;  %p7320_p8 = scmp.lt.s32.totalorder %s227_s4, %s227_s4 }
  0x9e   :  { %p7321_p9 = scmp.lt.s32.totalorder %s7319_s28, %s7315_s26 }
  0xa0   :  { %p7322_p10 = por %p7321_p9, %p7320_p8 }
  0xa2   :  { %p7323_p11 = pnand %p7322_p10, %p7316_p7 }
  0xa4   :  { %7326 = shalt.err (!%p7323_p11)
}
  0xa5   :  { %229 = dma.hbm_to_vmem [thread:$0]  %s8003_s20, 16, %s227_s4, [#allocation18]  }
  0xa6   :  { %s7327_s6 = scalar_lea.hbm %s8013_s17, 512 }
  0xa7   :  { %p7328_p12 = scmp.ne.s32.totalorder %s8013_s17, %s7327_s6  ;;  %p7331_p13 = scmp.lt.u32.totalorder %s7327_s6, %s8013_s17 }
  0xa9   :  { %p7333_p0 = pnand %p7331_p13, %p7328_p12 }
  0xab   :  { %7336 = shalt.err (!%p7333_p0)
}
  0xac   :  { %s7337_s24 = scalar_lea.vmem %s8111_s22, 512  ;;  %p7342_p2 = scmp.lt.s32.totalorder %s8111_s22, %s8111_s22 }
  0xad   :  { %p7338_p1 = scmp.ne.s32.totalorder %s8111_s22, %s7337_s24  ;;  %p7343_p3 = scmp.lt.s32.totalorder %s7337_s24, %s7337_s24 }
  0xaf   :  { %p7344_p4 = por %p7343_p3, %p7342_p2 }
  0xb1   :  { %p7345_p5 = pnand %p7344_p4, %p7338_p1 }
  0xb3   :  { %7348 = shalt.err (!%p7345_p5)
}
  0xb4   :  { %s7842_s1 = smov 128   ;;  %s7843_s20 = smov 8  }
  0xb5   :  { %251 = dma.hbm_to_vmem [thread:$0]  %s8013_s17, 512, %s8111_s22, [#allocation21], %s7842_s1, %s7842_s1, %s7843_s20  }
  0xb6   :  { %s7844_s2 = smov [#allocation23]   ;;  %s7845_s0 = smov [#allocation26]  }
  0xb7   :  { %s267_s7 = sshll.u32 %s7844_s2, 4  ;;  %s289_s10 = sshll.u32 %s7845_s0, 4  ;;  %s268_s7 = int_to_ptr.vmem [resolvable:$true] %s267_s7  ;;  %s8129_s10 = int_to_ptr.vmem [resolvable:$true] %s289_s10 }
  0xb8   :  { %s7349_s12 = scalar_lea.hbm %s8023_s29, 512 }
  0xb9   :  { %p7350_p6 = scmp.ne.s32.totalorder %s8023_s29, %s7349_s12  ;;  %p7353_p7 = scmp.lt.u32.totalorder %s7349_s12, %s8023_s29 }
  0xbb   :  { %p7355_p8 = pnand %p7353_p7, %p7350_p6 }
  0xbd   :  { %7358 = shalt.err (!%p7355_p8)
}
  0xbe   :  { %s7359_s11 = scalar_lea.vmem %s268_s7, 512  ;;  %p7364_p10 = scmp.lt.s32.totalorder %s268_s7, %s268_s7 }
  0xbf   :  { %p7360_p9 = scmp.ne.s32.totalorder %s268_s7, %s7359_s11  ;;  %p7365_p11 = scmp.lt.s32.totalorder %s7359_s11, %s7359_s11 }
  0xc1   :  { %p7366_p12 = por %p7365_p11, %p7364_p10 }
  0xc3   :  { %p7367_p13 = pnand %p7366_p12, %p7360_p9 }
  0xc5   :  { %7370 = shalt.err (!%p7367_p13)
}
  0xc6   :  { %273 = dma.hbm_to_vmem [thread:$0]  %s8023_s29, 512, %s268_s7, [#allocation24], %s7842_s1, %s7842_s1, %s7843_s20  }
  0xc7   :  { %s7371_s17 = scalar_lea.hbm %s8033_s21, 512 }
  0xc8   :  { %p7372_p0 = scmp.ne.s32.totalorder %s8033_s21, %s7371_s17  ;;  %p7375_p1 = scmp.lt.u32.totalorder %s7371_s17, %s8033_s21 }
  0xca   :  { %p7377_p2 = pnand %p7375_p1, %p7372_p0 }
  0xcc   :  { %7380 = shalt.err (!%p7377_p2)
}
  0xcd   :  { %s7381_s15 = scalar_lea.vmem %s8129_s10, 512  ;;  %p7386_p4 = scmp.lt.s32.totalorder %s8129_s10, %s8129_s10 }
  0xce   :  { %p7382_p3 = scmp.ne.s32.totalorder %s8129_s10, %s7381_s15  ;;  %p7387_p5 = scmp.lt.s32.totalorder %s7381_s15, %s7381_s15 }
  0xd0   :  { %p7388_p6 = por %p7387_p5, %p7386_p4 }
  0xd2   :  { %p7389_p7 = pnand %p7388_p6, %p7382_p3 }
  0xd4   :  { %7392 = shalt.err (!%p7389_p7)
}
  0xd5   :  { %295 = dma.hbm_to_vmem [thread:$0]  %s8033_s21, 512, %s8129_s10, [#allocation27], %s7842_s1, %s7842_s1, %s7843_s20  }
  0xd6   :  { %s7846_s29 = smov [#allocation29]   ;;  %s7847_s4 = smov [#allocation32]  }
  0xd7   :  { %s312_s16 = sshll.u32 %s7846_s29, 4  ;;  %s331_s18 = sshll.u32 %s7847_s4, 4  ;;  %s313_s16 = int_to_ptr.vmem [resolvable:$true] %s312_s16  ;;  %s8150_s18 = int_to_ptr.vmem [resolvable:$true] %s331_s18 }
  0xd8   :  { %s7393_s22 = scalar_lea.hbm %s8043_s13, 16 }
  0xd9   :  { %p7394_p8 = scmp.ne.s32.totalorder %s8043_s13, %s7393_s22  ;;  %p7397_p9 = scmp.lt.u32.totalorder %s7393_s22, %s8043_s13 }
  0xdb   :  { %p7399_p10 = pnand %p7397_p9, %p7394_p8 }
  0xdd   :  { %7402 = shalt.err (!%p7399_p10)
}
  0xde   :  { %s7403_s23 = scalar_lea.vmem %s313_s16, 16  ;;  %s7407_s26 = scalar_lea.vmem %s313_s16, 32 }
  0xdf   :  { %p7404_p11 = scmp.ne.s32.totalorder %s313_s16, %s7403_s23  ;;  %p7408_p12 = scmp.lt.s32.totalorder %s313_s16, %s313_s16 }
  0xe0   :  { %p7409_p13 = scmp.lt.s32.totalorder %s7407_s26, %s7403_s23 }
  0xe2   :  { %p7410_p0 = por %p7409_p13, %p7408_p12 }
  0xe4   :  { %p7411_p1 = pnand %p7410_p0, %p7404_p11 }
  0xe6   :  { %7414 = shalt.err (!%p7411_p1)
}
  0xe7   :  { %315 = dma.hbm_to_vmem [thread:$0]  %s8043_s13, 16, %s313_s16, [#allocation30]  }
  0xe8   :  { %s7415_s21 = scalar_lea.hbm %s8053_s8, 512 }
  0xe9   :  { %p7416_p2 = scmp.ne.s32.totalorder %s8053_s8, %s7415_s21  ;;  %p7419_p3 = scmp.lt.u32.totalorder %s7415_s21, %s8053_s8 }
  0xeb   :  { %p7421_p4 = pnand %p7419_p3, %p7416_p2 }
  0xed   :  { %7424 = shalt.err (!%p7421_p4)
}
  0xee   :  { %s7425_s28 = scalar_lea.vmem %s8150_s18, 512  ;;  %p7430_p6 = scmp.lt.s32.totalorder %s8150_s18, %s8150_s18 }
  0xef   :  { %p7426_p5 = scmp.ne.s32.totalorder %s8150_s18, %s7425_s28  ;;  %p7431_p7 = scmp.lt.s32.totalorder %s7425_s28, %s7425_s28 }
  0xf1   :  { %p7432_p8 = por %p7431_p7, %p7430_p6 }
  0xf3   :  { %p7433_p9 = pnand %p7432_p8, %p7426_p5 }
  0xf5   :  { %7436 = shalt.err (!%p7433_p9)
}
  0xf6   :  { %337 = dma.hbm_to_vmem [thread:$0]  %s8053_s8, 512, %s8150_s18, [#allocation33], %s7842_s1, %s7842_s1, %s7843_s20  }
  0xf7   :  { %s7848_s13 = smov [#allocation35]   ;;  %s7849_s24 = smov [#allocation2]  }
  0xf8   :  { %s356_s6 = sshll.u32 %s7848_s13, 4  ;;  %s128_s2 = sshll.u32 %s7849_s24, 4  ;;  %s357_s6 = int_to_ptr.vmem [resolvable:$true] %s356_s6  ;;  %s129_s2 = int_to_ptr.vmem [resolvable:$true] %s128_s2 }
  0xf9   :  { %s7437_s7 = scalar_lea.hbm %s8068_s3, 16 }
  0xfa   :  { %p7438_p10 = scmp.ne.s32.totalorder %s8068_s3, %s7437_s7  ;;  %p7441_p11 = scmp.lt.u32.totalorder %s7437_s7, %s8068_s3 }
  0xfc   :  { %p7443_p12 = pnand %p7441_p11, %p7438_p10 }
  0xfe   :  { %7446 = shalt.err (!%p7443_p12)
}
  0xff   :  { %s7447_s0 = scalar_lea.vmem %s357_s6, 16  ;;  %s7451_s10 = scalar_lea.vmem %s357_s6, 32 }
 0x100   :  { %p7448_p13 = scmp.ne.s32.totalorder %s357_s6, %s7447_s0  ;;  %p7452_p0 = scmp.lt.s32.totalorder %s357_s6, %s357_s6 }
 0x101   :  { %p7453_p1 = scmp.lt.s32.totalorder %s7451_s10, %s7447_s0 }
 0x103   :  { %p7454_p2 = por %p7453_p1, %p7452_p0 }
 0x105   :  { %p7455_p3 = pnand %p7454_p2, %p7448_p13 }
 0x107   :  { %7458 = shalt.err (!%p7455_p3)
}
 0x108   :  { %359 = dma.hbm_to_vmem [thread:$0]  %s8068_s3, 16, %s357_s6, [#allocation36]  }
 0x109   :  { %s7459_s8 = scalar_lea.hbm %s7938_s19, 16 }
 0x10a   :  { %p7460_p4 = scmp.ne.s32.totalorder %s7938_s19, %s7459_s8  ;;  %p7463_p5 = scmp.lt.u32.totalorder %s7459_s8, %s7938_s19 }
 0x10c   :  { %p7465_p6 = pnand %p7463_p5, %p7460_p4 }
 0x10e   :  { %7468 = shalt.err (!%p7465_p6)
}
 0x10f   :  { %s7469_s12 = scalar_lea.vmem %s129_s2, 16  ;;  %s7473_s11 = scalar_lea.vmem %s129_s2, 32 }
 0x110   :  { %p7470_p7 = scmp.ne.s32.totalorder %s129_s2, %s7469_s12  ;;  %p7474_p8 = scmp.lt.s32.totalorder %s129_s2, %s129_s2 }
 0x111   :  { %p7475_p9 = scmp.lt.s32.totalorder %s7473_s11, %s7469_s12 }
 0x113   :  { %p7476_p10 = por %p7475_p9, %p7474_p8 }
 0x115   :  { %p7477_p11 = pnand %p7476_p10, %p7470_p7 }
 0x117   :  { %7480 = shalt.err (!%p7477_p11)
}
 0x118   :  { %131 = dma.hbm_to_vmem [thread:$0]  %s7938_s19, 16, %s129_s2, [#allocation3]  }
 0x119   :  { %s7850_s17 = smov [#allocation7]   ;;  %s7851_s15 = smov [#allocation10]  }
 0x11a   :  { %s148_s3 = sshll.u32 %s7850_s17, 4  ;;  %s172_s29 = sshll.u32 %s7851_s15, 4  ;;  %s149_s3 = int_to_ptr.vmem [resolvable:$true] %s148_s3  ;;  %s173_s29 = int_to_ptr.vmem [resolvable:$true] %s172_s29 }
 0x11b   :  { %s7481_s16 = scalar_lea.hbm %s7948_s30, 16 }
 0x11c   :  { %p7482_p12 = scmp.ne.s32.totalorder %s7948_s30, %s7481_s16  ;;  %p7485_p13 = scmp.lt.u32.totalorder %s7481_s16, %s7948_s30 }
 0x11e   :  { %p7487_p0 = pnand %p7485_p13, %p7482_p12 }
 0x120   :  { %7490 = shalt.err (!%p7487_p0)
}
 0x121   :  { %s7491_s4 = scalar_lea.vmem %s149_s3, 16  ;;  %s7495_s18 = scalar_lea.vmem %s149_s3, 32 }
 0x122   :  { %p7492_p1 = scmp.ne.s32.totalorder %s149_s3, %s7491_s4  ;;  %p7496_p2 = scmp.lt.s32.totalorder %s149_s3, %s149_s3 }
 0x123   :  { %p7497_p3 = scmp.lt.s32.totalorder %s7495_s18, %s7491_s4 }
 0x125   :  { %p7498_p4 = por %p7497_p3, %p7496_p2 }
 0x127   :  { %p7499_p5 = pnand %p7498_p4, %p7492_p1 }
 0x129   :  { %7502 = shalt.err (!%p7499_p5)
}
 0x12a   :  { %151 = dma.hbm_to_vmem [thread:$0]  %s7948_s30, 16, %s149_s3, [#allocation6]  }
 0x12b   :  { %s7503_s19 = scalar_lea.hbm %s7968_s27, 16 }
 0x12c   :  { %p7504_p6 = scmp.ne.s32.totalorder %s7968_s27, %s7503_s19  ;;  %p7507_p7 = scmp.lt.u32.totalorder %s7503_s19, %s7968_s27 }
 0x12e   :  { %p7509_p8 = pnand %p7507_p7, %p7504_p6 }
 0x130   :  { %7512 = shalt.err (!%p7509_p8)
}
 0x131   :  { %s7513_s22 = scalar_lea.vmem %s173_s29, 16  ;;  %s7517_s23 = scalar_lea.vmem %s173_s29, 32 }
 0x132   :  { %p7514_p9 = scmp.ne.s32.totalorder %s173_s29, %s7513_s22  ;;  %p7518_p10 = scmp.lt.s32.totalorder %s173_s29, %s173_s29 }
 0x133   :  { %p7519_p11 = scmp.lt.s32.totalorder %s7517_s23, %s7513_s22 }
 0x135   :  { %p7520_p12 = por %p7519_p11, %p7518_p10 }
 0x137   :  { %p7521_p13 = pnand %p7520_p12, %p7514_p9 }
 0x139   :  { %7524 = shalt.err (!%p7521_p13)
}
 0x13a   :  { %s8976_s26 = sld [smem:[#allocation67_spill]]  ;;  %s7852_s21 = smov [#allocation13]  }
 0x13b   :  { %175 = dma.hbm_to_vmem [thread:$0]  %s7968_s27, 16, %s173_s29, [#allocation9]  }
 0x13c   :  { %s192_s30 = sshll.u32 %s7852_s21, 4  ;;  %s7853_s28 = smov [#allocation16]   ;;  %s193_s30 = int_to_ptr.vmem [resolvable:$true] %s192_s30 }
 0x13d   :  { %s216_s13 = sshll.u32 %s7853_s28, 4  ;;  %s217_s13 = int_to_ptr.vmem [resolvable:$true] %s216_s13 }
 0x140   :  { %s7525_s6 = scalar_lea.hbm %s8976_s26, 16 }
 0x141   :  { %p7526_p0 = scmp.ne.s32.totalorder %s8976_s26, %s7525_s6  ;;  %p7529_p1 = scmp.lt.u32.totalorder %s7525_s6, %s8976_s26 }
 0x143   :  { %p7531_p2 = pnand %p7529_p1, %p7526_p0 }
 0x145   :  { %7534 = shalt.err (!%p7531_p2)
}
 0x146   :  { %s7535_s24 = scalar_lea.vmem %s193_s30, 16  ;;  %s7539_s2 = scalar_lea.vmem %s193_s30, 32 }
 0x147   :  { %p7536_p3 = scmp.ne.s32.totalorder %s193_s30, %s7535_s24  ;;  %p7540_p4 = scmp.lt.s32.totalorder %s193_s30, %s193_s30 }
 0x148   :  { %p7541_p5 = scmp.lt.s32.totalorder %s7539_s2, %s7535_s24 }
 0x14a   :  { %p7542_p6 = por %p7541_p5, %p7540_p4 }
 0x14c   :  { %p7543_p7 = pnand %p7542_p6, %p7536_p3 }
 0x14e   :  { %7546 = shalt.err (!%p7543_p7)
}
 0x14f   :  { %s8977_s27 = sld [smem:[#allocation70_spill]] }
 0x150   :  { %195 = dma.hbm_to_vmem [thread:$0]  %s8976_s26, 16, %s193_s30, [#allocation12]  }
 0x155   :  { %s7547_s7 = scalar_lea.hbm %s8977_s27, 16 }
 0x156   :  { %p7548_p8 = scmp.ne.s32.totalorder %s8977_s27, %s7547_s7  ;;  %p7551_p9 = scmp.lt.u32.totalorder %s7547_s7, %s8977_s27 }
 0x158   :  { %p7553_p10 = pnand %p7551_p9, %p7548_p8 }
 0x15a   :  { %7556 = shalt.err (!%p7553_p10)
}
 0x15b   :  { %s7557_s0 = scalar_lea.vmem %s217_s13, 16  ;;  %s7561_s10 = scalar_lea.vmem %s217_s13, 32 }
 0x15c   :  { %p7558_p11 = scmp.ne.s32.totalorder %s217_s13, %s7557_s0  ;;  %p7562_p12 = scmp.lt.s32.totalorder %s217_s13, %s217_s13 }
 0x15d   :  { %p7563_p13 = scmp.lt.s32.totalorder %s7561_s10, %s7557_s0 }
 0x15f   :  { %p7564_p0 = por %p7563_p13, %p7562_p12 }
 0x161   :  { %p7565_p1 = pnand %p7564_p0, %p7558_p11 }
 0x163   :  { %7568 = shalt.err (!%p7565_p1)
}
 0x164   :  { %s8978_s8 = sld [smem:[#allocation71_spill]]  ;;  %s7854_s12 = smov [#allocation19]  }
 0x165   :  { %219 = dma.hbm_to_vmem [thread:$0]  %s8977_s27, 16, %s217_s13, [#allocation15]  }
 0x166   :  { %s236_s11 = sshll.u32 %s7854_s12, 4  ;;  %s7855_s17 = smov [#allocation22]   ;;  %s237_s11 = int_to_ptr.vmem [resolvable:$true] %s236_s11 }
 0x167   :  { %s258_s3 = sshll.u32 %s7855_s17, 4  ;;  %s259_s3 = int_to_ptr.vmem [resolvable:$true] %s258_s3 }
 0x16a   :  { %s7569_s15 = scalar_lea.hbm %s8978_s8, 16 }
 0x16b   :  { %p7570_p2 = scmp.ne.s32.totalorder %s8978_s8, %s7569_s15  ;;  %p7573_p3 = scmp.lt.u32.totalorder %s7569_s15, %s8978_s8 }
 0x16d   :  { %p7575_p4 = pnand %p7573_p3, %p7570_p2 }
 0x16f   :  { %7578 = shalt.err (!%p7575_p4)
}
 0x170   :  { %s7579_s29 = scalar_lea.vmem %s237_s11, 16  ;;  %s7583_s16 = scalar_lea.vmem %s237_s11, 32 }
 0x171   :  { %p7580_p5 = scmp.ne.s32.totalorder %s237_s11, %s7579_s29  ;;  %p7584_p6 = scmp.lt.s32.totalorder %s237_s11, %s237_s11 }
 0x172   :  { %p7585_p7 = scmp.lt.s32.totalorder %s7583_s16, %s7579_s29 }
 0x174   :  { %p7586_p8 = por %p7585_p7, %p7584_p6 }
 0x176   :  { %p7587_p9 = pnand %p7586_p8, %p7580_p5 }
 0x178   :  { %7590 = shalt.err (!%p7587_p9)
}
 0x179   :  { %s8979_s4 = sld [smem:[#allocation72_spill]] }
 0x17a   :  { %239 = dma.hbm_to_vmem [thread:$0]  %s8978_s8, 16, %s237_s11, [#allocation18]  }
 0x17f   :  { %s7591_s18 = scalar_lea.hbm %s8979_s4, 16 }
 0x180   :  { %p7592_p10 = scmp.ne.s32.totalorder %s8979_s4, %s7591_s18  ;;  %p7595_p11 = scmp.lt.u32.totalorder %s7591_s18, %s8979_s4 }
 0x182   :  { %p7597_p12 = pnand %p7595_p11, %p7592_p10 }
 0x184   :  { %7600 = shalt.err (!%p7597_p12)
}
 0x185   :  { %s7601_s19 = scalar_lea.vmem %s259_s3, 16  ;;  %s7605_s22 = scalar_lea.vmem %s259_s3, 32 }
 0x186   :  { %p7602_p13 = scmp.ne.s32.totalorder %s259_s3, %s7601_s19  ;;  %p7606_p0 = scmp.lt.s32.totalorder %s259_s3, %s259_s3 }
 0x187   :  { %p7607_p1 = scmp.lt.s32.totalorder %s7605_s22, %s7601_s19 }
 0x189   :  { %p7608_p2 = por %p7607_p1, %p7606_p0 }
 0x18b   :  { %p7609_p3 = pnand %p7608_p2, %p7602_p13 }
 0x18d   :  { %7612 = shalt.err (!%p7609_p3)
}
 0x18e   :  { %s8980_s23 = sld [smem:[#allocation73_spill]]  ;;  %s7856_s26 = smov [#allocation25]  }
 0x18f   :  { %261 = dma.hbm_to_vmem [thread:$0]  %s8979_s4, 16, %s259_s3, [#allocation21]  }
 0x190   :  { %s280_s21 = sshll.u32 %s7856_s26, 4  ;;  %s7857_s30 = smov [#allocation28]   ;;  %s281_s21 = int_to_ptr.vmem [resolvable:$true] %s280_s21 }
 0x191   :  { %s302_s28 = sshll.u32 %s7857_s30, 4  ;;  %s303_s28 = int_to_ptr.vmem [resolvable:$true] %s302_s28 }
 0x194   :  { %s7613_s13 = scalar_lea.hbm %s8980_s23, 16 }
 0x195   :  { %p7614_p4 = scmp.ne.s32.totalorder %s8980_s23, %s7613_s13  ;;  %p7617_p5 = scmp.lt.u32.totalorder %s7613_s13, %s8980_s23 }
 0x197   :  { %p7619_p6 = pnand %p7617_p5, %p7614_p4 }
 0x199   :  { %7622 = shalt.err (!%p7619_p6)
}
 0x19a   :  { %s7623_s6 = scalar_lea.vmem %s281_s21, 16  ;;  %s7627_s24 = scalar_lea.vmem %s281_s21, 32 }
 0x19b   :  { %p7624_p7 = scmp.ne.s32.totalorder %s281_s21, %s7623_s6  ;;  %p7628_p8 = scmp.lt.s32.totalorder %s281_s21, %s281_s21 }
 0x19c   :  { %p7629_p9 = scmp.lt.s32.totalorder %s7627_s24, %s7623_s6 }
 0x19e   :  { %p7630_p10 = por %p7629_p9, %p7628_p8 }
 0x1a0   :  { %p7631_p11 = pnand %p7630_p10, %p7624_p7 }
 0x1a2   :  { %7634 = shalt.err (!%p7631_p11)
}
 0x1a3   :  { %s8981_s2 = sld [smem:[#allocation74_spill]] }
 0x1a4   :  { %283 = dma.hbm_to_vmem [thread:$0]  %s8980_s23, 16, %s281_s21, [#allocation24]  }
 0x1a9   :  { %s7635_s27 = scalar_lea.hbm %s8981_s2, 16 }
 0x1aa   :  { %p7636_p12 = scmp.ne.s32.totalorder %s8981_s2, %s7635_s27  ;;  %p7639_p13 = scmp.lt.u32.totalorder %s7635_s27, %s8981_s2 }
 0x1ac   :  { %p7641_p0 = pnand %p7639_p13, %p7636_p12 }
 0x1ae   :  { %7644 = shalt.err (!%p7641_p0)
}
 0x1af   :  { %s7645_s7 = scalar_lea.vmem %s303_s28, 16  ;;  %s7649_s0 = scalar_lea.vmem %s303_s28, 32 }
 0x1b0   :  { %p7646_p1 = scmp.ne.s32.totalorder %s303_s28, %s7645_s7  ;;  %p7650_p2 = scmp.lt.s32.totalorder %s303_s28, %s303_s28 }
 0x1b1   :  { %p7651_p3 = scmp.lt.s32.totalorder %s7649_s0, %s7645_s7 }
 0x1b3   :  { %p7652_p4 = por %p7651_p3, %p7650_p2 }
 0x1b5   :  { %p7653_p5 = pnand %p7652_p4, %p7646_p1 }
 0x1b7   :  { %7656 = shalt.err (!%p7653_p5)
}
 0x1b8   :  { %s8982_s10 = sld [smem:[#allocation75_spill]]  ;;  %s7858_s8 = smov [#allocation31]  }
 0x1b9   :  { %305 = dma.hbm_to_vmem [thread:$0]  %s8981_s2, 16, %s303_s28, [#allocation27]  }
 0x1ba   :  { %s322_s12 = sshll.u32 %s7858_s8, 4  ;;  %s7859_s11 = smov [#allocation34]   ;;  %s323_s12 = int_to_ptr.vmem [resolvable:$true] %s322_s12 }
 0x1bb   :  { %s344_s17 = sshll.u32 %s7859_s11, 4  ;;  %s345_s17 = int_to_ptr.vmem [resolvable:$true] %s344_s17 }
 0x1be   :  { %s7657_s3 = scalar_lea.hbm %s8982_s10, 16 }
 0x1bf   :  { %p7658_p6 = scmp.ne.s32.totalorder %s8982_s10, %s7657_s3  ;;  %p7661_p7 = scmp.lt.u32.totalorder %s7657_s3, %s8982_s10 }
 0x1c1   :  { %p7663_p8 = pnand %p7661_p7, %p7658_p6 }
 0x1c3   :  { %7666 = shalt.err (!%p7663_p8)
}
 0x1c4   :  { %s7667_s15 = scalar_lea.vmem %s323_s12, 16  ;;  %s7671_s29 = scalar_lea.vmem %s323_s12, 32 }
 0x1c5   :  { %p7668_p9 = scmp.ne.s32.totalorder %s323_s12, %s7667_s15  ;;  %p7672_p10 = scmp.lt.s32.totalorder %s323_s12, %s323_s12 }
 0x1c6   :  { %p7673_p11 = scmp.lt.s32.totalorder %s7671_s29, %s7667_s15 }
 0x1c8   :  { %p7674_p12 = por %p7673_p11, %p7672_p10 }
 0x1ca   :  { %p7675_p13 = pnand %p7674_p12, %p7668_p9 }
 0x1cc   :  { %7678 = shalt.err (!%p7675_p13)
}
 0x1cd   :  { %s8983_s16 = sld [smem:[#allocation76_spill]] }
 0x1ce   :  { %325 = dma.hbm_to_vmem [thread:$0]  %s8982_s10, 16, %s323_s12, [#allocation30]  }
 0x1d3   :  { %s7679_s4 = scalar_lea.hbm %s8983_s16, 16 }
 0x1d4   :  { %p7680_p0 = scmp.ne.s32.totalorder %s8983_s16, %s7679_s4  ;;  %p7683_p1 = scmp.lt.u32.totalorder %s7679_s4, %s8983_s16 }
 0x1d6   :  { %p7685_p2 = pnand %p7683_p1, %p7680_p0 }
 0x1d8   :  { %7688 = shalt.err (!%p7685_p2)
}
 0x1d9   :  { %s7689_s18 = scalar_lea.vmem %s345_s17, 16  ;;  %s7693_s19 = scalar_lea.vmem %s345_s17, 32 }
 0x1da   :  { %p7690_p3 = scmp.ne.s32.totalorder %s345_s17, %s7689_s18  ;;  %p7694_p4 = scmp.lt.s32.totalorder %s345_s17, %s345_s17 }
 0x1db   :  { %p7695_p5 = scmp.lt.s32.totalorder %s7693_s19, %s7689_s18 }
 0x1dd   :  { %p7696_p6 = por %p7695_p5, %p7694_p4 }
 0x1df   :  { %p7697_p7 = pnand %p7696_p6, %p7690_p3 }
 0x1e1   :  { %7700 = shalt.err (!%p7697_p7)
}
 0x1e2   :  { %s8984_s22 = sld [smem:[#allocation78_spill]]  ;;  %s7860_s23 = smov [#allocation37]  }
 0x1e3   :  { %347 = dma.hbm_to_vmem [thread:$0]  %s8983_s16, 16, %s345_s17, [#allocation33]  }
 0x1e4   :  { %s366_s26 = sshll.u32 %s7860_s23, 4  ;;  %s7861_s21 = smov [#allocation38]   ;;  %s367_s26 = int_to_ptr.vmem [resolvable:$true] %s366_s26 }
 0x1e5   :  { %s376_s30 = sshll.u32 %s7861_s21, 4  ;;  %s377_s30 = int_to_ptr.vmem [resolvable:$true] %s376_s30 }
 0x1e8   :  { %s7701_s28 = scalar_lea.hbm %s8984_s22, 16 }
 0x1e9   :  { %p7702_p8 = scmp.ne.s32.totalorder %s8984_s22, %s7701_s28  ;;  %p7705_p9 = scmp.lt.u32.totalorder %s7701_s28, %s8984_s22 }
 0x1eb   :  { %p7707_p10 = pnand %p7705_p9, %p7702_p8 }
 0x1ed   :  { %7710 = shalt.err (!%p7707_p10)
}
 0x1ee   :  { %s7711_s13 = scalar_lea.vmem %s367_s26, 16  ;;  %s7715_s6 = scalar_lea.vmem %s367_s26, 32 }
 0x1ef   :  { %p7712_p11 = scmp.ne.s32.totalorder %s367_s26, %s7711_s13  ;;  %p7716_p12 = scmp.lt.s32.totalorder %s367_s26, %s367_s26 }
 0x1f0   :  { %p7717_p13 = scmp.lt.s32.totalorder %s7715_s6, %s7711_s13 }
 0x1f2   :  { %p7718_p0 = por %p7717_p13, %p7716_p12 }
 0x1f4   :  { %p7719_p1 = pnand %p7718_p0, %p7712_p11 }
 0x1f6   :  { %7722 = shalt.err (!%p7719_p1)
}
 0x1f7   :  { %369 = dma.hbm_to_vmem [thread:$0]  %s8984_s22, 16, %s367_s26, [#allocation36]  }
 0x1f8   :  { %s7723_s24 = scalar_lea.hbm %s8078_s9, 16 }
 0x1f9   :  { %p7724_p2 = scmp.ne.s32.totalorder %s8078_s9, %s7723_s24  ;;  %p7727_p3 = scmp.lt.u32.totalorder %s7723_s24, %s8078_s9 }
 0x1fb   :  { %p7729_p4 = pnand %p7727_p3, %p7724_p2 }
 0x1fd   :  { %7732 = shalt.err (!%p7729_p4)
}
 0x1fe   :  { %s7733_s2 = scalar_lea.vmem %s377_s30, 16  ;;  %s7737_s27 = scalar_lea.vmem %s377_s30, 32 }
 0x1ff   :  { %p7734_p5 = scmp.ne.s32.totalorder %s377_s30, %s7733_s2  ;;  %p7738_p6 = scmp.lt.s32.totalorder %s377_s30, %s377_s30 }
 0x200   :  { %p7739_p7 = scmp.lt.s32.totalorder %s7737_s27, %s7733_s2 }
 0x202   :  { %p7740_p8 = por %p7739_p7, %p7738_p6 }
 0x204   :  { %p7741_p9 = pnand %p7740_p8, %p7734_p5 }
 0x206   :  { %7744 = shalt.err (!%p7741_p9)
}
 0x207   :  { %379 = dma.hbm_to_vmem [thread:$0]  %s8078_s9, 16, %s377_s30, [#allocation39]  }
 0x208   :  { %7767 = dma.done.wait [#allocation3], 16  }
 0x209   :  { %7768 = vsyncadd [#allocation3], 4294967280 }
 0x20a   :  { %7769 = dma.done.wait [#allocation6], 32  }
 0x20b   :  { %7770 = vsyncadd [#allocation6], 4294967264 }
 0x20c   :  { %7771 = dma.done.wait [#allocation9], 32  }
 0x20d   :  { %7772 = vsyncadd [#allocation9], 4294967264 }
 0x20e   :  { %7773 = dma.done.wait [#allocation12], 32  }
 0x20f   :  { %7774 = vsyncadd [#allocation12], 4294967264 }
 0x210   :  { %7775 = dma.done.wait [#allocation15], 32  }
 0x211   :  { %7776 = vsyncadd [#allocation15], 4294967264 }
 0x212   :  { %7777 = dma.done.wait [#allocation18], 32  }
 0x213   :  { %7778 = vsyncadd [#allocation18], 4294967264 }
 0x214   :  { %7779 = dma.done.wait [#allocation21], 528  }
 0x215   :  { %7780 = vsyncadd [#allocation21], 4294966768 }
 0x216   :  { %7781 = dma.done.wait [#allocation24], 528  }
 0x217   :  { %7782 = vsyncadd [#allocation24], 4294966768 }
 0x218   :  { %7783 = dma.done.wait [#allocation27], 528  }
 0x219   :  { %7784 = vsyncadd [#allocation27], 4294966768 }
 0x21a   :  { %7785 = dma.done.wait [#allocation30], 32  }
 0x21b   :  { %7786 = vsyncadd [#allocation30], 4294967264 }
 0x21c   :  { %7787 = dma.done.wait [#allocation33], 528  }
 0x21d   :  { %7788 = vsyncadd [#allocation33], 4294966768 }
 0x21e   :  { %7789 = dma.done.wait [#allocation36], 32  }
 0x21f   :  { %7790 = vsyncadd [#allocation36], 4294967264 }
 0x220   :  { %7791 = dma.done.wait [#allocation39], 16  }
 0x221   :  { %7792 = vsyncadd [#allocation39], 4294967280  ;;  %s8985_s9 = sld [smem:[#allocation57_spill]]  ;;  %s8986_s7 = sld [smem:[#allocation56_spill]]  ;;  %v7862_v0 = vmov 0   ;;  %v458_v1 = vlaneseq  ;;  %v7863_v20 = vmov 0.0  }
 0x222   :  { %s8987_s0 = sld [smem:[#allocation59_spill]]  ;;  %7099 = vset.pattern.permute.xlu0 %v7862_v0  ;;  %7100 = vset.pattern.permute.xlu1 %v7862_v0  ;;  %s8988_s10 = sld [smem:[#allocation62_spill]]  ;;  %vm482_vm1 = vcmask 261120   ;;  %vm7864_vm4 = vmmov 0   ;;  %vm669_vm5 = vcmask 64512   ;;  %vm1339_vm7 = vcmask 130048  }
 0x223   :  { %v8224_v2 = vshrl.u32 %v458_v1, 7  ;;  %v8246_v21 = vand.u32 127, %v458_v1  ;;  %s8989_s8 = sld [smem:[#allocation61_spill]]  ;;  %s8990_s12 = sld [smem:[#allocation63_spill]]  ;;  %v7874_v57 = vmov -1e+09  }
 0x224   :  { %s7865_s11 = smov 120   ;;  %s7866_s17 = smov 96   ;;  %vm1341_vm8 = vcmask 195584   ;;  %vm2269_vm11 = vcmask 523264  }
 0x225   :  { %v664_v5 = vsub.s32 0, %v8224_v2  ;;  %v1345_v6 = vsub.s32 1, %v8224_v2  ;;  %s7867_s3 = smov 112   ;;  %s7868_s15 = smov 88   ;;  %vm462_vm13 = vcmp.le.s32.totalorder %v8246_v21, %v8224_v2 }
 0x226   :  { %s7869_s29 = smov 104   ;;  %s7870_s16 = smov 80  }
 0x227   :  { %v457_v3 = vld [vmem:[%s8985_s9] sm:$0x3]  ;;  %v465_v10 = vld [vmem:[%s8986_s7 + $0x8] sm:$0xff]  ;;  %s7871_s4 = smov 72   ;;  %s7872_s18 = smov 64  }
 0x228   :  { %v464_v4 = vld [vmem:[%s8986_s7] sm:$0xff]  ;;  %vm2592_vm0 = vcmp.ne.s32.totalorder %v457_v3, 0  ;;  %v479_v8 = vld [vmem:[%s8987_s0 + $0x8] sm:$0xff]  ;;  %v480_v12 = vld [vmem:[%s8987_s0 + $0x10] sm:$0xff]  ;;  %s7873_s19 = smov 56   ;;  %s8991_s22 = sld [smem:[#allocation55_spill]] }
 0x229   :  { %467 = vperm.xlu0 %7099, %v464_v4   ;;  %v478_v7 = vld [vmem:[%s8987_s0] sm:$0xff]  ;;  %v2593_v9 = vsel %vm2592_vm0, 1, %v7862_v0  ;;  %v481_v13 = vld [vmem:[%s8987_s0 + $0x18] sm:$0xff]  ;;  %v569_v18 = vld [vmem:[%s8988_s10 + $0x8] sm:$0xff]  ;;  %s7875_s23 = smov 40   ;;  %s7876_s26 = smov 48  }
 0x22a   :  { %v6886_v11 = vpack.c.bf16 %v479_v8, %v478_v7  ;;  %v8237_v14 = vrot.slane %v2593_v9, %v664_v5  ;;  %v8241_v15 = vrot.slane %v2593_v9, %v1345_v6  ;;  %v6890_v16 = vpack.c.bf16 %v481_v13, %v480_v12  ;;  %v568_v17 = vld [vmem:[%s8988_s10] sm:$0xff]  ;;  %v570_v26 = vld [vmem:[%s8988_s10 + $0x10] sm:$0xff]  ;;  %v571_v27 = vld [vmem:[%s8988_s10 + $0x18] sm:$0xff]  ;;  %s8992_s21 = sld [smem:[#allocation64_spill]]  ;;  %s7877_s30 = smov 16  }
 0x22b   :  { %v6894_v19 = vpack.c.bf16 %v569_v18, %v568_v17  ;;  %v6898_v28 = vpack.c.bf16 %v571_v27, %v570_v26  ;;  %v8258_v30 = vld [vmem:[%s8989_s8] sm:$0xff]  ;;  %s7878_s28 = smov 24   ;;  %s8993_s13 = sld [smem:[#allocation58_spill]] }
 0x22c   :  { %6887 = vmatprep.subr.bf16.mxu0 %v6886_v11  ;;  %v6166_v36 = vld [vmem:[%s8990_s12] ss:$0 sm:$0xff]  ;;  %s8994_s6 = sld [smem:[#allocation65_spill]]  ;;  %s8995_s24 = sld [smem:[#allocation60_spill]]  ;;  %vm2598_vm12 = vcmp.eq.s32.totalorder %v8237_v14, 1  ;;  %vm3279_vm15 = vcmp.eq.s32.totalorder %v8241_v15, 1 }
 0x22d   :  { %470 = vperm.xlu0 %7099, %v465_v10   ;;  %6889 = vmatpush3.bf16.msra.mxu0 %v6886_v11  ;;  %s8996_s2 = sld [smem:[#allocation66_spill]]  ;;  %s8997_s27 = sld [smem:[#allocation68_spill]]  ;;  %vm2599_vm14 = vmand %vm462_vm13, %vm2598_vm12 }
 0x22e   :  { %6891 = vmatprep.subr.bf16.mxu0 %v6890_v16  ;;  %6895 = vmatprep.subr.bf16.mxu1 %v6894_v19  ;;  %v456_v56 = vld [vmem:[%s8991_s22] sm:$0x3]  ;;  %vm3280_vm0 = vmand %vm462_vm13, %vm3279_vm15  ;;  %s8998_s9 = sld [smem:[#allocation69_spill]] }
 0x22f   :  { %6897 = vmatpush3.bf16.msra.mxu1 %v6894_v19  ;;  %vm660_vm6 = vcmp.ne.s32.totalorder %v456_v56, 0  ;;  %s8999_s7 = sld [smem:[#allocation77_spill]] }
 0x230   :  { %6899 = vmatprep.subr.bf16.mxu1 %v6898_v28  ;;  %v661_v58 = vsel %vm660_vm6, 0.0, %v7874_v57 }
 0x231   :  { %6893 = vmatpush3.bf16.msra.mxu0 %v6890_v16  ;;  %v8355_v59 = vrot.slane %v661_v58, %v664_v5  ;;  %v8365_v11 = vrot.slane %v661_v58, %v1345_v6 }
 0x232   :  { %6508 = vmatprep.subr.mxu0 %v7863_v20 }
 0x233   :  { %6901 = vmatpush3.bf16.msra.mxu1 %v6898_v28 }
 0x234   :  { %6498 = vmatprep.subr.mxu1 %v7863_v20 }
 0x2a8   :  { %v468_v22 = vpop.permute.xlu0 %467 }
 0x2a9   :  { %vm472_vm2 = vcmp.eq.s32.totalorder %v8246_v21, %v468_v22 }
 0x2aa   :  { %v6162_v23 = vsel %vm472_vm2, 1.0, %v7863_v20 }
 0x2ab   :  { %6484 = vmatprep.mubr.msk.f32.mxu0 %vm482_vm1, %v6162_v23 }
 0x2ac   :  { %v471_v24 = vpop.permute.xlu0 %470 }
 0x2ad   :  { %vm473_vm3 = vcmp.eq.s32.totalorder %v8246_v21, %v471_v24 }
 0x2ae   :  { %v6163_v25 = vsel %vm473_vm3, 1.0, %v7863_v20 }
 0x2af   :  { %6485 = vmatmul.mubr.msk.f32.vlgmr.msra.gmra.mrb[0].mxu0 %vm482_vm1, %v6163_v25 }
 0x2b0   :  { %6510 = vmatprep.mubr.msk.f32.mxu0 %vm7864_vm4, %v7863_v20 }
 0x382   :  { %v6486_v29 = vpop.f32.mrb[0].mxu0 }
 0x383   :  { %v565_v31 = vmul.f32 5.656854, %v6486_v29  ;;  %v555_v32 = vpop.f32.mrb[1].mxu0 }
 0x384   :  { %v564_v33 = vmul.f32 5.656854, %v555_v32 }
 0x385   :  { %v8264_v35 = vadd.f32 %v565_v31, %v8258_v30 }
 0x386   :  { %v8261_v34 = vadd.f32 %v564_v33, %v8258_v30 }
 0x388   :  { %6495 = vmatprep.mubr.msk.f32.mxu1 %vm482_vm1, %v8261_v34 }
 0x389   :  { %6496 = vmatmul.mubr.msk.f32.vlgmr.msra.gmra.mrb[0].mxu1 %vm482_vm1, %v8264_v35 }
 0x38a   :  { %6500 = vmatprep.mubr.msk.f32.mxu1 %vm7864_vm4, %v7863_v20 }
 0x45c   :  { %v6497_v37 = vpop.f32.mrb[0].mxu1 }
 0x45d   :  { %v651_v38 = vpop.f32.mrb[1].mxu1  ;;  %v8289_v40 = vadd.f32 %v6497_v37, %v6166_v36 }
 0x45e   :  { %v8275_v39 = vadd.f32 %v6166_v36, %v651_v38 }
 0x460   :  { %831 = vrot.lane.b32.xlu0 %v8275_v39, %s7865_s11  ;;  %667 = vrot.lane.b32.xlu1 %v8275_v39, %s7866_s17 }
 0x464   :  { %996 = vrot.lane.b32.xlu0 %v8275_v39, %s7867_s3  ;;  %833 = vrot.lane.b32.xlu1 %v8275_v39, %s7868_s15 }
 0x468   :  { %1161 = vrot.lane.b32.xlu0 %v8275_v39, %s7869_s29  ;;  %998 = vrot.lane.b32.xlu1 %v8275_v39, %s7870_s16 }
 0x46c   :  { %1513 = vrot.lane.b32.xlu0 %v8289_v40, %s7868_s15  ;;  %1163 = vrot.lane.b32.xlu1 %v8275_v39, %s7871_s4 }
 0x470   :  { %1678 = vrot.lane.b32.xlu0 %v8289_v40, %s7870_s16  ;;  %1348 = vrot.lane.b32.xlu1 %v8289_v40, %s7866_s17 }
 0x474   :  { %1843 = vrot.lane.b32.xlu0 %v8289_v40, %s7871_s4  ;;  %1511 = vrot.lane.b32.xlu1 %v8289_v40, %s7865_s11 }
 0x478   :  { %755 = vrot.lane.b32.xlu0 %v8275_v39, %s7872_s18  ;;  %1676 = vrot.lane.b32.xlu1 %v8289_v40, %s7867_s3 }
 0x47c   :  { %1841 = vrot.lane.b32.xlu1 %v8289_v40, %s7869_s29 }
 0x480   :  { %920 = vrot.lane.b32.xlu1 %v8275_v39, %s7873_s19 }
 0x4d2   :  { %v832_v41 = vpop.permute.xlu0 %831  ;;  %v668_v42 = vpop.permute.xlu1 %667 }
 0x4d3   :  { %6499 = vmatpush3.xpose.msk.msra.mxu1 %vm669_vm5, %v668_v42 }
 0x4d4   :  { %6503 = vmatprep.subr.mxu1 %v7863_v20 }
 0x4d6   :  { %v997_v43 = vpop.permute.xlu0 %996  ;;  %6501 = vmatmul.mubr.msk.f32.vlgmr.msra.gmra.mrb[2].mxu1 %vm669_vm5, %v8275_v39  ;;  %v834_v44 = vpop.permute.xlu1 %833 }
 0x4d7   :  { %6509 = vmatpush3.xpose.msk.msra.mxu0 %vm669_vm5, %v834_v44  ;;  %6505 = vmatprep.mubr.msk.f32.mxu1 %vm7864_vm4, %v7863_v20 }
 0x4d8   :  { %6518 = vmatprep.subr.mxu0 %v7863_v20 }
 0x4da   :  { %v1162_v45 = vpop.permute.xlu0 %1161  ;;  %6511 = vmatmul.mubr.msk.f32.vlgmr.msra.gmra.mrb[2].mxu0 %vm669_vm5, %v832_v41  ;;  %v999_v46 = vpop.permute.xlu1 %998 }
 0x4db   :  { %6519 = vmatpush3.xpose.msk.msra.mxu0 %vm669_vm5, %v999_v46  ;;  %6520 = vmatprep.mubr.msk.f32.mxu0 %vm7864_vm4, %v7863_v20 }
 0x4dc   :  { %6528 = vmatprep.subr.mxu0 %v7863_v20 }
 0x4de   :  { %v1514_v47 = vpop.permute.xlu0 %1513  ;;  %6521 = vmatmul.mubr.msk.f32.vlgmr.msra.gmra.mrb[4].mxu0 %vm669_vm5, %v997_v43  ;;  %v1164_v48 = vpop.permute.xlu1 %1163 }
 0x4df   :  { %6529 = vmatpush3.xpose.msk.msra.mxu0 %vm669_vm5, %v1164_v48  ;;  %6530 = vmatprep.mubr.msk.f32.mxu0 %vm7864_vm4, %v7863_v20 }
 0x4e0   :  { %6538 = vmatprep.subr.mxu0 %v7863_v20 }
 0x4e2   :  { %v1679_v49 = vpop.permute.xlu0 %1678  ;;  %6531 = vmatmul.mubr.msk.f32.vlgmr.msra.gmra.mrb[6].mxu0 %vm669_vm5, %v1162_v45  ;;  %v1349_v50 = vpop.permute.xlu1 %1348 }
 0x4e3   :  { %6539 = vmatpush3.xpose.msk.msra.mxu0 %vm669_vm5, %v1349_v50  ;;  %6540 = vmatprep.mubr.msk.f32.mxu0 %vm7864_vm4, %v7863_v20 }
 0x4e4   :  { %6548 = vmatprep.subr.mxu0 %v7863_v20 }
 0x4e6   :  { %v1844_v51 = vpop.permute.xlu0 %1843  ;;  %6541 = vmatmul.mubr.msk.f32.vlgmr.msra.gmra.mrb[8].mxu0 %vm669_vm5, %v8289_v40  ;;  %v1512_v52 = vpop.permute.xlu1 %1511 }
 0x4e7   :  { %6549 = vmatpush3.xpose.msk.msra.mxu0 %vm669_vm5, %v1514_v47  ;;  %6550 = vmatprep.mubr.msk.f32.mxu0 %vm7864_vm4, %v7863_v20 }
 0x4e8   :  { %6558 = vmatprep.subr.mxu0 %v7863_v20 }
 0x4ea   :  { %v756_v53 = vpop.permute.xlu0 %755  ;;  %6551 = vmatmul.mubr.msk.f32.vlgmr.msra.gmra.mrb[10].mxu0 %vm669_vm5, %v1512_v52  ;;  %v1677_v54 = vpop.permute.xlu1 %1676 }
 0x4eb   :  { %6504 = vmatpush3.msra.mxu1 %v756_v53  ;;  %6559 = vmatpush3.xpose.msk.msra.mxu0 %vm669_vm5, %v1679_v49 }
 0x4ec   :  { %6560 = vmatprep.mubr.msk.f32.mxu0 %vm7864_vm4, %v7863_v20  ;;  %6568 = vmatprep.subr.mxu0 %v7863_v20 }
 0x4ed   :  { %6513 = vmatprep.subr.mxu1 %v7863_v20 }
 0x4ee   :  { %6561 = vmatmul.mubr.msk.f32.vlgmr.msra.gmra.mrb[12].mxu0 %vm669_vm5, %v1677_v54  ;;  %v1842_v55 = vpop.permute.xlu1 %1841 }
 0x4ef   :  { %6569 = vmatpush3.xpose.msk.msra.mxu0 %vm669_vm5, %v1844_v51  ;;  %6570 = vmatprep.mubr.msk.f32.mxu0 %vm7864_vm4, %v7863_v20 }
 0x4f2   :  { %6571 = vmatmul.mubr.msk.f32.vlgmr.msra.gmra.mrb[14].mxu0 %vm669_vm5, %v1842_v55  ;;  %v8381_v37 = vpop.permute.xlu1 %920 }
 0x5a9   :  { %v740_v60 = vpop.f32.mrb[2].mxu1 }
 0x5aa   :  { %v741_v61 = vadd.f32 %v740_v60, %v8355_v59  ;;  %v6502_v62 = vpop.f32.mrb[3].mxu1 }
 0x5ac   :  { %v744_v63 = vsel %vm669_vm5, %v741_v61, -inf }
 0x5ad   :  { %v905_v0 = vpop.f32.mrb[2].mxu0  ;;  %745 = vmax.xlane.f32.xlu0 %v744_v63 }
 0x5ae   :  { %v906_v1 = vadd.f32 %v905_v0, %v8355_v59  ;;  %v6512_v3 = vpop.f32.mrb[3].mxu0 }
 0x5b0   :  { %v909_v4 = vsel %vm669_vm5, %v906_v1, -inf }
 0x5b1   :  { %v1070_v7 = vpop.f32.mrb[4].mxu0  ;;  %910 = vmax.xlane.f32.xlu1 %v909_v4 }
 0x5b2   :  { %v1071_v8 = vadd.f32 %v1070_v7, %v8355_v59  ;;  %v6522_v9 = vpop.f32.mrb[5].mxu0 }
 0x5b4   :  { %v1074_v5 = vsel %vm669_vm5, %v1071_v8, -inf }
 0x5b5   :  { %v1235_v10 = vpop.f32.mrb[6].mxu0  ;;  %1075 = vmax.xlane.f32.xlu0 %v1074_v5 }
 0x5b6   :  { %v1236_v12 = vadd.f32 %v1235_v10, %v8355_v59  ;;  %v6532_v13 = vpop.f32.mrb[7].mxu0 }
 0x5b8   :  { %v1239_v16 = vsel %vm669_vm5, %v1236_v12, -inf }
 0x5b9   :  { %v1420_v17 = vpop.f32.mrb[8].mxu0  ;;  %1240 = vmax.xlane.f32.xlu0 %v1239_v16 }
 0x5ba   :  { %v1421_v18 = vadd.f32 %v1420_v17, %v8365_v11  ;;  %v6542_v19 = vpop.f32.mrb[9].mxu0 }
 0x5bc   :  { %v1424_v22 = vsel %vm669_vm5, %v1421_v18, -inf }
 0x5bd   :  { %v1585_v23 = vpop.f32.mrb[10].mxu0  ;;  %1425 = vmax.xlane.f32.xlu1 %v1424_v22 }
 0x5be   :  { %v1586_v24 = vadd.f32 %v1585_v23, %v8365_v11  ;;  %v6552_v25 = vpop.f32.mrb[11].mxu0 }
 0x5c0   :  { %v1589_v6 = vsel %vm669_vm5, %v1586_v24, -inf }
 0x5c1   :  { %v1750_v26 = vpop.f32.mrb[12].mxu0  ;;  %1590 = vmax.xlane.f32.xlu0 %v1589_v6 }
 0x5c2   :  { %v1751_v27 = vadd.f32 %v1750_v26, %v8365_v11  ;;  %v6562_v28 = vpop.f32.mrb[13].mxu0 }
 0x5c4   :  { %v1754_v29 = vsel %vm669_vm5, %v1751_v27, -inf }
 0x5c5   :  { %v1915_v31 = vpop.f32.mrb[14].mxu0  ;;  %1755 = vmax.xlane.f32.xlu1 %v1754_v29 }
 0x5c6   :  { %v1916_v32 = vadd.f32 %v1915_v31, %v8365_v11  ;;  %v6572_v33 = vpop.f32.mrb[15].mxu0 }
 0x5c8   :  { %v1919_v36 = vsel %vm669_vm5, %v1916_v32, -inf }
 0x5c9   :  { %1920 = vmax.xlane.f32.xlu0 %v1919_v36 }
 0x5d6   :  { %1250 = vrot.lane.b32.xlu1 %v8275_v39, %s7875_s23 }
 0x5df   :  { %1085 = vrot.lane.b32.xlu0 %v8275_v39, %s7876_s26 }
 0x63a   :  { %v746_v38 = vpop.xlane.xlu0 %745 }
 0x63b   :  { %v747_v41 = vsub.f32 %v741_v61, %v746_v38 }
 0x63d   :  { %v748_v42 = vmul.f32 1.442695, %v747_v41 }
 0x63e   :  { %v911_v43 = vpop.xlane.xlu1 %910 }
 0x63f   :  { %7101 = vpow2.f32 %v748_v42  ;;  %v912_v44 = vsub.f32 %v906_v1, %v911_v43 }
 0x641   :  { %v913_v45 = vmul.f32 1.442695, %v912_v44 }
 0x642   :  { %v1076_v46 = vpop.xlane.xlu0 %1075 }
 0x643   :  { %7103 = vpow2.f32 %v913_v45  ;;  %v1077_v47 = vsub.f32 %v1071_v8, %v1076_v46 }
 0x645   :  { %v1078_v48 = vmul.f32 1.442695, %v1077_v47 }
 0x646   :  { %v1241_v49 = vpop.xlane.xlu0 %1240 }
 0x647   :  { %7105 = vpow2.f32 %v1078_v48  ;;  %v1242_v50 = vsub.f32 %v1236_v12, %v1241_v49 }
 0x649   :  { %v7102_v51 = vpop.eup %7101  ;;  %v1243_v52 = vmul.f32 1.442695, %v1242_v50 }
 0x64a   :  { %v750_v39 = vsel %vm669_vm5, %v7102_v51, 0.0  ;;  %v1426_v61 = vpop.xlane.xlu1 %1425 }
 0x64b   :  { %7107 = vpow2.f32 %v1243_v52  ;;  %751 = vadd.xlane.f32.xlu1 %v750_v39  ;;  %v1427_v62 = vsub.f32 %v1421_v18, %v1426_v61 }
 0x64d   :  { %v7104_v53 = vpop.eup %7103  ;;  %v1428_v3 = vmul.f32 1.442695, %v1427_v62 }
 0x64e   :  { %v915_v54 = vsel %vm669_vm5, %v7104_v53, 0.0  ;;  %v1591_v63 = vpop.xlane.xlu0 %1590 }
 0x64f   :  { %916 = vadd.xlane.f32.xlu0 %v915_v54  ;;  %v1592_v1 = vsub.f32 %v1586_v24, %v1591_v63  ;;  %7109 = vpow2.f32 %v1428_v3  ;;  %v2021_v3 = vld [vmem:[%s8992_s21] sm:$0xff] }
 0x651   :  { %v7106_v55 = vpop.eup %7105  ;;  %v1593_v8 = vmul.f32 1.442695, %v1592_v1 }
 0x652   :  { %v1080_v56 = vsel %vm669_vm5, %v7106_v55, 0.0  ;;  %v1756_v0 = vpop.xlane.xlu1 %1755 }
 0x653   :  { %1081 = vadd.xlane.f32.xlu1 %v1080_v56  ;;  %v1757_v4 = vsub.f32 %v1751_v27, %v1756_v0  ;;  %7111 = vpow2.f32 %v1593_v8  ;;  %v2023_v8 = vld [vmem:[%s8992_s21 + $0x10] sm:$0xff] }
 0x655   :  { %v8386_v58 = vpop.eup %7107  ;;  %v1758_v9 = vmul.f32 1.442695, %v1757_v4  ;;  %v2022_v4 = vld [vmem:[%s8992_s21 + $0x8] sm:$0xff] }
 0x656   :  { %v1245_v60 = vsel %vm669_vm5, %v8386_v58, 0.0  ;;  %v1921_v7 = vpop.xlane.xlu0 %1920  ;;  %v1251_v24 = vpop.permute.xlu1 %1250 }
 0x657   :  { %1246 = vadd.xlane.f32.xlu0 %v1245_v60  ;;  %v1922_v5 = vsub.f32 %v1916_v32, %v1921_v7  ;;  %7113 = vpow2.f32 %v1758_v9  ;;  %v6902_v7 = vpack.c.bf16 %v2022_v4, %v2021_v3  ;;  %v2024_v9 = vld [vmem:[%s8992_s21 + $0x18] sm:$0xff]  ;;  %v2254_v4 = vld [vmem:[%s8996_s2] sm:$0xff] }
 0x659   :  { %v1923_v10 = vmul.f32 1.442695, %v1922_v5  ;;  %v7110_v12 = vpop.eup %7109  ;;  %6903 = vmatprep.subr.bf16.mxu0 %v6902_v7  ;;  %v6906_v5 = vpack.c.bf16 %v2024_v9, %v2023_v8  ;;  %v2256_v8 = vld [vmem:[%s8996_s2 + $0x10] sm:$0xff] }
 0x65a   :  { %v1430_v16 = vsel %vm669_vm5, %v7110_v12, 0.0  ;;  %v1086_v25 = vpop.permute.xlu0 %1085  ;;  %6905 = vmatpush3.bf16.msra.mxu0 %v6902_v7  ;;  %v2255_v7 = vld [vmem:[%s8996_s2 + $0x8] sm:$0xff] }
 0x65b   :  { %7115 = vpow2.f32 %v1923_v10  ;;  %6907 = vmatprep.subr.bf16.mxu0 %v6906_v5  ;;  %v6918_v9 = vpack.c.bf16 %v2255_v7, %v2254_v4  ;;  %v6210_v7 = vld [vmem:[#allocation14] ss:$0 sm:$0xff] }
 0x65d   :  { %v8394_v13 = vpop.eup %7111 }
 0x65e   :  { %v1595_v19 = vsel %vm669_vm5, %v8394_v13, 0.0  ;;  %6909 = vmatpush3.bf16.msra.mxu0 %v6906_v5  ;;  %v2257_v5 = vld [vmem:[%s8996_s2 + $0x18] sm:$0xff] }
 0x65f   :  { %6919 = vmatprep.subr.bf16.mxu0 %v6918_v9 }
 0x661   :  { %v8397_v17 = vpop.eup %7113 }
 0x662   :  { %v1760_v18 = vsel %vm669_vm5, %v8397_v17, 0.0 }
 0x664   :  { %1600 = vrot.lane.b32.xlu1 %v8289_v40, %s7873_s19 }
 0x665   :  { %v8403_v22 = vpop.eup %7115 }
 0x666   :  { %v1925_v23 = vsel %vm669_vm5, %v8403_v22, 0.0 }
 0x66d   :  { %1435 = vrot.lane.b32.xlu0 %v8289_v40, %s7872_s18 }
 0x688   :  { %1431 = vadd.xlane.f32.xlu1 %v1430_v16 }
 0x68c   :  { %1761 = vadd.xlane.f32.xlu1 %v1760_v18  ;;  %1596 = vadd.xlane.f32.xlu0 %v1595_v19 }
 0x690   :  { %1926 = vadd.xlane.f32.xlu1 %v1925_v23 }
 0x6a1   :  { %1930 = vrot.lane.b32.xlu1 %v8289_v40, %s7875_s23 }
 0x6a2   :  { %1765 = vrot.lane.b32.xlu0 %v8289_v40, %s7876_s26 }
 0x6d8   :  { %v752_v6 = vpop.xlane.xlu1 %751 }
 0x6d9   :  { %7117 = vrcp.f32 %v752_v6 }
 0x6dc   :  { %v917_v26 = vpop.xlane.xlu0 %916 }
 0x6dd   :  { %7119 = vrcp.f32 %v917_v26 }
 0x6e0   :  { %v1082_v27 = vpop.xlane.xlu1 %1081 }
 0x6e1   :  { %7121 = vrcp.f32 %v1082_v27 }
 0x6e3   :  { %v7118_v28 = vpop.eup %7117 }
 0x6e4   :  { %v1247_v29 = vpop.xlane.xlu0 %1246  ;;  %v754_v31 = vmul.f32 %v7118_v28, %v7102_v51  ;;  %v1601_v42 = vpop.permute.xlu1 %1600 }
 0x6e5   :  { %7123 = vrcp.f32 %v1247_v29 }
 0x6e6   :  { %6506 = vmatmul.mubr.msk.f32.vlgmr.msra.gmra.mrb[4].mxu1 %vm669_vm5, %v754_v31 }
 0x6e7   :  { %v7120_v32 = vpop.eup %7119  ;;  %6514 = vmatpush3.msra.mxu1 %v8381_v37  ;;  %6515 = vmatprep.mubr.msk.f32.mxu1 %vm7864_vm4, %v7863_v20 }
 0x6e8   :  { %6523 = vmatprep.subr.mxu1 %v7863_v20  ;;  %v919_v40 = vmul.f32 %v7120_v32, %v7104_v53  ;;  %v1436_v41 = vpop.permute.xlu0 %1435 }
 0x6ea   :  { %6516 = vmatmul.mubr.msk.f32.vlgmr.msra.gmra.mrb[6].mxu1 %vm669_vm5, %v919_v40 }
 0x6eb   :  { %v7122_v33 = vpop.eup %7121  ;;  %6524 = vmatpush3.msra.mxu1 %v1086_v25  ;;  %6525 = vmatprep.mubr.msk.f32.mxu1 %vm7864_vm4, %v7863_v20 }
 0x6ec   :  { %6533 = vmatprep.subr.mxu1 %v7863_v20  ;;  %v1084_v36 = vmul.f32 %v7122_v33, %v7106_v55 }
 0x6ee   :  { %6526 = vmatmul.mubr.msk.f32.vlgmr.msra.gmra.mrb[8].mxu1 %vm669_vm5, %v1084_v36  ;;  %v6193_v36 = vld [vmem:[#allocation2] ss:$0 sm:$0xff] }
 0x6ef   :  { %v7124_v38 = vpop.eup %7123  ;;  %6534 = vmatpush3.msra.mxu1 %v1251_v24  ;;  %6535 = vmatprep.mubr.msk.f32.mxu1 %vm7864_vm4, %v7863_v20 }
 0x6f0   :  { %6543 = vmatprep.subr.mxu1 %v7863_v20  ;;  %v1249_v37 = vmul.f32 %v7124_v38, %v8386_v58 }
 0x6f2   :  { %6536 = vmatmul.mubr.msk.f32.vlgmr.msra.gmra.mrb[10].mxu1 %vm669_vm5, %v1249_v37 }
 0x6f3   :  { %6544 = vmatpush3.msra.mxu1 %v1436_v41  ;;  %6545 = vmatprep.mubr.msk.f32.mxu1 %vm7864_vm4, %v7863_v20 }
 0x6f4   :  { %6553 = vmatprep.subr.mxu1 %v7863_v20 }
 0x715   :  { %v1432_v43 = vpop.xlane.xlu1 %1431 }
 0x716   :  { %7125 = vrcp.f32 %v1432_v43 }
 0x719   :  { %v1762_v44 = vpop.xlane.xlu1 %1761  ;;  %v1597_v45 = vpop.xlane.xlu0 %1596 }
 0x71a   :  { %7127 = vrcp.f32 %v1597_v45 }
 0x71b   :  { %7129 = vrcp.f32 %v1762_v44 }
 0x71d   :  { %v1927_v46 = vpop.xlane.xlu1 %1926  ;;  %v1766_v52 = vpop.permute.xlu0 %1765 }
 0x71e   :  { %7131 = vrcp.f32 %v1927_v46 }
 0x720   :  { %v7126_v47 = vpop.eup %7125 }
 0x721   :  { %v1434_v48 = vmul.f32 %v7126_v47, %v7110_v12  ;;  %v1931_v54 = vpop.permute.xlu1 %1930  ;;  %v2397_v47 = vld [vmem:[%s8993_s13] sm:$0xff] }
 0x723   :  { %6546 = vmatmul.mubr.msk.f32.vlgmr.msra.gmra.mrb[12].mxu1 %vm669_vm5, %v1434_v48 }
 0x724   :  { %6554 = vmatpush3.msra.mxu1 %v1601_v42  ;;  %6555 = vmatprep.mubr.msk.f32.mxu1 %vm7864_vm4, %v7863_v20  ;;  %v7128_v49 = vpop.eup %7127 }
 0x725   :  { %6563 = vmatprep.subr.mxu1 %v7863_v20  ;;  %v1599_v50 = vmul.f32 %v7128_v49, %v8394_v13  ;;  %v7130_v51 = vpop.eup %7129 }
 0x726   :  { %v1764_v39 = vmul.f32 %v7130_v51, %v8397_v17 }
 0x727   :  { %6556 = vmatmul.mubr.msk.f32.vlgmr.msra.gmra.mrb[14].mxu1 %vm669_vm5, %v1599_v50 }
 0x728   :  { %6564 = vmatpush3.msra.mxu1 %v1766_v52  ;;  %6565 = vmatprep.mubr.msk.f32.mxu1 %vm7864_vm4, %v7863_v20  ;;  %v7132_v53 = vpop.eup %7131 }
 0x729   :  { %6573 = vmatprep.subr.mxu1 %v7863_v20  ;;  %v1929_v55 = vmul.f32 %v7132_v53, %v8403_v22 }
 0x72b   :  { %6566 = vmatmul.mubr.msk.f32.vlgmr.msra.gmra.mrb[16].mxu1 %vm669_vm5, %v1764_v39 }
 0x72c   :  { %6574 = vmatpush3.msra.mxu1 %v1931_v54  ;;  %6575 = vmatprep.mubr.msk.f32.mxu1 %vm7864_vm4, %v7863_v20 }
 0x72f   :  { %6576 = vmatmul.mubr.msk.f32.vlgmr.msra.gmra.mrb[18].mxu1 %vm669_vm5, %v1929_v55  ;;  %v2398_v55 = vld [vmem:[%s8993_s13 + $0x8] sm:$0xff] }
 0x7b9   :  { %v827_v56 = vpop.f32.mrb[4].mxu1 }
 0x7ba   :  { %v6507_v58 = vpop.f32.mrb[5].mxu1 }
 0x7bb   :  { %v2161_v58 = vld [vmem:[%s8994_s6 + $0x8] sm:$0xff] }
 0x7bd   :  { %v992_v60 = vpop.f32.mrb[6].mxu1 }
 0x7be   :  { %1327 = vrot.lane.b32.xlu0 %v992_v60, %s7843_s20  ;;  %v6517_v61 = vpop.f32.mrb[7].mxu1  ;;  %v2162_v60 = vld [vmem:[%s8994_s6 + $0x10] sm:$0xff] }
 0x7c1   :  { %v1157_v62 = vpop.f32.mrb[8].mxu1 }
 0x7c2   :  { %1331 = vrot.lane.b32.xlu1 %v1157_v62, %s7877_s30  ;;  %v6527_v63 = vpop.f32.mrb[9].mxu1  ;;  %v2163_v62 = vld [vmem:[%s8994_s6 + $0x18] sm:$0xff] }
 0x7c3   :  { %v6914_v63 = vpack.c.bf16 %v2163_v62, %v2162_v60 }
 0x7c5   :  { %v1322_v0 = vpop.f32.mrb[10].mxu1 }
 0x7c6   :  { %1335 = vrot.lane.b32.xlu1 %v1322_v0, %s7878_s28  ;;  %v6537_v1 = vpop.f32.mrb[11].mxu1  ;;  %v2411_v0 = vld [vmem:[%s8995_s24] sm:$0xff] }
 0x7c7   :  { %v2412_v1 = vld [vmem:[%s8995_s24 + $0x8] sm:$0xff] }
 0x7c8   :  { %v6934_v3 = vpack.c.bf16 %v2412_v1, %v2411_v0 }
 0x7f6   :  { %v1507_v10 = vpop.f32.mrb[12].mxu1 }
 0x7f7   :  { %v6547_v12 = vpop.f32.mrb[13].mxu1 }
 0x7f8   :  { %v2258_v12 = vld [vmem:[%s8996_s2 + $0x20] sm:$0xff] }
 0x7fa   :  { %v1672_v13 = vpop.f32.mrb[14].mxu1 }
 0x7fb   :  { %2007 = vrot.lane.b32.xlu0 %v1672_v13, %s7843_s20  ;;  %v6557_v16 = vpop.f32.mrb[15].mxu1  ;;  %v2259_v13 = vld [vmem:[%s8996_s2 + $0x28] sm:$0xff] }
 0x7fc   :  { %v6926_v16 = vpack.c.bf16 %v2259_v13, %v2258_v12 }
 0x7fe   :  { %v1837_v17 = vpop.f32.mrb[16].mxu1 }
 0x7ff   :  { %2011 = vrot.lane.b32.xlu0 %v1837_v17, %s7877_s30  ;;  %v6567_v18 = vpop.f32.mrb[17].mxu1 }
 0x802   :  { %v2002_v19 = vpop.f32.mrb[18].mxu1 }
 0x803   :  { %2015 = vrot.lane.b32.xlu1 %v2002_v19, %s7878_s28  ;;  %v6577_v22 = vpop.f32.mrb[19].mxu1 }
 0x830   :  { %v1328_v23 = vpop.permute.xlu0 %1327 }
 0x831   :  { %v1338_v25 = vsel %vm669_vm5, %v827_v56, %v1328_v23  ;;  %v2160_v56 = vld [vmem:[%s8994_s6] sm:$0xff] }
 0x832   :  { %v6910_v61 = vpack.c.bf16 %v2161_v58, %v2160_v56 }
 0x834   :  { %v1332_v24 = vpop.permute.xlu1 %1331  ;;  %6911 = vmatprep.subr.bf16.mxu1 %v6910_v61 }
 0x835   :  { %v1340_v6 = vsel %vm1339_vm7, %v1338_v25, %v1332_v24  ;;  %6913 = vmatpush3.bf16.msra.mxu1 %v6910_v61 }
 0x836   :  { %6915 = vmatprep.subr.bf16.mxu1 %v6914_v63 }
 0x838   :  { %v1336_v26 = vpop.permute.xlu1 %1335 }
 0x839   :  { %v1342_v27 = vsel %vm1341_vm8, %v1340_v6, %v1336_v26  ;;  %6917 = vmatpush3.bf16.msra.mxu1 %v6914_v63  ;;  %v6196_v6 = vld [vmem:[#allocation5] ss:$0 sm:$0xff] }
 0x83a   :  { %6586 = vmatprep.mubr.msk.f32.mxu0 %vm482_vm1, %v1342_v27  ;;  %6935 = vmatprep.subr.bf16.mxu1 %v6934_v3  ;;  %v6197_v27 = vld [vmem:[#allocation7] ss:$0 sm:$0xff] }
 0x86d   :  { %v2008_v28 = vpop.permute.xlu0 %2007 }
 0x86e   :  { %v2018_v31 = vsel %vm669_vm5, %v1507_v10, %v2008_v28  ;;  %v6922_v10 = vpack.c.bf16 %v2257_v5, %v2256_v8 }
 0x871   :  { %v2012_v29 = vpop.permute.xlu0 %2011 }
 0x872   :  { %v2019_v32 = vsel %vm1339_vm7, %v2018_v31, %v2012_v29 }
 0x875   :  { %v2016_v40 = vpop.permute.xlu1 %2015 }
 0x876   :  { %v2020_v33 = vsel %vm1341_vm8, %v2019_v32, %v2016_v40 }
 0x877   :  { %6587 = vmatmul.mubr.msk.f32.vlgmr.msra.gmra.mrb[16].mxu0 %vm482_vm1, %v2020_v33  ;;  %v2413_v33 = vld [vmem:[%s8995_s24 + $0x10] sm:$0xff] }
 0x878   :  { %6921 = vmatpush3.bf16.msra.mxu0 %v6918_v9 }
 0x879   :  { %6923 = vmatprep.subr.bf16.mxu0 %v6922_v10 }
 0x87c   :  { %6925 = vmatpush3.bf16.msra.mxu0 %v6922_v10 }
 0x87d   :  { %6927 = vmatprep.subr.bf16.mxu0 %v6926_v16 }
 0x880   :  { %6929 = vmatpush3.bf16.msra.mxu0 %v6926_v16 }
 0x94a   :  { %v6588_v38 = vpop.f32.mrb[16].mxu0 }
 0x94b   :  { %v2110_v37 = vadd.f32 %v6588_v38, %v6193_v36  ;;  %v2104_v41 = vpop.f32.mrb[17].mxu0 }
 0x94c   :  { %v2105_v42 = vadd.f32 %v6193_v36, %v2104_v41  ;;  %v2414_v36 = vld [vmem:[%s8995_s24 + $0x18] sm:$0xff] }
 0x94d   :  { %v2114_v43 = vadd.f32 %v2110_v37, %v8264_v35 }
 0x94e   :  { %v2113_v44 = vadd.f32 %v2105_v42, %v8261_v34  ;;  %v6938_v42 = vpack.c.bf16 %v2414_v36, %v2413_v33 }
 0x94f   :  { %v2118_v45 = vsel %vm482_vm1, %v2114_v43, 0.0 }
 0x950   :  { %2119 = vadd.xlane.f32.xlu1 %v2118_v45  ;;  %v2115_v46 = vsel %vm482_vm1, %v2113_v44, 0.0  ;;  %v2260_v45 = vld [vmem:[%s8996_s2 + $0x30] sm:$0xff] }
 0x951   :  { %2116 = vadd.xlane.f32.xlu0 %v2115_v46  ;;  %v2261_v46 = vld [vmem:[%s8996_s2 + $0x38] sm:$0xff] }
 0x961   :  { %2400 = vperm.xlu1 %7100, %v2397_v47   ;;  %v6930_v47 = vpack.c.bf16 %v2261_v46, %v2260_v45 }
 0x963   :  { %6931 = vmatprep.subr.bf16.mxu0 %v6930_v47 }
 0x964   :  { %6933 = vmatpush3.bf16.msra.mxu0 %v6930_v47 }
 0x965   :  { %6641 = vmatprep.subr.mxu0 %v7863_v20 }
 0x9dd   :  { %v2120_v48 = vpop.xlane.xlu1 %2119 }
 0x9de   :  { %v2123_v49 = vmul.f32 0.03125, %v2120_v48  ;;  %v2117_v50 = vpop.xlane.xlu0 %2116  ;;  %v2500_v48 = vld [vmem:[%s8997_s27] sm:$0xff] }
 0x9df   :  { %v2122_v51 = vmul.f32 0.03125, %v2117_v50 }
 0x9e0   :  { %v2125_v35 = vsub.f32 %v2114_v43, %v2123_v49  ;;  %v2501_v49 = vld [vmem:[%s8997_s27 + $0x8] sm:$0xff] }
 0x9e1   :  { %v2124_v52 = vsub.f32 %v2113_v44, %v2122_v51  ;;  %v2401_v29 = vpop.permute.xlu1 %2400  ;;  %v6942_v50 = vpack.c.bf16 %v2501_v49, %v2500_v48  ;;  %v2502_v51 = vld [vmem:[%s8997_s27 + $0x10] sm:$0xff] }
 0x9e2   :  { %v2127_v53 = vmul.f32 %v2125_v35, %v2125_v35  ;;  %vm2405_vm9 = vcmp.eq.s32.totalorder %v8246_v21, %v2401_v29  ;;  %v2600_v29 = vsel %vm2599_vm14, 0.0, %v7874_v57 }
 0x9e3   :  { %v2126_v34 = vmul.f32 %v2124_v52, %v2124_v52  ;;  %v6206_v41 = vsel %vm2405_vm9, 1.0, %v7863_v20 }
 0x9e4   :  { %v2131_v54 = vsel %vm482_vm1, %v2127_v53, 0.0 }
 0x9e5   :  { %v2128_v39 = vsel %vm482_vm1, %v2126_v34, 0.0  ;;  %v6198_v34 = vld [vmem:[#allocation8] ss:$0 sm:$0xff] }
 0x9e6   :  { %2129 = vadd.xlane.f32.xlu0 %v2128_v39 }
 0x9ea   :  { %2132 = vadd.xlane.f32.xlu0 %v2131_v54 }
 0xa00   :  { %2403 = vperm.xlu0 %7099, %v2398_v55  }
 0xa73   :  { %v2130_v17 = vpop.xlane.xlu0 %2129 }
 0xa74   :  { %v2134_v18 = vmul.f32 0.03125, %v2130_v17 }
 0xa76   :  { %v2136_v19 = vadd.f32 1e-05, %v2134_v18 }
 0xa77   :  { %v2133_v22 = vpop.xlane.xlu0 %2132 }
 0xa78   :  { %7133 = vrsqrt.f32 %v2136_v19  ;;  %v2135_v23 = vmul.f32 0.03125, %v2133_v22 }
 0xa7a   :  { %v2137_v24 = vadd.f32 1e-05, %v2135_v23 }
 0xa7c   :  { %7135 = vrsqrt.f32 %v2137_v24 }
 0xa7f   :  { %v2404_v43 = vpop.permute.xlu0 %2403 }
 0xa80   :  { %vm2406_vm10 = vcmp.eq.s32.totalorder %v8246_v21, %v2404_v43 }
 0xa81   :  { %v6207_v44 = vsel %vm2406_vm10, 1.0, %v7863_v20 }
 0xa82   :  { %v7134_v25 = vpop.eup %7133 }
 0xa83   :  { %v2140_v26 = vmul.f32 %v7134_v25, %v2124_v52 }
 0xa85   :  { %v2149_v28 = vmul.f32 %v6196_v6, %v2140_v26 }
 0xa86   :  { %v7136_v31 = vpop.eup %7135 }
 0xa87   :  { %v2141_v32 = vmul.f32 %v7136_v31, %v2125_v35  ;;  %v8482_v40 = vadd.f32 %v6197_v27, %v2149_v28  ;;  %v2503_v35 = vld [vmem:[%s8997_s27 + $0x18] sm:$0xff] }
 0xa88   :  { %v6946_v52 = vpack.c.bf16 %v2503_v35, %v2502_v51 }
 0xa89   :  { %v2150_v38 = vmul.f32 %v6196_v6, %v2141_v32  ;;  %6597 = vmatprep.mubr.msk.f32.mxu1 %vm482_vm1, %v8482_v40 }
 0xa8b   :  { %v8489_v37 = vadd.f32 %v6197_v27, %v2150_v38 }
 0xa8d   :  { %6598 = vmatmul.mubr.msk.f32.vlgmr.msra.gmra.mrb[20].mxu1 %vm482_vm1, %v8489_v37 }
 0xa8e   :  { %6937 = vmatpush3.bf16.msra.mxu1 %v6934_v3  ;;  %6627 = vmatprep.mubr.msk.f32.mxu1 %vm482_vm1, %v6206_v41 }
 0xa8f   :  { %6939 = vmatprep.subr.bf16.mxu1 %v6938_v42 }
 0xa92   :  { %6941 = vmatpush3.bf16.msra.mxu1 %v6938_v42 }
 0xa93   :  { %6943 = vmatprep.subr.bf16.mxu1 %v6942_v50 }
 0xa95   :  { %6628 = vmatmul.mubr.msk.f32.vlgmr.msra.gmra.mrb[22].mxu1 %vm482_vm1, %v6207_v44 }
 0xa96   :  { %6945 = vmatpush3.bf16.msra.mxu1 %v6942_v50  ;;  %v3281_v50 = vsel %vm3280_vm0, 0.0, %v7874_v57 }
 0xa97   :  { %6947 = vmatprep.subr.bf16.mxu1 %v6946_v52 }
 0xa9a   :  { %6949 = vmatpush3.bf16.msra.mxu1 %v6946_v52 }
 0xa9b   :  { %6646 = vmatprep.subr.mxu1 %v7863_v20 }
 0xb60   :  { %v6599_v39 = vpop.f32.mrb[20].mxu1 }
 0xb61   :  { %v2249_v53 = vadd.f32 %v6599_v39, %v6198_v34  ;;  %v2243_v54 = vpop.f32.mrb[21].mxu1 }
 0xb62   :  { %v2244_v55 = vadd.f32 %v6198_v34, %v2243_v54 }
 0xb63   :  { %v2253_v58 = vmax.f32 %v2249_v53, 0.0 }
 0xb64   :  { %v2252_v56 = vmax.f32 %v2244_v55, 0.0 }
 0xb66   :  { %6616 = vmatprep.mubr.msk.f32.mxu0 %vm2269_vm11, %v2252_v56 }
 0xb67   :  { %6617 = vmatmul.mubr.msk.f32.vlgmr.msra.gmra.mrb[18].mxu0 %vm2269_vm11, %v2253_v58 }
 0xb68   :  { %v6629_v60 = vpop.f32.mrb[22].mxu1  ;;  %6643 = vmatprep.mubr.msk.f32.mxu0 %vm7864_vm4, %v7863_v20 }
 0xb69   :  { %v2497_v61 = vmul.f32 5.656854, %v6629_v60  ;;  %v2487_v62 = vpop.f32.mrb[23].mxu1 }
 0xb6a   :  { %v2496_v63 = vmul.f32 5.656854, %v2487_v62 }
 0xb6b   :  { %v8514_v1 = vadd.f32 %v2497_v61, %v8258_v30 }
 0xb6c   :  { %v8511_v0 = vadd.f32 %v2496_v63, %v8258_v30 }
 0xb6e   :  { %6638 = vmatprep.mubr.msk.f32.mxu1 %vm482_vm1, %v8511_v0 }
 0xb6f   :  { %6639 = vmatmul.mubr.msk.f32.vlgmr.msra.gmra.mrb[24].mxu1 %vm482_vm1, %v8514_v1 }
 0xb70   :  { %6648 = vmatprep.mubr.msk.f32.mxu1 %vm7864_vm4, %v7863_v20 }
 0xc3a   :  { %v8522_v3 = vpop.f32.mrb[18].mxu0 }
 0xc3b   :  { %v8524_v4 = vpop.f32.mrb[19].mxu0 }
 0xc42   :  { %v6640_v8 = vpop.f32.mrb[24].mxu1 }
 0xc43   :  { %v2583_v9 = vpop.f32.mrb[25].mxu1  ;;  %v8540_v30 = vadd.f32 %v6640_v8, %v6210_v7 }
 0xc44   :  { %v8526_v5 = vadd.f32 %v6210_v7, %v2583_v9 }
 0xc46   :  { %2765 = vrot.lane.b32.xlu0 %v8526_v5, %s7865_s11  ;;  %2602 = vrot.lane.b32.xlu1 %v8526_v5, %s7866_s17 }
 0xc4a   :  { %2930 = vrot.lane.b32.xlu0 %v8526_v5, %s7867_s3  ;;  %2767 = vrot.lane.b32.xlu1 %v8526_v5, %s7868_s15 }
 0xc4e   :  { %3095 = vrot.lane.b32.xlu0 %v8526_v5, %s7869_s29  ;;  %2932 = vrot.lane.b32.xlu1 %v8526_v5, %s7870_s16 }
 0xc52   :  { %3448 = vrot.lane.b32.xlu0 %v8540_v30, %s7868_s15  ;;  %3097 = vrot.lane.b32.xlu1 %v8526_v5, %s7871_s4 }
 0xc56   :  { %3613 = vrot.lane.b32.xlu0 %v8540_v30, %s7870_s16  ;;  %3283 = vrot.lane.b32.xlu1 %v8540_v30, %s7866_s17 }
 0xc5a   :  { %3778 = vrot.lane.b32.xlu0 %v8540_v30, %s7871_s4  ;;  %3446 = vrot.lane.b32.xlu1 %v8540_v30, %s7865_s11 }
 0xc5e   :  { %2689 = vrot.lane.b32.xlu0 %v8526_v5, %s7872_s18  ;;  %3611 = vrot.lane.b32.xlu1 %v8540_v30, %s7867_s3 }
 0xc62   :  { %3776 = vrot.lane.b32.xlu1 %v8540_v30, %s7869_s29 }
 0xc66   :  { %2854 = vrot.lane.b32.xlu1 %v8526_v5, %s7873_s19 }
 0xcb8   :  { %v2766_v10 = vpop.permute.xlu0 %2765  ;;  %v2603_v12 = vpop.permute.xlu1 %2602 }
 0xcb9   :  { %6642 = vmatpush3.xpose.msk.msra.mxu0 %vm669_vm5, %v2603_v12 }
 0xcba   :  { %6651 = vmatprep.subr.mxu0 %v7863_v20 }
 0xcbc   :  { %v2931_v13 = vpop.permute.xlu0 %2930  ;;  %6644 = vmatmul.mubr.msk.f32.vlgmr.msra.gmra.mrb[20].mxu0 %vm669_vm5, %v8526_v5  ;;  %v2768_v16 = vpop.permute.xlu1 %2767 }
 0xcbd   :  { %6652 = vmatpush3.xpose.msk.msra.mxu0 %vm669_vm5, %v2768_v16  ;;  %6653 = vmatprep.mubr.msk.f32.mxu0 %vm7864_vm4, %v7863_v20 }
 0xcbe   :  { %6661 = vmatprep.subr.mxu0 %v7863_v20 }
 0xcc0   :  { %v3096_v17 = vpop.permute.xlu0 %3095  ;;  %6654 = vmatmul.mubr.msk.f32.vlgmr.msra.gmra.mrb[22].mxu0 %vm669_vm5, %v2766_v10  ;;  %v2933_v18 = vpop.permute.xlu1 %2932 }
 0xcc1   :  { %6662 = vmatpush3.xpose.msk.msra.mxu0 %vm669_vm5, %v2933_v18  ;;  %6663 = vmatprep.mubr.msk.f32.mxu0 %vm7864_vm4, %v7863_v20 }
 0xcc2   :  { %6671 = vmatprep.subr.mxu0 %v7863_v20 }
 0xcc4   :  { %v3449_v19 = vpop.permute.xlu0 %3448  ;;  %6664 = vmatmul.mubr.msk.f32.vlgmr.msra.gmra.mrb[24].mxu0 %vm669_vm5, %v2931_v13  ;;  %v3098_v22 = vpop.permute.xlu1 %3097 }
 0xcc5   :  { %6672 = vmatpush3.xpose.msk.msra.mxu0 %vm669_vm5, %v3098_v22  ;;  %6673 = vmatprep.mubr.msk.f32.mxu0 %vm7864_vm4, %v7863_v20 }
 0xcc6   :  { %6681 = vmatprep.subr.mxu0 %v7863_v20 }
 0xcc8   :  { %v3614_v23 = vpop.permute.xlu0 %3613  ;;  %6674 = vmatmul.mubr.msk.f32.vlgmr.msra.gmra.mrb[26].mxu0 %vm669_vm5, %v3096_v17  ;;  %v3284_v24 = vpop.permute.xlu1 %3283 }
 0xcc9   :  { %6682 = vmatpush3.xpose.msk.msra.mxu0 %vm669_vm5, %v3284_v24  ;;  %6683 = vmatprep.mubr.msk.f32.mxu0 %vm7864_vm4, %v7863_v20 }
 0xcca   :  { %6691 = vmatprep.subr.mxu0 %v7863_v20 }
 0xccc   :  { %v3779_v25 = vpop.permute.xlu0 %3778  ;;  %6684 = vmatmul.mubr.msk.f32.vlgmr.msra.gmra.mrb[28].mxu0 %vm669_vm5, %v8540_v30  ;;  %v3447_v6 = vpop.permute.xlu1 %3446 }
 0xccd   :  { %6692 = vmatpush3.xpose.msk.msra.mxu0 %vm669_vm5, %v3449_v19  ;;  %6693 = vmatprep.mubr.msk.f32.mxu0 %vm7864_vm4, %v7863_v20 }
 0xcce   :  { %6701 = vmatprep.subr.mxu0 %v7863_v20 }
 0xcd0   :  { %v2690_v26 = vpop.permute.xlu0 %2689  ;;  %6694 = vmatmul.mubr.msk.f32.vlgmr.msra.gmra.mrb[30].mxu0 %vm669_vm5, %v3447_v6  ;;  %v3612_v27 = vpop.permute.xlu1 %3611 }
 0xcd1   :  { %6647 = vmatpush3.msra.mxu1 %v2690_v26  ;;  %6702 = vmatpush3.xpose.msk.msra.mxu0 %vm669_vm5, %v3614_v23 }
 0xcd2   :  { %6703 = vmatprep.mubr.msk.f32.mxu0 %vm7864_vm4, %v7863_v20  ;;  %6711 = vmatprep.subr.mxu0 %v7863_v20 }
 0xcd3   :  { %6656 = vmatprep.subr.mxu1 %v7863_v20 }
 0xcd4   :  { %6704 = vmatmul.mubr.msk.f32.vlgmr.msra.gmra.mrb[32].mxu0 %vm669_vm5, %v3612_v27  ;;  %v3777_v28 = vpop.permute.xlu1 %3776 }
 0xcd5   :  { %6712 = vmatpush3.xpose.msk.msra.mxu0 %vm669_vm5, %v3779_v25  ;;  %6713 = vmatprep.mubr.msk.f32.mxu0 %vm7864_vm4, %v7863_v20 }
 0xcd8   :  { %6714 = vmatmul.mubr.msk.f32.vlgmr.msra.gmra.mrb[34].mxu0 %vm669_vm5, %v3777_v28  ;;  %v8626_v63 = vpop.permute.xlu1 %2854 }
 0xd8f   :  { %v2674_v31 = vpop.f32.mrb[20].mxu0 }
 0xd90   :  { %v2675_v32 = vadd.f32 %v2674_v31, %v2600_v29  ;;  %v6645_v33 = vpop.f32.mrb[21].mxu0 }
 0xd92   :  { %v2678_v36 = vsel %vm669_vm5, %v2675_v32, -inf }
 0xd93   :  { %2679 = vmax.xlane.f32.xlu0 %v2678_v36  ;;  %v2839_v38 = vpop.f32.mrb[22].mxu0 }
 0xd94   :  { %v2840_v41 = vadd.f32 %v2839_v38, %v2600_v29  ;;  %v6655_v42 = vpop.f32.mrb[23].mxu0 }
 0xd96   :  { %v2843_v14 = vsel %vm669_vm5, %v2840_v41, -inf }
 0xd97   :  { %2844 = vmax.xlane.f32.xlu1 %v2843_v14  ;;  %v3004_v43 = vpop.f32.mrb[24].mxu0 }
 0xd98   :  { %v3005_v44 = vadd.f32 %v3004_v43, %v2600_v29  ;;  %v6665_v45 = vpop.f32.mrb[25].mxu0 }
 0xd9a   :  { %v3008_v46 = vsel %vm669_vm5, %v3005_v44, -inf }
 0xd9b   :  { %3009 = vmax.xlane.f32.xlu0 %v3008_v46  ;;  %v3169_v47 = vpop.f32.mrb[26].mxu0 }
 0xd9c   :  { %v3170_v48 = vadd.f32 %v3169_v47, %v2600_v29  ;;  %v6675_v49 = vpop.f32.mrb[27].mxu0 }
 0xd9e   :  { %v3173_v51 = vsel %vm669_vm5, %v3170_v48, -inf }
 0xd9f   :  { %3174 = vmax.xlane.f32.xlu0 %v3173_v51  ;;  %v3355_v15 = vpop.f32.mrb[28].mxu0 }
 0xda0   :  { %v3356_v35 = vadd.f32 %v3355_v15, %v3281_v50  ;;  %v6685_v52 = vpop.f32.mrb[29].mxu0 }
 0xda2   :  { %v3359_v34 = vsel %vm669_vm5, %v3356_v35, -inf }
 0xda3   :  { %3360 = vmax.xlane.f32.xlu1 %v3359_v34  ;;  %v3520_v39 = vpop.f32.mrb[30].mxu0 }
 0xda4   :  { %v3521_v53 = vadd.f32 %v3520_v39, %v3281_v50  ;;  %v6695_v54 = vpop.f32.mrb[31].mxu0 }
 0xda6   :  { %v3524_v2 = vsel %vm669_vm5, %v3521_v53, -inf }
 0xda7   :  { %3525 = vmax.xlane.f32.xlu0 %v3524_v2  ;;  %v3685_v21 = vpop.f32.mrb[32].mxu0 }
 0xda8   :  { %v3686_v55 = vadd.f32 %v3685_v21, %v3281_v50  ;;  %v6705_v56 = vpop.f32.mrb[33].mxu0 }
 0xdaa   :  { %v3689_v57 = vsel %vm669_vm5, %v3686_v55, -inf }
 0xdab   :  { %3690 = vmax.xlane.f32.xlu1 %v3689_v57  ;;  %v3850_v58 = vpop.f32.mrb[34].mxu0 }
 0xdac   :  { %v3851_v60 = vadd.f32 %v3850_v58, %v3281_v50  ;;  %v6715_v61 = vpop.f32.mrb[35].mxu0 }
 0xdae   :  { %v3854_v62 = vsel %vm669_vm5, %v3851_v60, -inf }
 0xdaf   :  { %3855 = vmax.xlane.f32.xlu0 %v3854_v62 }
 0xdbc   :  { %3184 = vrot.lane.b32.xlu1 %v8526_v5, %s7875_s23 }
 0xdc5   :  { %3019 = vrot.lane.b32.xlu0 %v8526_v5, %s7876_s26 }
 0xe20   :  { %v2680_v7 = vpop.xlane.xlu0 %2679 }
 0xe21   :  { %v2681_v8 = vsub.f32 %v2675_v32, %v2680_v7 }
 0xe23   :  { %v2682_v9 = vmul.f32 1.442695, %v2681_v8 }
 0xe24   :  { %v2845_v10 = vpop.xlane.xlu1 %2844 }
 0xe25   :  { %7137 = vpow2.f32 %v2682_v9  ;;  %v2846_v12 = vsub.f32 %v2840_v41, %v2845_v10 }
 0xe27   :  { %v2847_v13 = vmul.f32 1.442695, %v2846_v12 }
 0xe28   :  { %v3010_v16 = vpop.xlane.xlu0 %3009 }
 0xe29   :  { %7139 = vpow2.f32 %v2847_v13  ;;  %v3011_v17 = vsub.f32 %v3005_v44, %v3010_v16 }
 0xe2b   :  { %v3012_v18 = vmul.f32 1.442695, %v3011_v17 }
 0xe2c   :  { %v3175_v19 = vpop.xlane.xlu0 %3174 }
 0xe2d   :  { %7141 = vpow2.f32 %v3012_v18  ;;  %v3176_v22 = vsub.f32 %v3170_v48, %v3175_v19 }
 0xe2f   :  { %v7138_v23 = vpop.eup %7137  ;;  %v3177_v24 = vmul.f32 1.442695, %v3176_v22 }
 0xe30   :  { %v2684_v5 = vsel %vm669_vm5, %v7138_v23, 0.0  ;;  %v3361_v31 = vpop.xlane.xlu1 %3360 }
 0xe31   :  { %7143 = vpow2.f32 %v3177_v24  ;;  %2685 = vadd.xlane.f32.xlu1 %v2684_v5  ;;  %v3362_v32 = vsub.f32 %v3356_v35, %v3361_v31 }
 0xe33   :  { %v7140_v25 = vpop.eup %7139  ;;  %v3363_v41 = vmul.f32 1.442695, %v3362_v32 }
 0xe34   :  { %v2849_v6 = vsel %vm669_vm5, %v7140_v25, 0.0  ;;  %v3526_v33 = vpop.xlane.xlu0 %3525 }
 0xe35   :  { %2850 = vadd.xlane.f32.xlu0 %v2849_v6  ;;  %v3527_v38 = vsub.f32 %v3521_v53, %v3526_v33  ;;  %7145 = vpow2.f32 %v3363_v41 }
 0xe37   :  { %v7142_v26 = vpop.eup %7141  ;;  %v3528_v43 = vmul.f32 1.442695, %v3527_v38  ;;  %v3957_v38 = vld [vmem:[%s8998_s9 + $0x8] sm:$0xff] }
 0xe38   :  { %v3014_v27 = vsel %vm669_vm5, %v7142_v26, 0.0  ;;  %v3691_v36 = vpop.xlane.xlu1 %3690 }
 0xe39   :  { %3015 = vadd.xlane.f32.xlu1 %v3014_v27  ;;  %v3692_v42 = vsub.f32 %v3686_v55, %v3691_v36  ;;  %7147 = vpow2.f32 %v3528_v43  ;;  %v3956_v36 = vld [vmem:[%s8998_s9] sm:$0xff] }
 0xe3a   :  { %v6950_v41 = vpack.c.bf16 %v3957_v38, %v3956_v36  ;;  %v4186_v38 = vld [vmem:[#allocation23] sm:$0xff] }
 0xe3b   :  { %v8631_v28 = vpop.eup %7143  ;;  %v3693_v44 = vmul.f32 1.442695, %v3692_v42  ;;  %v3958_v42 = vld [vmem:[%s8998_s9 + $0x10] sm:$0xff] }
 0xe3c   :  { %v3179_v29 = vsel %vm669_vm5, %v8631_v28, 0.0  ;;  %v3856_v14 = vpop.xlane.xlu0 %3855  ;;  %v3185_v34 = vpop.permute.xlu1 %3184  ;;  %6951 = vmatprep.subr.bf16.mxu0 %v6950_v41 }
 0xe3d   :  { %3180 = vadd.xlane.f32.xlu0 %v3179_v29  ;;  %v3857_v45 = vsub.f32 %v3851_v60, %v3856_v14  ;;  %7149 = vpow2.f32 %v3693_v44  ;;  %6953 = vmatpush3.bf16.msra.mxu0 %v6950_v41  ;;  %v3959_v14 = vld [vmem:[%s8998_s9 + $0x18] sm:$0xff]  ;;  %v4187_v41 = vld [vmem:[#allocation23 + $0x8] sm:$0xff] }
 0xe3e   :  { %v6954_v43 = vpack.c.bf16 %v3959_v14, %v3958_v42  ;;  %v6966_v42 = vpack.c.bf16 %v4187_v41, %v4186_v38  ;;  %v4189_v14 = vld [vmem:[#allocation23 + $0x18] sm:$0xff] }
 0xe3f   :  { %v3858_v46 = vmul.f32 1.442695, %v3857_v45  ;;  %v7146_v47 = vpop.eup %7145 }
 0xe40   :  { %v3365_v49 = vsel %vm669_vm5, %v7146_v47, 0.0  ;;  %v3020_v39 = vpop.permute.xlu0 %3019  ;;  %6955 = vmatprep.subr.bf16.mxu0 %v6954_v43 }
 0xe41   :  { %7151 = vpow2.f32 %v3858_v46  ;;  %6957 = vmatpush3.bf16.msra.mxu0 %v6954_v43 }
 0xe42   :  { %6967 = vmatprep.subr.bf16.mxu0 %v6966_v42 }
 0xe43   :  { %v8639_v48 = vpop.eup %7147 }
 0xe44   :  { %v3530_v51 = vsel %vm669_vm5, %v8639_v48, 0.0 }
 0xe47   :  { %v8642_v50 = vpop.eup %7149 }
 0xe48   :  { %v3695_v15 = vsel %vm669_vm5, %v8642_v50, 0.0 }
 0xe4a   :  { %3535 = vrot.lane.b32.xlu1 %v8540_v30, %s7873_s19 }
 0xe4b   :  { %v8648_v35 = vpop.eup %7151 }
 0xe4c   :  { %v3860_v52 = vsel %vm669_vm5, %v8648_v35, 0.0 }
 0xe53   :  { %3370 = vrot.lane.b32.xlu0 %v8540_v30, %s7872_s18 }
 0xe6e   :  { %3366 = vadd.xlane.f32.xlu1 %v3365_v49 }
 0xe72   :  { %3531 = vadd.xlane.f32.xlu0 %v3530_v51  ;;  %3696 = vadd.xlane.f32.xlu1 %v3695_v15  ;;  %v6201_v15 = vld [vmem:[#allocation10] ss:$0 sm:$0xff] }
 0xe76   :  { %3861 = vadd.xlane.f32.xlu1 %v3860_v52 }
 0xe87   :  { %3865 = vrot.lane.b32.xlu1 %v8540_v30, %s7875_s23 }
 0xe88   :  { %3700 = vrot.lane.b32.xlu0 %v8540_v30, %s7876_s26 }
 0xebe   :  { %v2686_v53 = vpop.xlane.xlu1 %2685 }
 0xebf   :  { %7153 = vrcp.f32 %v2686_v53 }
 0xec2   :  { %v2851_v54 = vpop.xlane.xlu0 %2850 }
 0xec3   :  { %7155 = vrcp.f32 %v2851_v54 }
 0xec6   :  { %v3016_v2 = vpop.xlane.xlu1 %3015 }
 0xec7   :  { %7157 = vrcp.f32 %v3016_v2 }
 0xec9   :  { %v7154_v21 = vpop.eup %7153 }
 0xeca   :  { %v2688_v55 = vmul.f32 %v7154_v21, %v7138_v23  ;;  %v3181_v56 = vpop.xlane.xlu0 %3180  ;;  %v3536_v7 = vpop.permute.xlu1 %3535 }
 0xecb   :  { %7159 = vrcp.f32 %v3181_v56 }
 0xecc   :  { %6649 = vmatmul.mubr.msk.f32.vlgmr.msra.gmra.mrb[26].mxu1 %vm669_vm5, %v2688_v55 }
 0xecd   :  { %v7156_v57 = vpop.eup %7155  ;;  %6657 = vmatpush3.msra.mxu1 %v8626_v63  ;;  %6658 = vmatprep.mubr.msk.f32.mxu1 %vm7864_vm4, %v7863_v20 }
 0xece   :  { %v2853_v30 = vmul.f32 %v7156_v57, %v7140_v25  ;;  %6666 = vmatprep.subr.mxu1 %v7863_v20  ;;  %v3371_v63 = vpop.permute.xlu0 %3370 }
 0xed0   :  { %6659 = vmatmul.mubr.msk.f32.vlgmr.msra.gmra.mrb[28].mxu1 %vm669_vm5, %v2853_v30 }
 0xed1   :  { %v7158_v58 = vpop.eup %7157  ;;  %6667 = vmatpush3.msra.mxu1 %v3020_v39  ;;  %6668 = vmatprep.mubr.msk.f32.mxu1 %vm7864_vm4, %v7863_v20  ;;  %v2348_v39 = vadd.f32 %v8522_v3, %v6201_v15 }
 0xed2   :  { %v3018_v60 = vmul.f32 %v7158_v58, %v7142_v26  ;;  %6676 = vmatprep.subr.mxu1 %v7863_v20 }
 0xed3   :  { %v2352_v53 = vadd.f32 %v2348_v39, %v8489_v37 }
 0xed4   :  { %6669 = vmatmul.mubr.msk.f32.vlgmr.msra.gmra.mrb[30].mxu1 %vm669_vm5, %v3018_v60 }
 0xed5   :  { %v7160_v61 = vpop.eup %7159  ;;  %6677 = vmatpush3.msra.mxu1 %v3185_v34  ;;  %6678 = vmatprep.mubr.msk.f32.mxu1 %vm7864_vm4, %v7863_v20  ;;  %v2356_v54 = vsel %vm482_vm1, %v2352_v53, 0.0 }
 0xed6   :  { %v3183_v62 = vmul.f32 %v7160_v61, %v8631_v28  ;;  %6686 = vmatprep.subr.mxu1 %v7863_v20 }
 0xed8   :  { %6679 = vmatmul.mubr.msk.f32.vlgmr.msra.gmra.mrb[32].mxu1 %vm669_vm5, %v3183_v62 }
 0xed9   :  { %6687 = vmatpush3.msra.mxu1 %v3371_v63  ;;  %6688 = vmatprep.mubr.msk.f32.mxu1 %vm7864_vm4, %v7863_v20 }
 0xeda   :  { %6696 = vmatprep.subr.mxu1 %v7863_v20 }
 0xefb   :  { %v3367_v8 = vpop.xlane.xlu1 %3366 }
 0xefc   :  { %7161 = vrcp.f32 %v3367_v8 }
 0xeff   :  { %v3532_v9 = vpop.xlane.xlu0 %3531  ;;  %v3697_v10 = vpop.xlane.xlu1 %3696 }
 0xf00   :  { %7163 = vrcp.f32 %v3532_v9 }
 0xf01   :  { %7165 = vrcp.f32 %v3697_v10 }
 0xf03   :  { %v3862_v12 = vpop.xlane.xlu1 %3861  ;;  %v3701_v22 = vpop.permute.xlu0 %3700 }
 0xf04   :  { %7167 = vrcp.f32 %v3862_v12 }
 0xf06   :  { %v7162_v13 = vpop.eup %7161 }
 0xf07   :  { %v3369_v16 = vmul.f32 %v7162_v13, %v7146_v47  ;;  %v3866_v5 = vpop.permute.xlu1 %3865 }
 0xf09   :  { %6689 = vmatmul.mubr.msk.f32.vlgmr.msra.gmra.mrb[34].mxu1 %vm669_vm5, %v3369_v16  ;;  %v6237_v16 = vld [vmem:[#allocation16] ss:$0 sm:$0xff] }
 0xf0a   :  { %v7164_v17 = vpop.eup %7163  ;;  %6697 = vmatpush3.msra.mxu1 %v3536_v7  ;;  %6698 = vmatprep.mubr.msk.f32.mxu1 %vm7864_vm4, %v7863_v20 }
 0xf0b   :  { %v3534_v18 = vmul.f32 %v7164_v17, %v8639_v48  ;;  %6706 = vmatprep.subr.mxu1 %v7863_v20  ;;  %v7166_v19 = vpop.eup %7165 }
 0xf0c   :  { %v3699_v23 = vmul.f32 %v7166_v19, %v8642_v50 }
 0xf0d   :  { %6699 = vmatmul.mubr.msk.f32.vlgmr.msra.gmra.mrb[36].mxu1 %vm669_vm5, %v3534_v18 }
 0xf0e   :  { %6707 = vmatpush3.msra.mxu1 %v3701_v22  ;;  %6708 = vmatprep.mubr.msk.f32.mxu1 %vm7864_vm4, %v7863_v20  ;;  %v7168_v24 = vpop.eup %7167 }
 0xf0f   :  { %6716 = vmatprep.subr.mxu1 %v7863_v20  ;;  %v3864_v25 = vmul.f32 %v7168_v24, %v8648_v35  ;;  %v2343_v35 = vadd.f32 %v6201_v15, %v8524_v4 }
 0xf11   :  { %6709 = vmatmul.mubr.msk.f32.vlgmr.msra.gmra.mrb[38].mxu1 %vm669_vm5, %v3699_v23  ;;  %v2351_v52 = vadd.f32 %v2343_v35, %v8482_v40 }
 0xf12   :  { %6717 = vmatpush3.msra.mxu1 %v3866_v5  ;;  %6718 = vmatprep.mubr.msk.f32.mxu1 %vm7864_vm4, %v7863_v20 }
 0xf13   :  { %v2353_v34 = vsel %vm482_vm1, %v2351_v52, 0.0 }
 0xf15   :  { %6719 = vmatmul.mubr.msk.f32.vlgmr.msra.gmra.mrb[40].mxu1 %vm669_vm5, %v3864_v25  ;;  %v6204_v25 = vld [vmem:[#allocation11] ss:$0 sm:$0xff] }
 0xf9f   :  { %v2761_v6 = vpop.f32.mrb[26].mxu1 }
 0xfa0   :  { %v6650_v26 = vpop.f32.mrb[27].mxu1 }
 0xfa3   :  { %v2926_v27 = vpop.f32.mrb[28].mxu1 }
 0xfa4   :  { %3261 = vrot.lane.b32.xlu0 %v2926_v27, %s7843_s20  ;;  %v6660_v28 = vpop.f32.mrb[29].mxu1 }
 0xfa7   :  { %v3091_v29 = vpop.f32.mrb[30].mxu1 }
 0xfa8   :  { %3265 = vrot.lane.b32.xlu1 %v3091_v29, %s7877_s30  ;;  %v6670_v31 = vpop.f32.mrb[31].mxu1  ;;  %v6205_v29 = vld [vmem:[#allocation13] ss:$0 sm:$0xff] }
 0xfab   :  { %v3256_v32 = vpop.f32.mrb[32].mxu1 }
 0xfac   :  { %3269 = vrot.lane.b32.xlu1 %v3256_v32, %s7878_s28  ;;  %v6680_v33 = vpop.f32.mrb[33].mxu1 }
 0xfdc   :  { %v3442_v44 = vpop.f32.mrb[34].mxu1 }
 0xfdd   :  { %v6690_v45 = vpop.f32.mrb[35].mxu1 }
 0xfe0   :  { %v3607_v46 = vpop.f32.mrb[36].mxu1 }
 0xfe1   :  { %3942 = vrot.lane.b32.xlu0 %v3607_v46, %s7843_s20  ;;  %v6700_v47 = vpop.f32.mrb[37].mxu1 }
 0xfe4   :  { %v3772_v48 = vpop.f32.mrb[38].mxu1 }
 0xfe5   :  { %3946 = vrot.lane.b32.xlu0 %v3772_v48, %s7877_s30  ;;  %v6710_v49 = vpop.f32.mrb[39].mxu1 }
 0xfe8   :  { %v3937_v50 = vpop.f32.mrb[40].mxu1 }
 0xfe9   :  { %3950 = vrot.lane.b32.xlu1 %v3937_v50, %s7878_s28  ;;  %v6720_v51 = vpop.f32.mrb[41].mxu1 }
0x1004   :  { %2354 = vadd.xlane.f32.xlu0 %v2353_v34 }
0x100d   :  { %2357 = vadd.xlane.f32.xlu1 %v2356_v54 }
0x1016   :  { %v3262_v2 = vpop.permute.xlu0 %3261 }
0x1017   :  { %v3272_v55 = vsel %vm669_vm5, %v2761_v6, %v3262_v2 }
0x101a   :  { %v3266_v21 = vpop.permute.xlu1 %3265 }
0x101b   :  { %v3273_v56 = vsel %vm1339_vm7, %v3272_v55, %v3266_v21  ;;  %v4094_v55 = vld [vmem:[#allocation20] sm:$0xff] }
0x101e   :  { %v3270_v57 = vpop.permute.xlu1 %3269 }
0x101f   :  { %v3274_v4 = vsel %vm1341_vm8, %v3273_v56, %v3270_v57  ;;  %v4095_v56 = vld [vmem:[#allocation20 + $0x8] sm:$0xff] }
0x1020   :  { %6729 = vmatprep.mubr.msk.f32.mxu0 %vm482_vm1, %v3274_v4  ;;  %v6958_v57 = vpack.c.bf16 %v4095_v56, %v4094_v55  ;;  %v4096_v4 = vld [vmem:[#allocation20 + $0x10] sm:$0xff] }
0x1022   :  { %6959 = vmatprep.subr.bf16.mxu1 %v6958_v57 }
0x1023   :  { %6961 = vmatpush3.bf16.msra.mxu1 %v6958_v57 }
0x1053   :  { %v3943_v40 = vpop.permute.xlu0 %3942 }
0x1054   :  { %v3953_v3 = vsel %vm669_vm5, %v3442_v44, %v3943_v40  ;;  %v4097_v40 = vld [vmem:[#allocation20 + $0x18] sm:$0xff] }
0x1057   :  { %v3947_v30 = vpop.permute.xlu0 %3946 }
0x1058   :  { %v3954_v37 = vsel %vm1339_vm7, %v3953_v3, %v3947_v30  ;;  %v6962_v30 = vpack.c.bf16 %v4097_v40, %v4096_v4 }
0x105a   :  { %6963 = vmatprep.subr.bf16.mxu1 %v6962_v30 }
0x105b   :  { %v3951_v58 = vpop.permute.xlu1 %3950  ;;  %6965 = vmatpush3.bf16.msra.mxu1 %v6962_v30 }
0x105c   :  { %v3955_v60 = vsel %vm1341_vm8, %v3954_v37, %v3951_v58  ;;  %6754 = vmatprep.subr.mxu1 %v7863_v20 }
0x105d   :  { %6730 = vmatmul.mubr.msk.f32.vlgmr.msra.gmra.mrb[36].mxu0 %vm482_vm1, %v3955_v60 }
0x105e   :  { %6969 = vmatpush3.bf16.msra.mxu0 %v6966_v42 }
0x1091   :  { %v2355_v61 = vpop.xlane.xlu0 %2354 }
0x1092   :  { %v2359_v62 = vmul.f32 0.03125, %v2355_v61 }
0x1094   :  { %v2361_v63 = vsub.f32 %v2351_v52, %v2359_v62 }
0x1096   :  { %v2363_v7 = vmul.f32 %v2361_v63, %v2361_v63 }
0x1098   :  { %v2365_v8 = vsel %vm482_vm1, %v2363_v7, 0.0  ;;  %v6240_v7 = vld [vmem:[#allocation17] ss:$0 sm:$0xff] }
0x1099   :  { %2366 = vadd.xlane.f32.xlu1 %v2365_v8 }
0x109a   :  { %v2358_v9 = vpop.xlane.xlu1 %2357 }
0x109b   :  { %v2360_v19 = vmul.f32 0.03125, %v2358_v9  ;;  %v6241_v9 = vld [vmem:[#allocation19] ss:$0 sm:$0xff] }
0x109d   :  { %v2362_v6 = vsub.f32 %v2352_v53, %v2360_v19  ;;  %v6245_v19 = vld [vmem:[#allocation25] ss:$0 sm:$0xff] }
0x109f   :  { %v2364_v36 = vmul.f32 %v2362_v6, %v2362_v6 }
0x1126   :  { %v2367_v10 = vpop.xlane.xlu1 %2366 }
0x1127   :  { %v2371_v12 = vmul.f32 0.03125, %v2367_v10 }
0x1129   :  { %v2373_v13 = vadd.f32 1e-05, %v2371_v12 }
0x112b   :  { %7169 = vrsqrt.f32 %v2373_v13 }
0x1130   :  { %v6731_v17 = vpop.f32.mrb[36].mxu0 }
0x1131   :  { %v4039_v18 = vpop.f32.mrb[37].mxu0  ;;  %v4045_v22 = vadd.f32 %v6731_v17, %v6237_v16 }
0x1132   :  { %v4040_v23 = vadd.f32 %v6237_v16, %v4039_v18 }
0x1133   :  { %v4049_v26 = vadd.f32 %v4045_v22, %v8514_v1  ;;  %v4188_v1 = vld [vmem:[#allocation23 + $0x10] sm:$0xff] }
0x1134   :  { %v4048_v24 = vadd.f32 %v4040_v23, %v8511_v0  ;;  %v2368_v0 = vsel %vm482_vm1, %v2364_v36, 0.0  ;;  %v6970_v43 = vpack.c.bf16 %v4189_v14, %v4188_v1 }
0x1135   :  { %v7170_v5 = vpop.eup %7169  ;;  %v4053_v32 = vsel %vm482_vm1, %v4049_v26, 0.0 }
0x1136   :  { %v4050_v27 = vsel %vm482_vm1, %v4048_v24, 0.0  ;;  %v2377_v28 = vmul.f32 %v7170_v5, %v2361_v63  ;;  %6971 = vmatprep.subr.bf16.mxu0 %v6970_v43 }
0x1137   :  { %4051 = vadd.xlane.f32.xlu0 %v4050_v27  ;;  %6973 = vmatpush3.bf16.msra.mxu0 %v6970_v43 }
0x1138   :  { %v2386_v31 = vmul.f32 %v6204_v25, %v2377_v28  ;;  %6764 = vmatprep.subr.mxu0 %v7863_v20 }
0x113a   :  { %v2395_v33 = vadd.f32 %v6205_v29, %v2386_v31 }
0x113b   :  { %4054 = vadd.xlane.f32.xlu0 %v4053_v32 }
0x113c   :  { %6751 = vmatprep.mubr.msk.f32.mxu0 %vm482_vm1, %v2395_v33 }
0x113f   :  { %2369 = vadd.xlane.f32.xlu0 %v2368_v0 }
0x11c4   :  { %v4052_v44 = vpop.xlane.xlu0 %4051 }
0x11c5   :  { %v4056_v45 = vmul.f32 0.03125, %v4052_v44 }
0x11c7   :  { %v4058_v46 = vsub.f32 %v4048_v24, %v4056_v45 }
0x11c8   :  { %v4055_v47 = vpop.xlane.xlu0 %4054 }
0x11c9   :  { %v4057_v48 = vmul.f32 0.03125, %v4055_v47  ;;  %v4060_v49 = vmul.f32 %v4058_v46, %v4058_v46 }
0x11cb   :  { %v4059_v50 = vsub.f32 %v4049_v26, %v4057_v48  ;;  %v4062_v51 = vsel %vm482_vm1, %v4060_v49, 0.0 }
0x11cc   :  { %4063 = vadd.xlane.f32.xlu1 %v4062_v51  ;;  %v2370_v15 = vpop.xlane.xlu0 %2369 }
0x11cd   :  { %v2372_v35 = vmul.f32 0.03125, %v2370_v15  ;;  %v4061_v52 = vmul.f32 %v4059_v50, %v4059_v50 }
0x11cf   :  { %v2374_v34 = vadd.f32 1e-05, %v2372_v35  ;;  %v4065_v39 = vsel %vm482_vm1, %v4061_v52, 0.0 }
0x11d0   :  { %4066 = vadd.xlane.f32.xlu0 %v4065_v39 }
0x11d1   :  { %7171 = vrsqrt.f32 %v2374_v34 }
0x11db   :  { %v7172_v53 = vpop.eup %7171 }
0x11dc   :  { %v2378_v54 = vmul.f32 %v7172_v53, %v2362_v6  ;;  %v6242_v6 = vld [vmem:[#allocation22] ss:$0 sm:$0xff] }
0x11de   :  { %v2387_v2 = vmul.f32 %v6204_v25, %v2378_v54 }
0x11e0   :  { %v2396_v21 = vadd.f32 %v6205_v29, %v2387_v2 }
0x11e2   :  { %6752 = vmatmul.mubr.msk.f32.vlgmr.msra.gmra.mrb[38].mxu0 %vm482_vm1, %v2396_v21 }
0x11e3   :  { %6766 = vmatprep.mubr.msk.f32.mxu0 %vm7864_vm4, %v7863_v20 }
0x1259   :  { %v4064_v3 = vpop.xlane.xlu1 %4063 }
0x125a   :  { %v4068_v37 = vmul.f32 0.03125, %v4064_v3 }
0x125c   :  { %v4070_v58 = vadd.f32 1e-05, %v4068_v37 }
0x125d   :  { %v4067_v60 = vpop.xlane.xlu0 %4066 }
0x125e   :  { %7173 = vrsqrt.f32 %v4070_v58  ;;  %v4069_v61 = vmul.f32 0.03125, %v4067_v60 }
0x1260   :  { %v4071_v62 = vadd.f32 1e-05, %v4069_v61 }
0x1262   :  { %7175 = vrsqrt.f32 %v4071_v62 }
0x1268   :  { %v7174_v63 = vpop.eup %7173 }
0x1269   :  { %v4074_v8 = vmul.f32 %v7174_v63, %v4058_v46 }
0x126b   :  { %v4083_v10 = vmul.f32 %v6240_v7, %v4074_v8 }
0x126c   :  { %v7176_v12 = vpop.eup %7175 }
0x126d   :  { %v4075_v13 = vmul.f32 %v7176_v12, %v4059_v50  ;;  %v8727_v16 = vadd.f32 %v6241_v9, %v4083_v10 }
0x126f   :  { %v4084_v17 = vmul.f32 %v6240_v7, %v4075_v13  ;;  %6740 = vmatprep.mubr.msk.f32.mxu1 %vm482_vm1, %v8727_v16 }
0x1271   :  { %v8731_v18 = vadd.f32 %v6241_v9, %v4084_v17 }
0x1273   :  { %6741 = vmatmul.mubr.msk.f32.vlgmr.msra.gmra.mrb[42].mxu1 %vm482_vm1, %v8731_v18 }
0x1274   :  { %6756 = vmatprep.mubr.msk.f32.mxu1 %vm7864_vm4, %v7863_v20 }
0x12b5   :  { %v6753_v22 = vpop.f32.mrb[38].mxu0 }
0x12b6   :  { %v8737_v23 = vadd.f32 %v6753_v22, %v6245_v19  ;;  %v4269_v24 = vpop.f32.mrb[39].mxu0 }
0x12b7   :  { %v8739_v5 = vadd.f32 %v6245_v19, %v4269_v24 }
0x12b9   :  { %4443 = vrot.lane.b32.xlu1 %v8739_v5, %s7865_s11  ;;  %6755 = vmatpush3.xpose.msk.msra.mxu1 %vm669_vm5, %v8739_v5 }
0x12ba   :  { %6759 = vmatprep.subr.mxu1 %v7863_v20 }
0x12bd   :  { %4608 = vrot.lane.b32.xlu1 %v8739_v5, %s7867_s3 }
0x132b   :  { %v4444_v25 = vpop.permute.xlu1 %4443 }
0x132c   :  { %6765 = vmatpush3.xpose.msk.msra.mxu0 %vm669_vm5, %v4444_v25 }
0x132d   :  { %6774 = vmatprep.subr.mxu0 %v7863_v20 }
0x132f   :  { %v4609_v31 = vpop.permute.xlu1 %4608 }
0x1346   :  { %v6742_v26 = vpop.f32.mrb[42].mxu1 }
0x1347   :  { %v4177_v27 = vpop.f32.mrb[43].mxu1  ;;  %v4183_v29 = vadd.f32 %v6742_v26, %v6242_v6 }
0x1348   :  { %v4178_v28 = vadd.f32 %v6242_v6, %v4177_v27 }
0x134a   :  { %4606 = vrot.lane.b32.xlu1 %v4178_v28, %s7867_s3  ;;  %4441 = vrot.lane.b32.xlu0 %v4178_v28, %s7865_s11 }
0x134b   :  { %6757 = vmatmul.mubr.msk.f32.vlgmr.msra.gmra.mrb[44].mxu1 %vm669_vm5, %v4178_v28 }
0x134c   :  { %6761 = vmatprep.mubr.msk.f32.mxu1 %vm7864_vm4, %v7863_v20 }
0x134e   :  { %4771 = vrot.lane.b32.xlu1 %v4178_v28, %s7869_s29  ;;  %4773 = vrot.lane.b32.xlu0 %v8739_v5, %s7869_s29 }
0x1352   :  { %5114 = vrot.lane.b32.xlu1 %v4183_v29, %s7865_s11  ;;  %5116 = vrot.lane.b32.xlu0 %v8737_v23, %s7865_s11 }
0x1356   :  { %5279 = vrot.lane.b32.xlu1 %v4183_v29, %s7867_s3  ;;  %5281 = vrot.lane.b32.xlu0 %v8737_v23, %s7867_s3 }
0x135a   :  { %5444 = vrot.lane.b32.xlu1 %v4183_v29, %s7869_s29  ;;  %5446 = vrot.lane.b32.xlu0 %v8737_v23, %s7869_s29 }
0x135e   :  { %4530 = vrot.lane.b32.xlu1 %v8739_v5, %s7868_s15  ;;  %4365 = vrot.lane.b32.xlu0 %v8739_v5, %s7866_s17 }
0x13bc   :  { %v4442_v32 = vpop.permute.xlu0 %4441  ;;  %v4607_v33 = vpop.permute.xlu1 %4606 }
0x13bd   :  { %6767 = vmatmul.mubr.msk.f32.vlgmr.msra.gmra.mrb[40].mxu0 %vm669_vm5, %v4442_v32 }
0x13be   :  { %6775 = vmatpush3.xpose.msk.msra.mxu0 %vm669_vm5, %v4609_v31  ;;  %6776 = vmatprep.mubr.msk.f32.mxu0 %vm7864_vm4, %v7863_v20 }
0x13bf   :  { %6784 = vmatprep.subr.mxu0 %v7863_v20 }
0x13c0   :  { %v4774_v36 = vpop.permute.xlu0 %4773  ;;  %v4772_v0 = vpop.permute.xlu1 %4771 }
0x13c1   :  { %6777 = vmatmul.mubr.msk.f32.vlgmr.msra.gmra.mrb[42].mxu0 %vm669_vm5, %v4607_v33 }
0x13c2   :  { %6785 = vmatpush3.xpose.msk.msra.mxu0 %vm669_vm5, %v4774_v36  ;;  %6786 = vmatprep.mubr.msk.f32.mxu0 %vm7864_vm4, %v7863_v20 }
0x13c3   :  { %6794 = vmatprep.subr.mxu0 %v7863_v20 }
0x13c4   :  { %v5117_v38 = vpop.permute.xlu0 %5116  ;;  %v5115_v41 = vpop.permute.xlu1 %5114 }
0x13c5   :  { %6787 = vmatmul.mubr.msk.f32.vlgmr.msra.gmra.mrb[44].mxu0 %vm669_vm5, %v4772_v0 }
0x13c6   :  { %6795 = vmatpush3.xpose.msk.msra.mxu0 %vm669_vm5, %v8737_v23  ;;  %6796 = vmatprep.mubr.msk.f32.mxu0 %vm7864_vm4, %v7863_v20 }
0x13c7   :  { %6804 = vmatprep.subr.mxu0 %v7863_v20 }
0x13c8   :  { %v5282_v42 = vpop.permute.xlu0 %5281  ;;  %v5280_v14 = vpop.permute.xlu1 %5279 }
0x13c9   :  { %6797 = vmatmul.mubr.msk.f32.vlgmr.msra.gmra.mrb[46].mxu0 %vm669_vm5, %v4183_v29 }
0x13ca   :  { %6805 = vmatpush3.xpose.msk.msra.mxu0 %vm669_vm5, %v5117_v38  ;;  %6806 = vmatprep.mubr.msk.f32.mxu0 %vm7864_vm4, %v7863_v20 }
0x13cb   :  { %6814 = vmatprep.subr.mxu0 %v7863_v20 }
0x13cc   :  { %v5447_v1 = vpop.permute.xlu0 %5446  ;;  %v5445_v44 = vpop.permute.xlu1 %5444 }
0x13cd   :  { %6807 = vmatmul.mubr.msk.f32.vlgmr.msra.gmra.mrb[48].mxu0 %vm669_vm5, %v5115_v41 }
0x13ce   :  { %6815 = vmatpush3.xpose.msk.msra.mxu0 %vm669_vm5, %v5282_v42  ;;  %6816 = vmatprep.mubr.msk.f32.mxu0 %vm7864_vm4, %v7863_v20 }
0x13cf   :  { %6824 = vmatprep.subr.mxu0 %v7863_v20 }
0x13d0   :  { %v4366_v43 = vpop.permute.xlu0 %4365  ;;  %v4531_v19 = vpop.permute.xlu1 %4530 }
0x13d1   :  { %6760 = vmatpush3.msra.mxu1 %v4366_v43  ;;  %6817 = vmatmul.mubr.msk.f32.vlgmr.msra.gmra.mrb[50].mxu0 %vm669_vm5, %v5280_v14 }
0x13d2   :  { %6825 = vmatpush3.xpose.msk.msra.mxu0 %vm669_vm5, %v5447_v1  ;;  %6826 = vmatprep.mubr.msk.f32.mxu0 %vm7864_vm4, %v7863_v20 }
0x13d3   :  { %6769 = vmatprep.subr.mxu1 %v7863_v20 }
0x13d5   :  { %6827 = vmatmul.mubr.msk.f32.vlgmr.msra.gmra.mrb[52].mxu0 %vm669_vm5, %v5445_v44 }
0x141e   :  { %v4350_v45 = vpop.f32.mrb[44].mxu1 }
0x141f   :  { %v4351_v46 = vadd.f32 %v4350_v45, %v8355_v59  ;;  %v6758_v47 = vpop.f32.mrb[45].mxu1 }
0x1421   :  { %v4354_v48 = vsel %vm669_vm5, %v4351_v46, -inf }
0x1422   :  { %4355 = vmax.xlane.f32.xlu0 %v4354_v48 }
0x1490   :  { %v4515_v49 = vpop.f32.mrb[40].mxu0 }
0x1491   :  { %v4516_v50 = vadd.f32 %v4515_v49, %v8355_v59  ;;  %v6768_v51 = vpop.f32.mrb[41].mxu0 }
0x1493   :  { %v4519_v15 = vsel %vm669_vm5, %v4516_v50, -inf }
0x1494   :  { %4520 = vmax.xlane.f32.xlu1 %v4519_v15  ;;  %v4680_v35 = vpop.f32.mrb[42].mxu0 }
0x1495   :  { %v4681_v52 = vadd.f32 %v4680_v35, %v8355_v59  ;;  %v6778_v34 = vpop.f32.mrb[43].mxu0 }
0x1497   :  { %v4684_v39 = vsel %vm669_vm5, %v4681_v52, -inf }
0x1498   :  { %4685 = vmax.xlane.f32.xlu0 %v4684_v39  ;;  %v4845_v53 = vpop.f32.mrb[44].mxu0 }
0x1499   :  { %v4846_v54 = vadd.f32 %v4845_v53, %v8355_v59  ;;  %v6788_v2 = vpop.f32.mrb[45].mxu0 }
0x149b   :  { %v4849_v21 = vsel %vm669_vm5, %v4846_v54, -inf }
0x149c   :  { %4850 = vmax.xlane.f32.xlu0 %v4849_v21  ;;  %v5023_v55 = vpop.f32.mrb[46].mxu0 }
0x149d   :  { %v5024_v56 = vadd.f32 %v5023_v55, %v8365_v11  ;;  %v6798_v57 = vpop.f32.mrb[47].mxu0 }
0x149f   :  { %v5027_v4 = vsel %vm669_vm5, %v5024_v56, -inf }
0x14a0   :  { %5028 = vmax.xlane.f32.xlu1 %v5027_v4  ;;  %v5188_v40 = vpop.f32.mrb[48].mxu0 }
0x14a1   :  { %v5189_v30 = vadd.f32 %v5188_v40, %v8365_v11  ;;  %v6808_v3 = vpop.f32.mrb[49].mxu0 }
0x14a3   :  { %v5192_v37 = vsel %vm669_vm5, %v5189_v30, -inf }
0x14a4   :  { %5193 = vmax.xlane.f32.xlu0 %v5192_v37  ;;  %v5353_v58 = vpop.f32.mrb[50].mxu0 }
0x14a5   :  { %v5354_v59 = vadd.f32 %v5353_v58, %v8365_v11  ;;  %v6818_v60 = vpop.f32.mrb[51].mxu0 }
0x14a7   :  { %v5357_v61 = vsel %vm669_vm5, %v5354_v59, -inf }
0x14a8   :  { %5358 = vmax.xlane.f32.xlu1 %v5357_v61  ;;  %v5518_v62 = vpop.f32.mrb[52].mxu0 }
0x14a9   :  { %v5519_v63 = vadd.f32 %v5518_v62, %v8365_v11  ;;  %v6828_v7 = vpop.f32.mrb[53].mxu0 }
0x14ab   :  { %v5522_v8 = vsel %vm669_vm5, %v5519_v63, -inf }
0x14ac   :  { %5523 = vmax.xlane.f32.xlu0 %v5522_v8 }
0x14af   :  { %v4356_v9 = vpop.xlane.xlu0 %4355 }
0x14b0   :  { %v4357_v10 = vsub.f32 %v4351_v46, %v4356_v9 }
0x14b2   :  { %v4358_v12 = vmul.f32 1.442695, %v4357_v10 }
0x14b4   :  { %7177 = vpow2.f32 %v4358_v12 }
0x14b9   :  { %4860 = vrot.lane.b32.xlu1 %v8739_v5, %s7871_s4 }
0x14be   :  { %v7178_v13 = vpop.eup %7177 }
0x14bf   :  { %v4360_v17 = vsel %vm669_vm5, %v7178_v13, 0.0 }
0x14c2   :  { %4695 = vrot.lane.b32.xlu0 %v8739_v5, %s7870_s16 }
0x14dd   :  { %4361 = vadd.xlane.f32.xlu1 %v4360_v17 }
0x1521   :  { %v4521_v11 = vpop.xlane.xlu1 %4520 }
0x1522   :  { %v4522_v22 = vsub.f32 %v4516_v50, %v4521_v11 }
0x1524   :  { %v4523_v24 = vmul.f32 1.442695, %v4522_v22 }
0x1525   :  { %v4686_v25 = vpop.xlane.xlu0 %4685 }
0x1526   :  { %7179 = vpow2.f32 %v4523_v24  ;;  %v4687_v6 = vsub.f32 %v4681_v52, %v4686_v25 }
0x1528   :  { %v4688_v26 = vmul.f32 1.442695, %v4687_v6 }
0x1529   :  { %v4851_v27 = vpop.xlane.xlu0 %4850 }
0x152a   :  { %7181 = vpow2.f32 %v4688_v26  ;;  %v4852_v28 = vsub.f32 %v4846_v54, %v4851_v27 }
0x152c   :  { %v4853_v5 = vmul.f32 1.442695, %v4852_v28 }
0x152d   :  { %v5029_v38 = vpop.xlane.xlu1 %5028 }
0x152e   :  { %7183 = vpow2.f32 %v4853_v5  ;;  %v5030_v41 = vsub.f32 %v5024_v56, %v5029_v38  ;;  %v5627_v38 = vld [vmem:[#allocation26 + $0x18] sm:$0xff] }
0x1530   :  { %v7180_v29 = vpop.eup %7179  ;;  %v5031_v43 = vmul.f32 1.442695, %v5030_v41 }
0x1531   :  { %v4525_v31 = vsel %vm669_vm5, %v7180_v29, 0.0  ;;  %v5194_v42 = vpop.xlane.xlu0 %5193 }
0x1532   :  { %4526 = vadd.xlane.f32.xlu0 %v4525_v31  ;;  %v5195_v14 = vsub.f32 %v5189_v30, %v5194_v42  ;;  %7185 = vpow2.f32 %v5031_v43 }
0x1534   :  { %v7182_v32 = vpop.eup %7181  ;;  %v5196_v46 = vmul.f32 1.442695, %v5195_v14 }
0x1535   :  { %v4690_v33 = vsel %vm669_vm5, %v7182_v32, 0.0  ;;  %v5359_v1 = vpop.xlane.xlu1 %5358 }
0x1536   :  { %4691 = vadd.xlane.f32.xlu1 %v4690_v33  ;;  %v5360_v44 = vsub.f32 %v5354_v59, %v5359_v1  ;;  %7187 = vpow2.f32 %v5196_v46  ;;  %v5624_v33 = vld [vmem:[#allocation26] sm:$0xff] }
0x1538   :  { %v8826_v36 = vpop.eup %7183  ;;  %v5361_v47 = vmul.f32 1.442695, %v5360_v44 }
0x1539   :  { %v4855_v0 = vsel %vm669_vm5, %v8826_v36, 0.0  ;;  %v5524_v45 = vpop.xlane.xlu0 %5523  ;;  %v4861_v50 = vpop.permute.xlu1 %4860 }
0x153a   :  { %4856 = vadd.xlane.f32.xlu0 %v4855_v0  ;;  %v5525_v48 = vsub.f32 %v5519_v63, %v5524_v45  ;;  %7189 = vpow2.f32 %v5361_v47  ;;  %v5626_v0 = vld [vmem:[#allocation26 + $0x10] sm:$0xff] }
0x153b   :  { %v6978_v41 = vpack.c.bf16 %v5627_v38, %v5626_v0  ;;  %v6275_v0 = vld [vmem:[#allocation29] ss:$0 sm:$0xff] }
0x153c   :  { %v5526_v49 = vmul.f32 1.442695, %v5525_v48  ;;  %v7186_v51 = vpop.eup %7185 }
0x153d   :  { %v5033_v52 = vsel %vm669_vm5, %v7186_v51, 0.0  ;;  %v4696_v56 = vpop.permute.xlu0 %4695 }
0x153e   :  { %7191 = vpow2.f32 %v5526_v49 }
0x1540   :  { %v7188_v15 = vpop.eup %7187 }
0x1541   :  { %v5198_v39 = vsel %vm669_vm5, %v7188_v15, 0.0 }
0x1544   :  { %v8835_v34 = vpop.eup %7189 }
0x1545   :  { %v5363_v53 = vsel %vm669_vm5, %v8835_v34, 0.0 }
0x1547   :  { %5203 = vrot.lane.b32.xlu1 %v8737_v23, %s7868_s15 }
0x1548   :  { %v8840_v54 = vpop.eup %7191 }
0x1549   :  { %v5528_v2 = vsel %vm669_vm5, %v8840_v54, 0.0 }
0x1550   :  { %5038 = vrot.lane.b32.xlu0 %v8737_v23, %s7866_s17 }
0x156a   :  { %v4362_v35 = vpop.xlane.xlu1 %4361 }
0x156b   :  { %7193 = vrcp.f32 %v4362_v35  ;;  %5034 = vadd.xlane.f32.xlu1 %v5033_v52 }
0x156f   :  { %5199 = vadd.xlane.f32.xlu0 %v5198_v39  ;;  %5364 = vadd.xlane.f32.xlu1 %v5363_v53 }
0x1573   :  { %5529 = vadd.xlane.f32.xlu1 %v5528_v2 }
0x1575   :  { %v7194_v21 = vpop.eup %7193 }
0x1576   :  { %v4364_v55 = vmul.f32 %v7194_v21, %v7178_v13  ;;  %v6272_v21 = vld [vmem:[#allocation28] ss:$0 sm:$0xff] }
0x1578   :  { %6762 = vmatmul.mubr.msk.f32.vlgmr.msra.gmra.mrb[46].mxu1 %vm669_vm5, %v4364_v55 }
0x1579   :  { %6770 = vmatpush3.msra.mxu1 %v4531_v19  ;;  %6771 = vmatprep.mubr.msk.f32.mxu1 %vm7864_vm4, %v7863_v20 }
0x157a   :  { %6779 = vmatprep.subr.mxu1 %v7863_v20 }
0x1584   :  { %5533 = vrot.lane.b32.xlu1 %v8737_v23, %s7871_s4 }
0x1585   :  { %5368 = vrot.lane.b32.xlu0 %v8737_v23, %s7870_s16 }
0x15bf   :  { %v4527_v57 = vpop.xlane.xlu0 %4526 }
0x15c0   :  { %7195 = vrcp.f32 %v4527_v57 }
0x15c3   :  { %v4692_v4 = vpop.xlane.xlu1 %4691 }
0x15c4   :  { %7197 = vrcp.f32 %v4692_v4 }
0x15c7   :  { %v4857_v40 = vpop.xlane.xlu0 %4856  ;;  %v5204_v61 = vpop.permute.xlu1 %5203 }
0x15c8   :  { %7199 = vrcp.f32 %v4857_v40 }
0x15ca   :  { %v7196_v30 = vpop.eup %7195 }
0x15cb   :  { %v4529_v3 = vmul.f32 %v7196_v30, %v7180_v29  ;;  %v5039_v60 = vpop.permute.xlu0 %5038 }
0x15cd   :  { %6772 = vmatmul.mubr.msk.f32.vlgmr.msra.gmra.mrb[48].mxu1 %vm669_vm5, %v4529_v3 }
0x15ce   :  { %v7198_v37 = vpop.eup %7197  ;;  %6780 = vmatpush3.msra.mxu1 %v4696_v56  ;;  %6781 = vmatprep.mubr.msk.f32.mxu1 %vm7864_vm4, %v7863_v20 }
0x15cf   :  { %v4694_v58 = vmul.f32 %v7198_v37, %v7182_v32  ;;  %6789 = vmatprep.subr.mxu1 %v7863_v20 }
0x15d1   :  { %6782 = vmatmul.mubr.msk.f32.vlgmr.msra.gmra.mrb[50].mxu1 %vm669_vm5, %v4694_v58 }
0x15d2   :  { %v7200_v23 = vpop.eup %7199  ;;  %6790 = vmatpush3.msra.mxu1 %v4861_v50  ;;  %6791 = vmatprep.mubr.msk.f32.mxu1 %vm7864_vm4, %v7863_v20 }
0x15d3   :  { %v4859_v59 = vmul.f32 %v7200_v23, %v8826_v36  ;;  %6799 = vmatprep.subr.mxu1 %v7863_v20 }
0x15d5   :  { %6792 = vmatmul.mubr.msk.f32.vlgmr.msra.gmra.mrb[52].mxu1 %vm669_vm5, %v4859_v59 }
0x15d6   :  { %6800 = vmatpush3.msra.mxu1 %v5039_v60  ;;  %6801 = vmatprep.mubr.msk.f32.mxu1 %vm7864_vm4, %v7863_v20 }
0x15d7   :  { %6809 = vmatprep.subr.mxu1 %v7863_v20 }
0x15f8   :  { %v5035_v62 = vpop.xlane.xlu1 %5034 }
0x15f9   :  { %7201 = vrcp.f32 %v5035_v62 }
0x15fc   :  { %v5200_v63 = vpop.xlane.xlu0 %5199  ;;  %v5365_v7 = vpop.xlane.xlu1 %5364 }
0x15fd   :  { %7203 = vrcp.f32 %v5200_v63 }
0x15fe   :  { %7205 = vrcp.f32 %v5365_v7 }
0x1600   :  { %v5530_v8 = vpop.xlane.xlu1 %5529  ;;  %v5369_v19 = vpop.permute.xlu0 %5368 }
0x1601   :  { %7207 = vrcp.f32 %v5530_v8  ;;  %v5762_v8 = vld [vmem:[#allocation32] sm:$0xff] }
0x1603   :  { %v7202_v9 = vpop.eup %7201 }
0x1604   :  { %v5037_v10 = vmul.f32 %v7202_v9, %v7186_v51  ;;  %v5534_v24 = vpop.permute.xlu1 %5533  ;;  %v5763_v9 = vld [vmem:[#allocation32 + $0x8] sm:$0xff] }
0x1606   :  { %6802 = vmatmul.mubr.msk.f32.vlgmr.msra.gmra.mrb[54].mxu1 %vm669_vm5, %v5037_v10  ;;  %v6982_v10 = vpack.c.bf16 %v5763_v9, %v5762_v8  ;;  %v6001_v8 = vld [vmem:[%s8083_s5 + $0x18] sm:$0xff] }
0x1607   :  { %v7204_v12 = vpop.eup %7203  ;;  %6810 = vmatpush3.msra.mxu1 %v5204_v61  ;;  %6811 = vmatprep.mubr.msk.f32.mxu1 %vm7864_vm4, %v7863_v20 }
0x1608   :  { %v5202_v13 = vmul.f32 %v7204_v12, %v7188_v15  ;;  %6819 = vmatprep.subr.mxu1 %v7863_v20  ;;  %v7206_v17 = vpop.eup %7205  ;;  %v5764_v12 = vld [vmem:[#allocation32 + $0x10] sm:$0xff] }
0x1609   :  { %v5367_v11 = vmul.f32 %v7206_v17, %v8835_v34 }
0x160a   :  { %6812 = vmatmul.mubr.msk.f32.vlgmr.msra.gmra.mrb[56].mxu1 %vm669_vm5, %v5202_v13  ;;  %v5765_v13 = vld [vmem:[#allocation32 + $0x18] sm:$0xff] }
0x160b   :  { %6820 = vmatpush3.msra.mxu1 %v5369_v19  ;;  %6821 = vmatprep.mubr.msk.f32.mxu1 %vm7864_vm4, %v7863_v20  ;;  %v7208_v22 = vpop.eup %7207  ;;  %v6986_v17 = vpack.c.bf16 %v5765_v13, %v5764_v12  ;;  %v5856_v19 = vld [vmem:[%s8999_s7] sm:$0xff] }
0x160c   :  { %6829 = vmatprep.subr.mxu1 %v7863_v20  ;;  %v5532_v25 = vmul.f32 %v7208_v22, %v8840_v54  ;;  %v5858_v22 = vld [vmem:[%s8999_s7 + $0x10] sm:$0xff] }
0x160e   :  { %6822 = vmatmul.mubr.msk.f32.vlgmr.msra.gmra.mrb[58].mxu1 %vm669_vm5, %v5367_v11  ;;  %v5857_v11 = vld [vmem:[%s8999_s7 + $0x8] sm:$0xff] }
0x160f   :  { %6830 = vmatpush3.msra.mxu1 %v5534_v24  ;;  %6831 = vmatprep.mubr.msk.f32.mxu1 %vm7864_vm4, %v7863_v20  ;;  %v5625_v20 = vld [vmem:[#allocation26 + $0x8] sm:$0xff]  ;;  %v6990_v24 = vpack.c.bf16 %v5857_v11, %v5856_v19 }
0x1610   :  { %v6974_v36 = vpack.c.bf16 %v5625_v20, %v5624_v33  ;;  %6983 = vmatprep.subr.bf16.mxu1 %v6982_v10 }
0x1612   :  { %6832 = vmatmul.mubr.msk.f32.vlgmr.msra.gmra.mrb[60].mxu1 %vm669_vm5, %v5532_v25  ;;  %6975 = vmatprep.subr.bf16.mxu0 %v6974_v36  ;;  %v5859_v25 = vld [vmem:[%s8999_s7 + $0x18] sm:$0xff] }
0x1613   :  { %6977 = vmatpush3.bf16.msra.mxu0 %v6974_v36  ;;  %6985 = vmatpush3.bf16.msra.mxu1 %v6982_v10 }
0x1614   :  { %6979 = vmatprep.subr.bf16.mxu0 %v6978_v41  ;;  %6987 = vmatprep.subr.bf16.mxu1 %v6986_v17 }
0x1617   :  { %6981 = vmatpush3.bf16.msra.mxu0 %v6978_v41  ;;  %6989 = vmatpush3.bf16.msra.mxu1 %v6986_v17  ;;  %v6276_v41 = vld [vmem:[#allocation31] ss:$0 sm:$0xff] }
0x1618   :  { %6991 = vmatprep.subr.bf16.mxu0 %v6990_v24 }
0x164b   :  { %v4437_v6 = vpop.f32.mrb[46].mxu1 }
0x164c   :  { %v6763_v26 = vpop.f32.mrb[47].mxu1 }
0x164d   :  { %v5860_v26 = vld [vmem:[%s8999_s7 + $0x20] sm:$0xff] }
0x16a0   :  { %v4602_v27 = vpop.f32.mrb[48].mxu1 }
0x16a1   :  { %4937 = vrot.lane.b32.xlu0 %v4602_v27, %s7843_s20  ;;  %v6773_v28 = vpop.f32.mrb[49].mxu1  ;;  %v5861_v27 = vld [vmem:[%s8999_s7 + $0x28] sm:$0xff] }
0x16a2   :  { %v6998_v28 = vpack.c.bf16 %v5861_v27, %v5860_v26 }
0x16a4   :  { %v4767_v5 = vpop.f32.mrb[50].mxu1 }
0x16a5   :  { %4941 = vrot.lane.b32.xlu1 %v4767_v5, %s7877_s30  ;;  %v6783_v29 = vpop.f32.mrb[51].mxu1 }
0x16a8   :  { %v4932_v31 = vpop.f32.mrb[52].mxu1 }
0x16a9   :  { %4945 = vrot.lane.b32.xlu1 %v4932_v31, %s7878_s28  ;;  %v6793_v32 = vpop.f32.mrb[53].mxu1 }
0x16d9   :  { %v5110_v42 = vpop.f32.mrb[54].mxu1 }
0x16da   :  { %v6803_v1 = vpop.f32.mrb[55].mxu1 }
0x16dd   :  { %v5275_v14 = vpop.f32.mrb[56].mxu1 }
0x16de   :  { %5610 = vrot.lane.b32.xlu0 %v5275_v14, %s7843_s20  ;;  %v6813_v43 = vpop.f32.mrb[57].mxu1 }
0x16e1   :  { %v5440_v44 = vpop.f32.mrb[58].mxu1 }
0x16e2   :  { %5614 = vrot.lane.b32.xlu0 %v5440_v44, %s7877_s30  ;;  %v6823_v45 = vpop.f32.mrb[59].mxu1 }
0x16e5   :  { %v5605_v46 = vpop.f32.mrb[60].mxu1 }
0x16e6   :  { %5618 = vrot.lane.b32.xlu1 %v5605_v46, %s7878_s28  ;;  %v6833_v47 = vpop.f32.mrb[61].mxu1  ;;  %v5862_v46 = vld [vmem:[%s8999_s7 + $0x30] sm:$0xff] }
0x16e7   :  { %v5863_v47 = vld [vmem:[%s8999_s7 + $0x38] sm:$0xff] }
0x1713   :  { %v4938_v48 = vpop.permute.xlu0 %4937 }
0x1714   :  { %v4948_v50 = vsel %vm669_vm5, %v4437_v6, %v4938_v48  ;;  %v6994_v6 = vpack.c.bf16 %v5859_v25, %v5858_v22  ;;  %v7002_v48 = vpack.c.bf16 %v5863_v47, %v5862_v46 }
0x1717   :  { %v4942_v49 = vpop.permute.xlu1 %4941 }
0x1718   :  { %v4949_v51 = vsel %vm1339_vm7, %v4948_v50, %v4942_v49  ;;  %v6277_v49 = vld [vmem:[#allocation34] ss:$0 sm:$0xff] }
0x171b   :  { %v4946_v15 = vpop.permute.xlu1 %4945 }
0x171c   :  { %v4950_v35 = vsel %vm1341_vm8, %v4949_v51, %v4946_v15 }
0x171d   :  { %6842 = vmatprep.mubr.msk.f32.mxu0 %vm482_vm1, %v4950_v35 }
0x1750   :  { %v5611_v52 = vpop.permute.xlu0 %5610 }
0x1751   :  { %v5621_v39 = vsel %vm669_vm5, %v5110_v42, %v5611_v52 }
0x1754   :  { %v5615_v34 = vpop.permute.xlu0 %5614 }
0x1755   :  { %v5622_v53 = vsel %vm1339_vm7, %v5621_v39, %v5615_v34  ;;  %v6280_v39 = vld [vmem:[#allocation35] ss:$0 sm:$0xff] }
0x1758   :  { %v5619_v54 = vpop.permute.xlu1 %5618 }
0x1759   :  { %v5623_v2 = vsel %vm1341_vm8, %v5622_v53, %v5619_v54 }
0x175a   :  { %6843 = vmatmul.mubr.msk.f32.vlgmr.msra.gmra.mrb[54].mxu0 %vm482_vm1, %v5623_v2 }
0x175b   :  { %6993 = vmatpush3.bf16.msra.mxu0 %v6990_v24  ;;  %v6283_v24 = vld [vmem:[#allocation37] ss:$0 sm:$0xff] }
0x175c   :  { %6995 = vmatprep.subr.bf16.mxu0 %v6994_v6 }
0x175f   :  { %6997 = vmatpush3.bf16.msra.mxu0 %v6994_v6 }
0x1760   :  { %6999 = vmatprep.subr.bf16.mxu0 %v6998_v28 }
0x1763   :  { %7001 = vmatpush3.bf16.msra.mxu0 %v6998_v28  ;;  %v6284_v28 = vld [vmem:[#allocation38] ss:$0 sm:$0xff] }
0x1764   :  { %7003 = vmatprep.subr.bf16.mxu0 %v7002_v48 }
0x1767   :  { %7005 = vmatpush3.bf16.msra.mxu0 %v7002_v48 }
0x182d   :  { %v6844_v55 = vpop.f32.mrb[54].mxu0 }
0x182e   :  { %v5713_v56 = vadd.f32 %v6844_v55, %v6272_v21  ;;  %v5707_v57 = vpop.f32.mrb[55].mxu0 }
0x182f   :  { %v5708_v4 = vadd.f32 %v6272_v21, %v5707_v57 }
0x1830   :  { %v5717_v40 = vadd.f32 %v5713_v56, %v8731_v18 }
0x1831   :  { %v5716_v30 = vadd.f32 %v5708_v4, %v8727_v16 }
0x1832   :  { %v5721_v3 = vsel %vm482_vm1, %v5717_v40, 0.0 }
0x1833   :  { %5722 = vadd.xlane.f32.xlu1 %v5721_v3  ;;  %v5718_v37 = vsel %vm482_vm1, %v5716_v30, 0.0 }
0x1834   :  { %5719 = vadd.xlane.f32.xlu0 %v5718_v37 }
0x18c0   :  { %v5723_v58 = vpop.xlane.xlu1 %5722 }
0x18c1   :  { %v5725_v23 = vmul.f32 0.03125, %v5723_v58  ;;  %v5720_v59 = vpop.xlane.xlu0 %5719 }
0x18c2   :  { %v5724_v60 = vmul.f32 0.03125, %v5720_v59 }
0x18c3   :  { %v5727_v61 = vsub.f32 %v5717_v40, %v5725_v23 }
0x18c4   :  { %v5726_v62 = vsub.f32 %v5716_v30, %v5724_v60 }
0x18c5   :  { %v5729_v18 = vmul.f32 %v5727_v61, %v5727_v61 }
0x18c6   :  { %v5728_v63 = vmul.f32 %v5726_v62, %v5726_v62 }
0x18c7   :  { %v5733_v16 = vsel %vm482_vm1, %v5729_v18, 0.0 }
0x18c8   :  { %v5730_v7 = vsel %vm482_vm1, %v5728_v63, 0.0  ;;  %v5998_v63 = vld [vmem:[%s8083_s5] sm:$0xff] }
0x18c9   :  { %5731 = vadd.xlane.f32.xlu0 %v5730_v7  ;;  %v5999_v7 = vld [vmem:[%s8083_s5 + $0x8] sm:$0xff] }
0x18ca   :  { %v7006_v18 = vpack.c.bf16 %v5999_v7, %v5998_v63 }
0x18cc   :  { %7007 = vmatprep.subr.bf16.mxu1 %v7006_v18 }
0x18cd   :  { %5734 = vadd.xlane.f32.xlu0 %v5733_v16  ;;  %v6000_v16 = vld [vmem:[%s8083_s5 + $0x10] sm:$0xff]  ;;  %s7879_s5 = smov [#allocation40]  }
0x18ce   :  { %v7010_v9 = vpack.c.bf16 %v6001_v8, %v6000_v16  ;;  %s6097_s0 = sshll.u32 %s7879_s5, 4  ;;  %s6098_s0 = int_to_ptr.vmem [resolvable:$true] %s6097_s0 }
0x18cf   :  { %s7745_s10 = scalar_lea.vmem %s6098_s0, 256  ;;  %p7750_p11 = scmp.lt.s32.totalorder %s6098_s0, %s6098_s0 }
0x18d0   :  { %p7746_p10 = scmp.ne.s32.totalorder %s6098_s0, %s7745_s10  ;;  %p7751_p12 = scmp.lt.s32.totalorder %s7745_s10, %s7745_s10 }
0x18d2   :  { %p7752_p13 = por %p7751_p12, %p7750_p11 }
0x18d4   :  { %p7753_p0 = pnand %p7752_p13, %p7746_p10 }
0x1956   :  { %v5732_v5 = vpop.xlane.xlu0 %5731 }
0x1957   :  { %v5736_v29 = vmul.f32 0.03125, %v5732_v5 }
0x1959   :  { %v5738_v31 = vadd.f32 1e-05, %v5736_v29 }
0x195a   :  { %v5735_v32 = vpop.xlane.xlu0 %5734 }
0x195b   :  { %7209 = vrsqrt.f32 %v5738_v31  ;;  %v5737_v33 = vmul.f32 0.03125, %v5735_v32  ;;  %v6285_v32 = vld [vmem:[%s8088_s25] ss:$0 sm:$0xff] }
0x195d   :  { %v5739_v20 = vadd.f32 1e-05, %v5737_v33 }
0x195f   :  { %7211 = vrsqrt.f32 %v5739_v20 }
0x1965   :  { %v7210_v36 = vpop.eup %7209 }
0x1966   :  { %v5742_v38 = vmul.f32 %v7210_v36, %v5726_v62 }
0x1968   :  { %v5751_v42 = vmul.f32 %v6275_v0, %v5742_v38 }
0x1969   :  { %v7212_v1 = vpop.eup %7211 }
0x196a   :  { %v5743_v14 = vmul.f32 %v7212_v1, %v5727_v61  ;;  %v5760_v43 = vadd.f32 %v6276_v41, %v5751_v42 }
0x196c   :  { %v5752_v44 = vmul.f32 %v6275_v0, %v5743_v14  ;;  %6853 = vmatprep.mubr.msk.f32.mxu1 %vm482_vm1, %v5760_v43 }
0x196e   :  { %v5761_v45 = vadd.f32 %v6276_v41, %v5752_v44 }
0x1970   :  { %6854 = vmatmul.mubr.msk.f32.vlgmr.msra.gmra.mrb[62].mxu1 %vm482_vm1, %v5761_v45 }
0x1971   :  { %7009 = vmatpush3.bf16.msra.mxu1 %v7006_v18 }
0x1972   :  { %7011 = vmatprep.subr.bf16.mxu1 %v7010_v9 }
0x1975   :  { %7013 = vmatpush3.bf16.msra.mxu1 %v7010_v9 }
0x1a43   :  { %v6855_v50 = vpop.f32.mrb[62].mxu1 }
0x1a44   :  { %v5851_v51 = vadd.f32 %v6855_v50, %v6277_v49  ;;  %v5845_v15 = vpop.f32.mrb[63].mxu1 }
0x1a45   :  { %v5846_v35 = vadd.f32 %v6277_v49, %v5845_v15 }
0x1a46   :  { %v5855_v34 = vmax.f32 %v5851_v51, 0.0 }
0x1a47   :  { %v5854_v52 = vmax.f32 %v5846_v35, 0.0 }
0x1a49   :  { %6872 = vmatprep.mubr.msk.f32.mxu0 %vm2269_vm11, %v5854_v52 }
0x1a4a   :  { %6873 = vmatmul.mubr.msk.f32.vlgmr.msra.gmra.mrb[56].mxu0 %vm2269_vm11, %v5855_v34 }
0x1b1d   :  { %v6874_v53 = vpop.f32.mrb[56].mxu0 }
0x1b1e   :  { %v5949_v54 = vadd.f32 %v6874_v53, %v6280_v39  ;;  %v5943_v2 = vpop.f32.mrb[57].mxu0 }
0x1b1f   :  { %v5944_v21 = vadd.f32 %v6280_v39, %v5943_v2 }
0x1b20   :  { %v5953_v55 = vadd.f32 %v5949_v54, %v5761_v45 }
0x1b21   :  { %v5952_v56 = vadd.f32 %v5944_v21, %v5760_v43 }
0x1b22   :  { %v5957_v57 = vsel %vm482_vm1, %v5953_v55, 0.0 }
0x1b23   :  { %5958 = vadd.xlane.f32.xlu0 %v5957_v57  ;;  %v5954_v4 = vsel %vm482_vm1, %v5952_v56, 0.0 }
0x1b24   :  { %5955 = vadd.xlane.f32.xlu1 %v5954_v4 }
0x1bb0   :  { %v5959_v40 = vpop.xlane.xlu0 %5958 }
0x1bb1   :  { %v5961_v30 = vmul.f32 0.03125, %v5959_v40  ;;  %v5956_v3 = vpop.xlane.xlu1 %5955 }
0x1bb2   :  { %v5960_v37 = vmul.f32 0.03125, %v5956_v3 }
0x1bb3   :  { %v5963_v58 = vsub.f32 %v5953_v55, %v5961_v30 }
0x1bb4   :  { %v5962_v23 = vsub.f32 %v5952_v56, %v5960_v37 }
0x1bb5   :  { %v5965_v59 = vmul.f32 %v5963_v58, %v5963_v58 }
0x1bb6   :  { %v5964_v60 = vmul.f32 %v5962_v23, %v5962_v23 }
0x1bb7   :  { %v5969_v61 = vsel %vm482_vm1, %v5965_v59, 0.0 }
0x1bb8   :  { %5970 = vadd.xlane.f32.xlu0 %v5969_v61  ;;  %v5966_v62 = vsel %vm482_vm1, %v5964_v60, 0.0 }
0x1bb9   :  { %5967 = vadd.xlane.f32.xlu1 %v5966_v62 }
0x1c45   :  { %v5971_v10 = vpop.xlane.xlu0 %5970 }
0x1c46   :  { %v5973_v12 = vmul.f32 0.03125, %v5971_v10  ;;  %v5968_v13 = vpop.xlane.xlu1 %5967 }
0x1c47   :  { %v5972_v17 = vmul.f32 0.03125, %v5968_v13 }
0x1c48   :  { %v5975_v19 = vadd.f32 1e-05, %v5973_v12 }
0x1c49   :  { %v5974_v11 = vadd.f32 1e-05, %v5972_v17 }
0x1c4a   :  { %7213 = vrsqrt.f32 %v5975_v19 }
0x1c4b   :  { %7215 = vrsqrt.f32 %v5974_v11 }
0x1c54   :  { %v7214_v22 = vpop.eup %7213 }
0x1c55   :  { %v7216_v25 = vpop.eup %7215  ;;  %v5979_v6 = vmul.f32 %v7214_v22, %v5963_v58 }
0x1c56   :  { %v5978_v26 = vmul.f32 %v7216_v25, %v5962_v23 }
0x1c57   :  { %v5988_v27 = vmul.f32 %v6283_v24, %v5979_v6 }
0x1c58   :  { %v5987_v5 = vmul.f32 %v6283_v24, %v5978_v26 }
0x1c59   :  { %v5997_v31 = vadd.f32 %v6284_v28, %v5988_v27 }
0x1c5a   :  { %v5996_v29 = vadd.f32 %v6284_v28, %v5987_v5 }
0x1c5c   :  { %6883 = vmatprep.mubr.msk.f32.mxu1 %vm482_vm1, %v5996_v29 }
0x1c5d   :  { %6884 = vmatmul.mubr.msk.f32.vlgmr.msra.gmra.mrb[64].mxu1 %vm482_vm1, %v5997_v31 }
0x1d30   :  { %v6885_v33 = vpop.f32.mrb[64].mxu1 }
0x1d31   :  { %v6087_v20 = vadd.f32 %v6885_v33, %v6285_v32  ;;  %v6081_v36 = vpop.f32.mrb[65].mxu1 }
0x1d32   :  { %v6082_v0 = vadd.f32 %v6285_v32, %v6081_v36 }
0x1d33   :  { %6091 = vst.msk [vmem:[#allocation40 + $0x8] sm:$0xff] %vm482_vm1, %v6087_v20 }
0x1d34   :  { %6090 = vst.msk [vmem:[#allocation40] sm:$0xff] %vm482_vm1, %v6082_v0 }
0x1d35   :  { %7756 = shalt.err (!%p7753_p0)
}
0x1d36   :  { %s7757_s25 = scalar_lea.hbm %s8093_s14, 256 }
0x1d37   :  { %p7758_p1 = scmp.ne.s32.totalorder %s8093_s14, %s7757_s25  ;;  %p7761_p2 = scmp.lt.u32.totalorder %s7757_s25, %s8093_s14 }
0x1d39   :  { %p7763_p3 = pnand %p7761_p2, %p7758_p1 }
0x1d3b   :  { %7766 = shalt.err (!%p7763_p3)
}
0x1d3c   :  { %6103 = dma.vmem_to_hbm [thread:$0]  %s6098_s0, 256, %s8093_s14, [#allocation4], %s7842_s1, %s7842_s1, %s7843_s20  }
0x1d3d   :  { %7793 = dma.done.wait [#allocation4], 256  }
0x1d3e   :  { %7794 = vsyncadd [#allocation4], 4294967040 }
0x1d3f   :  { %6107 = vsyncpa [#allocation3], 1 }
0x1d40   :  { %6108 = vsyncpa [#allocation6], 1 }
0x1d41   :  { %6109 = vsyncpa [#allocation9], 1 }
0x1d42   :  { %6110 = vsyncpa [#allocation12], 1 }
0x1d43   :  { %6111 = vsyncpa [#allocation15], 1 }
0x1d44   :  { %6112 = vsyncpa [#allocation18], 1 }
0x1d45   :  { %6113 = vsyncpa [#allocation21], 1 }
0x1d46   :  { %6114 = vsyncpa [#allocation24], 1 }
0x1d47   :  { %6115 = vsyncpa [#allocation27], 1 }
0x1d48   :  { %6116 = vsyncpa [#allocation30], 1 }
0x1d49   :  { %6117 = vsyncpa [#allocation33], 1 }
0x1d4a   :  { %6118 = vsyncpa [#allocation36], 1 }
0x1d4b   :  { %6119 = vsyncpa [#allocation39], 1 }
0x1d4c   :  { %6120 = vsyncpa [#allocation4], 1 }

</bundles_post_ra>
